<compile_context>
chip_gen: v7x
topology: tpu7x:2x2x1
jax: 0.10.0
libtpu: 0.0.40
codegen_flags: <defaults>
</compile_context>

<pallas_src>
import math
import functools

import jax
import jax.numpy as jnp
from jax.experimental import pallas as pl
from jax.experimental.pallas import tpu as pltpu


# -----------------------------------------------------------------------------
# Tiling helper
# -----------------------------------------------------------------------------
def _tile(dim, target, align):
    """Largest multiple of `align` that divides `dim` and is <= target.

    Falls back to the full dimension (always a legal block) if no aligned
    divisor exists.
    TODO(synk): for v7x's 64 MiB VMEM, pad ragged dims to (16, 128) multiples
    instead of falling back to a full-dim block.
    """
    if dim <= target:
        return dim
    best = 0
    t = align
    while t <= target:
        if dim % t == 0:
            best = t
        t += align
    return best if best else dim


def _row_align(dtype):
    # bf16 packs 2 rows per sublane -> align row tiles to 16, f32 to 8.
    return 16 if jnp.dtype(dtype).itemsize == 2 else 8


# -----------------------------------------------------------------------------
# Plain tiled matmul (f32 VMEM accumulator)
# -----------------------------------------------------------------------------
def _mm_kernel_nn(a_ref, b_ref, o_ref, acc_ref):
    @pl.when(pl.program_id(2) == 0)
    def _():
        acc_ref[...] = jnp.zeros_like(acc_ref)

    acc_ref[...] += jnp.dot(a_ref[...], b_ref[...],
                            preferred_element_type=jnp.float32)

    @pl.when(pl.program_id(2) == pl.num_programs(2) - 1)
    def _():
        o_ref[...] = acc_ref[...].astype(o_ref.dtype)


def pallas_matmul(a, b, *, out_dtype=None,
                  tm_target=512, tn_target=512, tk_target=512):
    """a: [M, K] @ b: [K, N] -> [M, N]."""
    M, K = a.shape
    Kb, N = b.shape
    assert K == Kb
    out_dtype = out_dtype or a.dtype

    tm = _tile(M, tm_target, _row_align(a.dtype))
    tn = _tile(N, tn_target, 128)
    tk = _tile(K, tk_target, 128)
    grid = (M // tm, N // tn, K // tk)

    bytes_accessed = int(a.size * a.dtype.itemsize + b.size * b.dtype.itemsize
                         + M * N * jnp.dtype(out_dtype).itemsize)
    return pl.pallas_call(
        _mm_kernel_nn,
        out_shape=jax.ShapeDtypeStruct((M, N), out_dtype),
        grid=grid,
        in_specs=[pl.BlockSpec((tm, tk), lambda i, j, k: (i, k)),
                  pl.BlockSpec((tk, tn), lambda i, j, k: (k, j))],
        out_specs=pl.BlockSpec((tm, tn), lambda i, j, k: (i, j)),
        scratch_shapes=[pltpu.VMEM((tm, tn), jnp.float32)],
        compiler_params=pltpu.CompilerParams(
            dimension_semantics=("parallel", "parallel", "arbitrary")),
        cost_estimate=pl.CostEstimate(flops=2 * M * N * K, transcendentals=0,
                                      bytes_accessed=bytes_accessed),
    )(a, b)


# -----------------------------------------------------------------------------
# Fused QKV matmul: [M, K] x [3, K, H] -> [3, M, H]  (head-ready layout)
# -----------------------------------------------------------------------------
def _qkv_kernel(a_ref, w_ref, o_ref, acc_ref):
    @pl.when(pl.program_id(3) == 0)
    def _():
        acc_ref[...] = jnp.zeros_like(acc_ref)

    acc_ref[...] += jnp.dot(a_ref[...], w_ref[...],
                            preferred_element_type=jnp.float32)

    @pl.when(pl.program_id(3) == pl.num_programs(3) - 1)
    def _():
        o_ref[...] = acc_ref[...].astype(o_ref.dtype)


def pallas_qkv_matmul(a, w3, *, out_dtype=None,
                      tm_target=512, tn_target=512, tk_target=512):
    """a: [M, K], w3: [3, K, H] -> [3, M, H] (q / k / v stacked, no splits)."""
    M, K = a.shape
    n_split, Kb, N = w3.shape
    assert K == Kb
    out_dtype = out_dtype or a.dtype

    tm = _tile(M, tm_target, _row_align(a.dtype))
    tn = _tile(N, tn_target, 128)
    tk = _tile(K, tk_target, 128)
    grid = (n_split, M // tm, N // tn, K // tk)

    bytes_accessed = int(a.size * a.dtype.itemsize + w3.size * w3.dtype.itemsize
                         + n_split * M * N * jnp.dtype(out_dtype).itemsize)
    return pl.pallas_call(
        _qkv_kernel,
        out_shape=jax.ShapeDtypeStruct((n_split, M, N), out_dtype),
        grid=grid,
        in_specs=[pl.BlockSpec((tm, tk), lambda s, i, j, k: (i, k)),
                  pl.BlockSpec((None, tk, tn), lambda s, i, j, k: (s, k, j))],
        out_specs=pl.BlockSpec((None, tm, tn), lambda s, i, j, k: (s, i, j)),
        scratch_shapes=[pltpu.VMEM((tm, tn), jnp.float32)],
        compiler_params=pltpu.CompilerParams(
            dimension_semantics=("parallel", "parallel", "parallel", "arbitrary")),
        cost_estimate=pl.CostEstimate(flops=2 * n_split * M * N * K,
                                      transcendentals=0,
                                      bytes_accessed=bytes_accessed),
    )(a, w3)


# -----------------------------------------------------------------------------
# Fused gate/up matmul with SwiGLU epilogue: silu(x @ wg) * (x @ wu)
# -----------------------------------------------------------------------------
def _swiglu_kernel(a_ref, wg_ref, wu_ref, o_ref, accg_ref, accu_ref):
    @pl.when(pl.program_id(2) == 0)
    def _():
        accg_ref[...] = jnp.zeros_like(accg_ref)
        accu_ref[...] = jnp.zeros_like(accu_ref)

    a = a_ref[...]
    accg_ref[...] += jnp.dot(a, wg_ref[...], preferred_element_type=jnp.float32)
    accu_ref[...] += jnp.dot(a, wu_ref[...], preferred_element_type=jnp.float32)

    @pl.when(pl.program_id(2) == pl.num_programs(2) - 1)
    def _():
        g = accg_ref[...]
        silu_g = g * (1.0 / (1.0 + jnp.exp(-g)))
        o_ref[...] = (silu_g * accu_ref[...]).astype(o_ref.dtype)


def pallas_swiglu(a, wg, wu, *, out_dtype=None,
                  tm_target=512, tn_target=512, tk_target=512):
    """a: [M, K], wg/wu: [K, I] -> silu(a@wg) * (a@wu): [M, I]."""
    M, K = a.shape
    Kb, N = wg.shape
    assert K == Kb and wu.shape == wg.shape
    out_dtype = out_dtype or a.dtype

    tm = _tile(M, tm_target, _row_align(a.dtype))
    tn = _tile(N, tn_target, 128)
    tk = _tile(K, tk_target, 128)
    grid = (M // tm, N // tn, K // tk)

    bytes_accessed = int(a.size * a.dtype.itemsize
                         + 2 * wg.size * wg.dtype.itemsize
                         + M * N * jnp.dtype(out_dtype).itemsize)
    return pl.pallas_call(
        _swiglu_kernel,
        out_shape=jax.ShapeDtypeStruct((M, N), out_dtype),
        grid=grid,
        in_specs=[pl.BlockSpec((tm, tk), lambda i, j, k: (i, k)),
                  pl.BlockSpec((tk, tn), lambda i, j, k: (k, j)),
                  pl.BlockSpec((tk, tn), lambda i, j, k: (k, j))],
        out_specs=pl.BlockSpec((tm, tn), lambda i, j, k: (i, j)),
        scratch_shapes=[pltpu.VMEM((tm, tn), jnp.float32),
                        pltpu.VMEM((tm, tn), jnp.float32)],
        compiler_params=pltpu.CompilerParams(
            dimension_semantics=("parallel", "parallel", "arbitrary")),
        cost_estimate=pl.CostEstimate(flops=4 * M * N * K,
                                      transcendentals=M * N,
                                      bytes_accessed=bytes_accessed),
    )(a, wg, wu)


# -----------------------------------------------------------------------------
# RMSNorm (row-tiled)
# -----------------------------------------------------------------------------
def pallas_rmsnorm(x, w, eps=1e-6, out_dtype=None, tm_target=512):
    M, H = x.shape
    out_dtype = out_dtype or x.dtype
    w2 = w.reshape(1, H).astype(jnp.float32)
    tm = _tile(M, tm_target, _row_align(x.dtype))

    def kernel(x_ref, w_ref, o_ref):
        xf = x_ref[...].astype(jnp.float32)
        var = jnp.mean(xf * xf, axis=-1, keepdims=True)
        o_ref[...] = (xf * jax.lax.rsqrt(var + eps) * w_ref[...]).astype(o_ref.dtype)

    return pl.pallas_call(
        kernel,
        out_shape=jax.ShapeDtypeStruct((M, H), out_dtype),
        grid=(M // tm,),
        in_specs=[pl.BlockSpec((tm, H), lambda i: (i, 0)),
                  pl.BlockSpec((1, H), lambda i: (0, 0))],
        out_specs=pl.BlockSpec((tm, H), lambda i: (i, 0)),
        compiler_params=pltpu.CompilerParams(dimension_semantics=("parallel",)),
    )(x, w2)


# -----------------------------------------------------------------------------
# Head-packed flash attention with in-kernel RoPE, key-padding + causal mask,
# causal block skipping and a lane-dense (B, S, H) output.
# -----------------------------------------------------------------------------
_NEG_INF = -0.7 * float(jnp.finfo(jnp.float32).max)


def pallas_mha(qkv3, pad3, rope_q, rope_k, *, num_heads, causal,
               tq_target=128, tk_target=128):
    """qkv3: [3, B, S, H] (q/k/v stacked).  pad3: [B, 1, S] int32 (1 = valid key).
    rope_q / rope_k: (cos, sin), each [S, H//2] f32; rope_q tables are
    pre-scaled by 1/sqrt(head_dim) so no per-block scale multiply is needed.
    Returns [B, S, H]."""
    three, B, S, H = qkv3.shape
    assert three == 3
    nH = num_heads
    Dh = H // nH
    assert Dh % 2 == 0
    D2 = Dh // 2
    cos_q, sin_q = rope_q
    cos_k, sin_k = rope_k

    tq = _tile(S, tq_target, _row_align(qkv3.dtype))
    tk = _tile(S, tk_target, 128)
    grid = (B, S // tq, S // tk)
    nkv = S // tk

    def kernel(pad_ref, cq_ref, sq_ref, ck_ref, sk_ref,
               q_ref, k_ref, v_ref, o_ref, m_scr, l_scr, acc_scr):
        qi = pl.program_id(1)
        ki = pl.program_id(2)

        @pl.when(ki == 0)
        def _():
            m_scr[...] = jnp.full_like(m_scr, -jnp.inf)
            l_scr[...] = jnp.zeros_like(l_scr)
            acc_scr[...] = jnp.zeros_like(acc_scr)

        def compute():
            qf = q_ref[...].astype(jnp.float32)      # (tq, H)
            kf = k_ref[...].astype(jnp.float32)      # (tk, H)
            v_all = v_ref[...]                       # (tk, H) bf16
            cq_all = cq_ref[...]
            sq_all = sq_ref[...]
            ck_all = ck_ref[...]
            sk_all = sk_ref[...]

            kv_ok = pad_ref[...] > 0                 # (1, tk)
            if causal:
                q_pos = qi * tq + jax.lax.broadcasted_iota(jnp.int32, (tq, tk), 0)
                k_pos = ki * tk + jax.lax.broadcasted_iota(jnp.int32, (tq, tk), 1)
                allowed = (q_pos >= k_pos) & kv_ok
            else:
                allowed = kv_ok

            cdt = q_ref.dtype
            for h in range(nH):
                c0 = h * Dh
                r0 = h * D2
                q1 = qf[:, c0:c0 + D2]
                q2 = qf[:, c0 + D2:c0 + Dh]
                k1 = kf[:, c0:c0 + D2]
                k2 = kf[:, c0 + D2:c0 + Dh]
                cq = cq_all[:, r0:r0 + D2]
                sq = sq_all[:, r0:r0 + D2]
                ck = ck_all[:, r0:r0 + D2]
                sk = sk_all[:, r0:r0 + D2]

                # RoPE (half-rotation); 1/sqrt(Dh) already folded into cq/sq.
                q1r = (q1 * cq - q2 * sq).astype(cdt)
                q2r = (q2 * cq + q1 * sq).astype(cdt)
                k1r = (k1 * ck - k2 * sk).astype(cdt)
                k2r = (k2 * ck + k1 * sk).astype(cdt)

                s = (jax.lax.dot_general(q1r, k1r, (((1,), (1,)), ((), ())),
                                         preferred_element_type=jnp.float32)
                     + jax.lax.dot_general(q2r, k2r, (((1,), (1,)), ((), ())),
                                           preferred_element_type=jnp.float32))
                s = jnp.where(allowed, s, _NEG_INF)

                # Online softmax with per-head state replicated across the
                # head's Dh columns -> the final normalization / store is a
                # single dense (tq, H) op.
                m_prev = m_scr[:, c0:c0 + Dh]                       # (tq, Dh)
                m_new = jnp.maximum(m_prev, jnp.max(s, axis=-1, keepdims=True))
                alpha = jnp.exp(m_prev - m_new)
                p = jnp.exp(s - m_new[:, :1])                       # (tq, tk)
                l_scr[:, c0:c0 + Dh] = (alpha * l_scr[:, c0:c0 + Dh]
                                        + jnp.sum(p, axis=-1, keepdims=True))
                acc_scr[:, c0:c0 + Dh] = (
                    alpha * acc_scr[:, c0:c0 + Dh]
                    + jnp.dot(p.astype(v_all.dtype), v_all[:, c0:c0 + Dh],
                              preferred_element_type=jnp.float32))
                m_scr[:, c0:c0 + Dh] = m_new

        if causal:
            # Skip KV blocks that lie entirely above the causal diagonal.
            @pl.when(ki * tk <= qi * tq + (tq - 1))
            def _():
                compute()
        else:
            compute()

        @pl.when(ki == nkv - 1)
        def _():
            o_ref[...] = (acc_scr[...] *
                          pl.reciprocal(l_scr[...], approx=True)).astype(o_ref.dtype)

    Hh = nH * D2
    bytes_accessed = int(3 * B * S * H * qkv3.dtype.itemsize
                         + B * S * H * qkv3.dtype.itemsize
                         + pad3.size * 4 + 4 * S * Hh * 4)
    return pl.pallas_call(
        kernel,
        out_shape=jax.ShapeDtypeStruct((B, S, H), qkv3.dtype),
        grid=grid,
        in_specs=[
            pl.BlockSpec((None, 1, tk), lambda b, qi, ki: (b, 0, ki)),
            pl.BlockSpec((tq, Hh), lambda b, qi, ki: (qi, 0)),
            pl.BlockSpec((tq, Hh), lambda b, qi, ki: (qi, 0)),
            pl.BlockSpec((tk, Hh), lambda b, qi, ki: (ki, 0)),
            pl.BlockSpec((tk, Hh), lambda b, qi, ki: (ki, 0)),
            pl.BlockSpec((None, None, tq, H), lambda b, qi, ki: (0, b, qi, 0)),
            pl.BlockSpec((None, None, tk, H), lambda b, qi, ki: (1, b, ki, 0)),
            pl.BlockSpec((None, None, tk, H), lambda b, qi, ki: (2, b, ki, 0)),
        ],
        out_specs=pl.BlockSpec((None, tq, H), lambda b, qi, ki: (b, qi, 0)),
        scratch_shapes=[pltpu.VMEM((tq, H), jnp.float32),
                        pltpu.VMEM((tq, H), jnp.float32),
                        pltpu.VMEM((tq, H), jnp.float32)],
        compiler_params=pltpu.CompilerParams(
            dimension_semantics=("parallel", "parallel", "arbitrary")),
        cost_estimate=pl.CostEstimate(flops=4 * B * nH * S * S * Dh,
                                      transcendentals=B * nH * S * S,
                                      bytes_accessed=bytes_accessed),
    )(pad3, cos_q, sin_q, cos_k, sin_k, qkv3, qkv3, qkv3)


# -----------------------------------------------------------------------------
# Model glue (plain JAX around the Pallas kernels)
# -----------------------------------------------------------------------------
def rope_tables(S, num_heads, head_dim, theta, q_scale):
    """Returns ((cos_q, sin_q), (cos_k, sin_k)), each [S, num_heads*head_dim//2].
    The q tables are pre-multiplied by 1/sqrt(head_dim)."""
    inv_freq = 1.0 / (theta ** (jnp.arange(0, head_dim, 2, dtype=jnp.float32)
                                / head_dim))
    ang = jnp.arange(S, dtype=jnp.float32)[:, None] * inv_freq[None, :]  # [S, D/2]
    cos = jnp.tile(jnp.cos(ang), (1, num_heads))                         # [S, H/2]
    sin = jnp.tile(jnp.sin(ang), (1, num_heads))
    return (cos * q_scale, sin * q_scale), (cos, sin)


def transformer_layer(p, x, pad3, rope_q, rope_k, num_heads, causal):
    B, S, H = x.shape
    h = pallas_rmsnorm(x.reshape(-1, H), p['ln1'], out_dtype=x.dtype)
    qkv3 = pallas_qkv_matmul(h, p['wqkv']).reshape(3, B, S, H)  # head-ready
    attn = pallas_mha(qkv3, pad3, rope_q, rope_k,
                      num_heads=num_heads, causal=causal)       # [B, S, H]
    x = x + pallas_matmul(attn.reshape(-1, H), p['wo']).reshape(B, S, H)

    h2 = pallas_rmsnorm(x.reshape(-1, H), p['ln2'], out_dtype=x.dtype)
    # TODO(synk): RMSNorm could additionally be fused into the matmul A-path
    # when the K tiling keeps the full hidden dim resident.
    act = pallas_swiglu(h2, p['wg'], p['wu'])                   # silu(g)*u
    mlp = pallas_matmul(act, p['wd']).reshape(B, S, H)
    return x + mlp


def decoder_forward(params, x, pad3, rope_q, rope_k, cfg):
    nH = cfg['num_attention_heads']
    for layer in params['decoder']:
        x = transformer_layer(layer, x, pad3, rope_q, rope_k, nH, causal=True)
    B, S, H = x.shape
    return pallas_rmsnorm(x.reshape(-1, H), params['dec_norm'],
                          out_dtype=x.dtype).reshape(B, S, H)


def encoder_step(params, span_emb, h_pred, pad3, rope_q, rope_k, cfg):
    # TODO(synk): SpanEncoder internals not provided; assume span_emb + decoder
    # hidden fusion followed by bidirectional (non-causal) encoder layers.
    x = span_emb + h_pred
    nH = cfg['num_attention_heads']
    for layer in params['encoder']:
        x = transformer_layer(layer, x, pad3, rope_q, rope_k, nH, causal=False)
    B, S, H = x.shape
    return pallas_rmsnorm(x.reshape(-1, H), params['enc_norm'],
                          out_dtype=x.dtype).reshape(B, S, H)


def proj_head(emb_t, h2d):
    # Tied embedding head: logits = h @ E^T.  emb_t ([H, V]) is the embedding
    # transposed once per forward, hoisted out of the generation loop.
    return pallas_matmul(h2d, emb_t, out_dtype=jnp.float32)


# -----------------------------------------------------------------------------
# Sampling (glue; matches sample_from_logits semantics)
# -----------------------------------------------------------------------------
def top_p_logits_processor(logits, top_p):
    if top_p >= 1.0:
        return logits
    sorted_logits = jnp.sort(logits, axis=-1)[..., ::-1]
    cum = jnp.cumsum(jax.nn.softmax(sorted_logits, axis=-1), axis=-1)
    remove = cum > top_p
    remove = jnp.concatenate(
        [jnp.zeros_like(remove[..., :1]), remove[..., :-1]], axis=-1)
    cutoff = jnp.min(jnp.where(remove, jnp.inf, sorted_logits),
                     axis=-1, keepdims=True)
    return jnp.where(logits < cutoff, -jnp.inf, logits)


def sample_from_logits(key, logits, temperature=1.0, top_p=1.0):
    logits = logits / max(temperature, 1e-8)
    if top_p < 1.0:
        logits = top_p_logits_processor(logits, top_p)
    # Clamp AFTER top-p, matching the PyTorch reference.
    logits = jnp.clip(logits, -50.0, 50.0)
    # TODO(synk): torch.multinomial has no in-kernel equivalent; categorical
    # draws from the same distribution.  The NaN/Inf -> argmax fallback is
    # unreachable after the clamp and is omitted.
    return jax.random.categorical(key, logits, axis=-1).astype(jnp.int32)


# -----------------------------------------------------------------------------
# SpanFusionLM forward
# -----------------------------------------------------------------------------
def span_fusion_lm_forward(params, seq_prompt, key, cfg,
                           temperature=1.0, top_p=1.0):
    B, n_prompt = seq_prompt.shape
    L = cfg['fixed_span_length']
    H = cfg['hidden_size']
    V = cfg['vocab_size']
    nH = cfg['num_attention_heads']
    D = H // nH
    S = n_prompt + L
    emb = params['emb']
    emb_t = emb.T                    # [H, V]; one transpose per forward call.

    pred_tokens = jnp.full((B, L), cfg['pred_token_id'], dtype=jnp.int32)
    seq0 = jnp.concatenate([seq_prompt.astype(jnp.int32), pred_tokens], axis=1)
    z0 = emb[pred_tokens]
    it0 = jnp.zeros((B,), jnp.int32)
    act0 = jnp.ones((B,), dtype=jnp.bool_)

    # RoPE tables (with the q attention scale folded in) hoisted out of the
    # generation loop.
    scale = 1.0 / math.sqrt(D)
    rope_q_dec, rope_k_dec = rope_tables(S, nH, D, cfg['rope_theta'], scale)
    rope_q_enc, rope_k_enc = rope_tables(L, nH, D, cfg['rope_theta'], scale)
    enc_pad = jnp.ones((B, 1, L), jnp.int32)   # encoder: no key padding

    def cond(carry):
        t, _key, _seq, _z, _it, act = carry
        return jnp.logical_and(t < cfg['g_max'], jnp.any(act))

    def body(carry):
        t, key, seq, z, it, act = carry
        key, k_last, k_span = jax.random.split(key, 3)

        embeddings = emb[seq]                                     # [B, S, H]
        pad3 = (seq != cfg['pad_token_id']).astype(jnp.int32)[:, None, :]
        h_dec = decoder_forward(params, embeddings, pad3,
                                rope_q_dec, rope_k_dec, cfg)
        h_pred = h_dec[:, n_prompt:, :]                           # [B, L, H]

        # One tied-embedding projection per iteration; "last position" logits
        # are the last row of the span logits.  The extra /temperature matches
        # the PyTorch reference (it divides in forward and again in sampling).
        logits_span = (proj_head(emb_t, h_pred.reshape(-1, H))
                       / temperature).reshape(B, L, V)
        logits_last = logits_span[:, -1, :]

        tokens_last = sample_from_logits(k_last, logits_last, temperature, top_p)
        finished = tokens_last == cfg['tbd_token_id']
        act = act & (~finished)
        it = it + act.astype(jnp.int32)

        tokens_span = sample_from_logits(
            k_span, logits_span.reshape(-1, V), temperature, top_p).reshape(B, L)

        old_span = seq[:, n_prompt:]
        new_span = jnp.where(act[:, None], tokens_span, old_span)
        seq = seq.at[:, n_prompt:].set(new_span)

        span_emb = emb[seq[:, n_prompt:]]
        z = encoder_step(params, span_emb, h_pred, enc_pad,
                         rope_q_enc, rope_k_enc, cfg)
        return (t + 1, key, seq, z, it, act)

    carry = (jnp.array(0, jnp.int32), key, seq0, z0, it0, act0)
    _t, _key, seq, z, iteration_count, _act = jax.lax.while_loop(cond, body, carry)

    final_logits = proj_head(emb_t, z.reshape(-1, H)).reshape(B, L, V)
    return {'seq': seq, 'logits_span': final_logits, 'g_hat': iteration_count}


# -----------------------------------------------------------------------------
# Deterministic parameter init (bf16 weights, f32 norm scales)
# -----------------------------------------------------------------------------
def init_params(key, cfg):
    H = cfg['hidden_size']
    V = cfg['vocab_size']
    I = cfg['intermediate_size']
    n_layers = cfg['num_decoder_layers'] + cfg['num_encoder_layers']
    keys = iter(jax.random.split(key, 8 * n_layers + 8))

    def nrm(shape):
        return (0.02 * jax.random.normal(next(keys), shape, jnp.float32)
                ).astype(jnp.bfloat16)

    def make_layer():
        return dict(ln1=jnp.ones((H,), jnp.float32),
                    ln2=jnp.ones((H,), jnp.float32),
                    wqkv=nrm((3, H, H)),        # fused Q/K/V, head-ready layout
                    wo=nrm((H, H)),
                    wg=nrm((H, I)),             # gate projection
                    wu=nrm((H, I)),             # up projection
                    wd=nrm((I, H)))

    return dict(
        emb=nrm((V, H)),
        decoder=[make_layer() for _ in range(cfg['num_decoder_layers'])],
        encoder=[make_layer() for _ in range(cfg['num_encoder_layers'])],
        dec_norm=jnp.ones((H,), jnp.float32),
        enc_norm=jnp.ones((H,), jnp.float32),
    )


# -----------------------------------------------------------------------------
if __name__ == "__main__":
    cfg = dict(
        vocab_size=64,
        hidden_size=32,
        intermediate_size=64,
        num_decoder_layers=2,
        num_encoder_layers=1,
        num_attention_heads=4,
        rope_theta=10000.0,
        g_max=2,
        max_seq_length=16,
        pad_token_id=0,
        pred_token_id=62,
        tbd_token_id=63,
    )
    cfg['fixed_span_length'] = math.ceil(math.sqrt(cfg['max_seq_length']))  # = 4

    key = jax.random.PRNGKey(0)
    p_key, d_key, s_key = jax.random.split(key, 3)

    params = init_params(p_key, cfg)

    B, n_prompt = 2, 8
    seq_prompt = jax.random.randint(d_key, (B, n_prompt), 1, 60, dtype=jnp.int32)

    fwd = jax.jit(functools.partial(span_fusion_lm_forward, cfg=cfg,
                                    temperature=1.0, top_p=1.0))
    out = fwd(params, seq_prompt, s_key)
    jax.block_until_ready(out)

    assert out['seq'].shape == (B, n_prompt + cfg['fixed_span_length'])
    assert out['logits_span'].shape == (B, cfg['fixed_span_length'], cfg['vocab_size'])
    assert out['g_hat'].shape == (B,)
    print("KERNEL_OK")
</pallas_src>

<mosaic_0001>
module attributes {stable_mosaic.version = 11 : i64} {
  func.func @kernel(%arg0: i32, %arg1: i32, %arg2: i32, %arg3: memref<1x1x12xi32, #tpu.memory_space<vmem>>, %arg4: memref<12x16xf32, #tpu.memory_space<vmem>>, %arg5: memref<12x16xf32, #tpu.memory_space<vmem>>, %arg6: memref<12x16xf32, #tpu.memory_space<vmem>>, %arg7: memref<12x16xf32, #tpu.memory_space<vmem>>, %arg8: memref<1x1x12x32xbf16, #tpu.memory_space<vmem>>, %arg9: memref<1x1x12x32xbf16, #tpu.memory_space<vmem>>, %arg10: memref<1x1x12x32xbf16, #tpu.memory_space<vmem>>, %arg11: memref<1x12x32xbf16, #tpu.memory_space<vmem>>, %arg12: memref<12x32xf32, #tpu.memory_space<vmem>>, %arg13: memref<12x32xf32, #tpu.memory_space<vmem>>, %arg14: memref<12x32xf32, #tpu.memory_space<vmem>>) attributes {dimension_semantics = [#tpu.dimension_semantics<parallel>, #tpu.dimension_semantics<parallel>, #tpu.dimension_semantics<arbitrary>], iteration_bounds = array<i64: 2, 1, 1>, scalar_prefetch = 0 : i64, scratch_operands = 3 : i64, tpu.core_type = #tpu.core_type<tc>, window_params = [{transform_indices = @transform_0, window_bounds = array<i64: 1, 1, 12>}, {transform_indices = @transform_1, window_bounds = array<i64: 12, 16>}, {transform_indices = @transform_2, window_bounds = array<i64: 12, 16>}, {transform_indices = @transform_3, window_bounds = array<i64: 12, 16>}, {transform_indices = @transform_4, window_bounds = array<i64: 12, 16>}, {transform_indices = @transform_5, window_bounds = array<i64: 1, 1, 12, 32>}, {transform_indices = @transform_6, window_bounds = array<i64: 1, 1, 12, 32>}, {transform_indices = @transform_7, window_bounds = array<i64: 1, 1, 12, 32>}, {transform_indices = @transform_8, window_bounds = array<i64: 1, 12, 32>}]} {
    %c0_i32 = arith.constant 0 : i32
    %0 = arith.cmpi eq, %arg2, %c0_i32 : i32
    %1 = arith.extui %0 : i1 to i32
    %c0_i32_0 = arith.constant 0 : i32
    %2 = arith.cmpi ne, %1, %c0_i32_0 : i32
    scf.if %2 {
      %cst = arith.constant 0xFF800000 : f32
      %12 = vector.broadcast %cst : f32 to vector<12x32xf32>
      %c0 = arith.constant 0 : index
      %c0_5 = arith.constant 0 : index
      %13 = vector.load %arg12[%c0, %c0_5] : memref<12x32xf32, #tpu.memory_space<vmem>>, vector<12x32xf32>
      tpu.vector_store %arg12[%c0, %c0_5], %12 {strides = array<i32>} : memref<12x32xf32, #tpu.memory_space<vmem>>, vector<12x32xf32>,
      %cst_6 = arith.constant 0.000000e+00 : f32
      %14 = vector.broadcast %cst_6 : f32 to vector<12x32xf32>
      %c0_7 = arith.constant 0 : index
      %c0_8 = arith.constant 0 : index
      %15 = vector.load %arg13[%c0_7, %c0_8] : memref<12x32xf32, #tpu.memory_space<vmem>>, vector<12x32xf32>
      tpu.vector_store %arg13[%c0_7, %c0_8], %14 {strides = array<i32>} : memref<12x32xf32, #tpu.memory_space<vmem>>, vector<12x32xf32>,
      %cst_9 = arith.constant 0.000000e+00 : f32
      %16 = vector.broadcast %cst_9 : f32 to vector<12x32xf32>
      %c0_10 = arith.constant 0 : index
      %c0_11 = arith.constant 0 : index
      %17 = vector.load %arg14[%c0_10, %c0_11] : memref<12x32xf32, #tpu.memory_space<vmem>>, vector<12x32xf32>
      tpu.vector_store %arg14[%c0_10, %c0_11], %16 {strides = array<i32>} : memref<12x32xf32, #tpu.memory_space<vmem>>, vector<12x32xf32>,
    } else {
    }
    %c12_i32 = arith.constant 12 : i32
    %3 = arith.muli %arg2, %c12_i32 : i32
    %c12_i32_1 = arith.constant 12 : i32
    %4 = arith.muli %arg1, %c12_i32_1 : i32
    %c11_i32 = arith.constant 11 : i32
    %5 = arith.addi %4, %c11_i32 : i32
    %6 = arith.cmpi sle, %3, %5 : i32
    %7 = arith.extui %6 : i1 to i32
    %c0_i32_2 = arith.constant 0 : i32
    %8 = arith.cmpi ne, %7, %c0_i32_2 : i32
    scf.if %8 {
      %c0 = arith.constant 0 : index
      %c0_5 = arith.constant 0 : index
      %c0_6 = arith.constant 0 : index
      %c0_7 = arith.constant 0 : index
      %12 = vector.load %arg8[%c0, %c0_5, %c0_6, %c0_7] : memref<1x1x12x32xbf16, #tpu.memory_space<vmem>>, vector<1x1x12x32xbf16>
      %13 = vector.shape_cast %12 : vector<1x1x12x32xbf16> to vector<12x32xbf16>
      %14 = arith.extf %13 : vector<12x32xbf16> to vector<12x32xf32>
      %c0_8 = arith.constant 0 : index
      %c0_9 = arith.constant 0 : index
      %c0_10 = arith.constant 0 : index
      %c0_11 = arith.constant 0 : index
      %15 = vector.load %arg9[%c0_8, %c0_9, %c0_10, %c0_11] : memref<1x1x12x32xbf16, #tpu.memory_space<vmem>>, vector<1x1x12x32xbf16>
      %16 = vector.shape_cast %15 : vector<1x1x12x32xbf16> to vector<12x32xbf16>
      %17 = arith.extf %16 : vector<12x32xbf16> to vector<12x32xf32>
      %c0_12 = arith.constant 0 : index
      %c0_13 = arith.constant 0 : index
      %c0_14 = arith.constant 0 : index
      %c0_15 = arith.constant 0 : index
      %18 = vector.load %arg10[%c0_12, %c0_13, %c0_14, %c0_15] : memref<1x1x12x32xbf16, #tpu.memory_space<vmem>>, vector<1x1x12x32xbf16>
      %19 = vector.shape_cast %18 : vector<1x1x12x32xbf16> to vector<12x32xbf16>
      %c0_16 = arith.constant 0 : index
      %c0_17 = arith.constant 0 : index
      %20 = vector.load %arg4[%c0_16, %c0_17] : memref<12x16xf32, #tpu.memory_space<vmem>>, vector<12x16xf32>
      %c0_18 = arith.constant 0 : index
      %c0_19 = arith.constant 0 : index
      %21 = vector.load %arg5[%c0_18, %c0_19] : memref<12x16xf32, #tpu.memory_space<vmem>>, vector<12x16xf32>
      %c0_20 = arith.constant 0 : index
      %c0_21 = arith.constant 0 : index
      %22 = vector.load %arg6[%c0_20, %c0_21] : memref<12x16xf32, #tpu.memory_space<vmem>>, vector<12x16xf32>
      %c0_22 = arith.constant 0 : index
      %c0_23 = arith.constant 0 : index
      %23 = vector.load %arg7[%c0_22, %c0_23] : memref<12x16xf32, #tpu.memory_space<vmem>>, vector<12x16xf32>
      %c0_24 = arith.constant 0 : index
      %c0_25 = arith.constant 0 : index
      %c0_26 = arith.constant 0 : index
      %24 = vector.load %arg3[%c0_24, %c0_25, %c0_26] : memref<1x1x12xi32, #tpu.memory_space<vmem>>, vector<1x1x12xi32>
      %25 = vector.shape_cast %24 : vector<1x1x12xi32> to vector<1x12xi32>
      %c0_i32_27 = arith.constant 0 : i32
      %26 = vector.broadcast %c0_i32_27 : i32 to vector<1x12xi32>
      %27 = arith.cmpi sgt, %25, %26 : vector<1x12xi32>
      %c12_i32_28 = arith.constant 12 : i32
      %28 = arith.muli %arg1, %c12_i32_28 : i32
      %29 = tpu.iota {dimensions = array<i32: 0>} : vector<12x12xi32>
      %30 = vector.broadcast %28 : i32 to vector<12x12xi32>
      %31 = arith.addi %30, %29 : vector<12x12xi32>
      %c12_i32_29 = arith.constant 12 : i32
      %32 = arith.muli %arg2, %c12_i32_29 : i32
      %33 = tpu.iota {dimensions = array<i32: 1>} : vector<12x12xi32>
      %34 = vector.broadcast %32 : i32 to vector<12x12xi32>
      %35 = arith.addi %34, %33 : vector<12x12xi32>
      %36 = arith.cmpi sge, %31, %35 : vector<12x12xi32>
      %37 = vector.broadcast %27 : vector<1x12xi1> to vector<12x12xi1>
      %38 = arith.andi %36, %37 : vector<12x12xi1>
      %39 = vector.extract_strided_slice %14 {offsets = [0, 0], sizes = [12, 4], strides = [1, 1]} : vector<12x32xf32> to vector<12x4xf32>
      %40 = vector.extract_strided_slice %14 {offsets = [0, 4], sizes = [12, 4], strides = [1, 1]} : vector<12x32xf32> to vector<12x4xf32>
      %41 = vector.extract_strided_slice %17 {offsets = [0, 0], sizes = [12, 4], strides = [1, 1]} : vector<12x32xf32> to vector<12x4xf32>
      %42 = vector.extract_strided_slice %17 {offsets = [0, 4], sizes = [12, 4], strides = [1, 1]} : vector<12x32xf32> to vector<12x4xf32>
      %43 = vector.extract_strided_slice %20 {offsets = [0, 0], sizes = [12, 4], strides = [1, 1]} : vector<12x16xf32> to vector<12x4xf32>
      %44 = vector.extract_strided_slice %21 {offsets = [0, 0], sizes = [12, 4], strides = [1, 1]} : vector<12x16xf32> to vector<12x4xf32>
      %45 = vector.extract_strided_slice %22 {offsets = [0, 0], sizes = [12, 4], strides = [1, 1]} : vector<12x16xf32> to vector<12x4xf32>
      %46 = vector.extract_strided_slice %23 {offsets = [0, 0], sizes = [12, 4], strides = [1, 1]} : vector<12x16xf32> to vector<12x4xf32>
      %47 = arith.mulf %39, %43 : vector<12x4xf32>
      %48 = arith.mulf %40, %44 : vector<12x4xf32>
      %49 = arith.subf %47, %48 : vector<12x4xf32>
      %50 = arith.truncf %49 : vector<12x4xf32> to vector<12x4xbf16>
      %51 = arith.mulf %40, %43 : vector<12x4xf32>
      %52 = arith.mulf %39, %44 : vector<12x4xf32>
      %53 = arith.addf %51, %52 : vector<12x4xf32>
      %54 = arith.truncf %53 : vector<12x4xf32> to vector<12x4xbf16>
      %55 = arith.mulf %41, %45 : vector<12x4xf32>
      %56 = arith.mulf %42, %46 : vector<12x4xf32>
      %57 = arith.subf %55, %56 : vector<12x4xf32>
      %58 = arith.truncf %57 : vector<12x4xf32> to vector<12x4xbf16>
      %59 = arith.mulf %42, %45 : vector<12x4xf32>
      %60 = arith.mulf %41, %46 : vector<12x4xf32>
      %61 = arith.addf %59, %60 : vector<12x4xf32>
      %62 = arith.truncf %61 : vector<12x4xf32> to vector<12x4xbf16>
      %cst = arith.constant dense<0.000000e+00> : vector<12x12xf32>
      %63 = tpu.matmul %50, %58, %cst {dimension_numbers = #tpu.dot_dimension_numbers<[1], [1], [0], [0], [0, 0, 1, 0], [], []>} : vector<12x4xbf16>, vector<12x4xbf16>, vector<12x12xf32> -> vector<12x12xf32>
      %cst_30 = arith.constant dense<0.000000e+00> : vector<12x12xf32>
      %64 = tpu.matmul %54, %62, %cst_30 {dimension_numbers = #tpu.dot_dimension_numbers<[1], [1], [0], [0], [0, 0, 1, 0], [], []>} : vector<12x4xbf16>, vector<12x4xbf16>, vector<12x12xf32> -> vector<12x12xf32>
      %65 = arith.addf %63, %64 : vector<12x12xf32>
      %cst_31 = arith.constant -2.38197633E+38 : f32
      %66 = vector.broadcast %cst_31 : f32 to vector<12x12xf32>
      %67 = arith.select %38, %65, %66 : vector<12x12xi1>, vector<12x12xf32>
      %c0_32 = arith.constant 0 : index
      %c0_33 = arith.constant 0 : index
      %68 = vector.load %arg12[%c0_32, %c0_33] : memref<12x32xf32, #tpu.memory_space<vmem>>, vector<12x8xf32>
      %cst_34 = arith.constant dense<0xFF800000> : vector<12xf32>
      %69 = vector.multi_reduction <maximumf>, %67, %cst_34 [1] : vector<12x12xf32> to vector<12xf32>
      %70 = vector.shape_cast %69 : vector<12xf32> to vector<12x1xf32>
      %71 = vector.broadcast %70 : vector<12x1xf32> to vector<12x8xf32>
      %72 = arith.maximumf %68, %71 : vector<12x8xf32>
      %73 = arith.subf %68, %72 : vector<12x8xf32>
      %74 = math.exp %73 : vector<12x8xf32>
      %75 = vector.extract_strided_slice %72 {offsets = [0, 0], sizes = [12, 1], strides = [1, 1]} : vector<12x8xf32> to vector<12x1xf32>
      %76 = vector.broadcast %75 : vector<12x1xf32> to vector<12x12xf32>
      %77 = arith.subf %67, %76 : vector<12x12xf32>
      %78 = math.exp %77 : vector<12x12xf32>
      %c0_35 = arith.constant 0 : index
      %c0_36 = arith.constant 0 : index
      %79 = vector.load %arg13[%c0_35, %c0_36] : memref<12x32xf32, #tpu.memory_space<vmem>>, vector<12x8xf32>
      %80 = arith.mulf %74, %79 : vector<12x8xf32>
      %cst_37 = arith.constant dense<0.000000e+00> : vector<12xf32>
      %81 = vector.multi_reduction <add>, %78, %cst_37 [1] : vector<12x12xf32> to vector<12xf32>
      %82 = vector.shape_cast %81 : vector<12xf32> to vector<12x1xf32>
      %83 = vector.broadcast %82 : vector<12x1xf32> to vector<12x8xf32>
      %84 = arith.addf %80, %83 : vector<12x8xf32>
      %c0_38 = arith.constant 0 : index
      %c0_39 = arith.constant 0 : index
      %85 = vector.load %arg13[%c0_38, %c0_39] : memref<12x32xf32, #tpu.memory_space<vmem>>, vector<12x8xf32>
      tpu.vector_store %arg13[%c0_38, %c0_39], %84 {strides = array<i32>} : memref<12x32xf32, #tpu.memory_space<vmem>>, vector<12x8xf32>,
      %c0_40 = arith.constant 0 : index
      %c0_41 = arith.constant 0 : index
      %86 = vector.load %arg14[%c0_40, %c0_41] : memref<12x32xf32, #tpu.memory_space<vmem>>, vector<12x8xf32>
      %87 = arith.mulf %74, %86 : vector<12x8xf32>
      %88 = arith.truncf %78 : vector<12x12xf32> to vector<12x12xbf16>
      %89 = vector.extract_strided_slice %19 {offsets = [0, 0], sizes = [12, 8], strides = [1, 1]} : vector<12x32xbf16> to vector<12x8xbf16>
      %cst_42 = arith.constant dense<0.000000e+00> : vector<12x8xf32>
      %90 = tpu.matmul %88, %89, %cst_42 {dimension_numbers = #tpu.dot_dimension_numbers<[1], [0], [0], [1], [0, 0, 1, 1], [], []>} : vector<12x12xbf16>, vector<12x8xbf16>, vector<12x8xf32> -> vector<12x8xf32>
      %91 = arith.addf %87, %90 : vector<12x8xf32>
      %c0_43 = arith.constant 0 : index
      %c0_44 = arith.constant 0 : index
      %92 = vector.load %arg14[%c0_43, %c0_44] : memref<12x32xf32, #tpu.memory_space<vmem>>, vector<12x8xf32>
      tpu.vector_store %arg14[%c0_43, %c0_44], %91 {strides = array<i32>} : memref<12x32xf32, #tpu.memory_space<vmem>>, vector<12x8xf32>,
      %c0_45 = arith.constant 0 : index
      %c0_46 = arith.constant 0 : index
      %93 = vector.load %arg12[%c0_45, %c0_46] : memref<12x32xf32, #tpu.memory_space<vmem>>, vector<12x8xf32>
      tpu.vector_store %arg12[%c0_45, %c0_46], %72 {strides = array<i32>} : memref<12x32xf32, #tpu.memory_space<vmem>>, vector<12x8xf32>,
      %94 = vector.extract_strided_slice %14 {offsets = [0, 8], sizes = [12, 4], strides = [1, 1]} : vector<12x32xf32> to vector<12x4xf32>
      %95 = vector.extract_strided_slice %14 {offsets = [0, 12], sizes = [12, 4], strides = [1, 1]} : vector<12x32xf32> to vector<12x4xf32>
      %96 = vector.extract_strided_slice %17 {offsets = [0, 8], sizes = [12, 4], strides = [1, 1]} : vector<12x32xf32> to vector<12x4xf32>
      %97 = vector.extract_strided_slice %17 {offsets = [0, 12], sizes = [12, 4], strides = [1, 1]} : vector<12x32xf32> to vector<12x4xf32>
      %98 = vector.extract_strided_slice %20 {offsets = [0, 4], sizes = [12, 4], strides = [1, 1]} : vector<12x16xf32> to vector<12x4xf32>
      %99 = vector.extract_strided_slice %21 {offsets = [0, 4], sizes = [12, 4], strides = [1, 1]} : vector<12x16xf32> to vector<12x4xf32>
      %100 = vector.extract_strided_slice %22 {offsets = [0, 4], sizes = [12, 4], strides = [1, 1]} : vector<12x16xf32> to vector<12x4xf32>
      %101 = vector.extract_strided_slice %23 {offsets = [0, 4], sizes = [12, 4], strides = [1, 1]} : vector<12x16xf32> to vector<12x4xf32>
      %102 = arith.mulf %94, %98 : vector<12x4xf32>
      %103 = arith.mulf %95, %99 : vector<12x4xf32>
      %104 = arith.subf %102, %103 : vector<12x4xf32>
      %105 = arith.truncf %104 : vector<12x4xf32> to vector<12x4xbf16>
      %106 = arith.mulf %95, %98 : vector<12x4xf32>
      %107 = arith.mulf %94, %99 : vector<12x4xf32>
      %108 = arith.addf %106, %107 : vector<12x4xf32>
      %109 = arith.truncf %108 : vector<12x4xf32> to vector<12x4xbf16>
      %110 = arith.mulf %96, %100 : vector<12x4xf32>
      %111 = arith.mulf %97, %101 : vector<12x4xf32>
      %112 = arith.subf %110, %111 : vector<12x4xf32>
      %113 = arith.truncf %112 : vector<12x4xf32> to vector<12x4xbf16>
      %114 = arith.mulf %97, %100 : vector<12x4xf32>
      %115 = arith.mulf %96, %101 : vector<12x4xf32>
      %116 = arith.addf %114, %115 : vector<12x4xf32>
      %117 = arith.truncf %116 : vector<12x4xf32> to vector<12x4xbf16>
      %cst_47 = arith.constant dense<0.000000e+00> : vector<12x12xf32>
      %118 = tpu.matmul %105, %113, %cst_47 {dimension_numbers = #tpu.dot_dimension_numbers<[1], [1], [0], [0], [0, 0, 1, 0], [], []>} : vector<12x4xbf16>, vector<12x4xbf16>, vector<12x12xf32> -> vector<12x12xf32>
      %cst_48 = arith.constant dense<0.000000e+00> : vector<12x12xf32>
      %119 = tpu.matmul %109, %117, %cst_48 {dimension_numbers = #tpu.dot_dimension_numbers<[1], [1], [0], [0], [0, 0, 1, 0], [], []>} : vector<12x4xbf16>, vector<12x4xbf16>, vector<12x12xf32> -> vector<12x12xf32>
      %120 = arith.addf %118, %119 : vector<12x12xf32>
      %cst_49 = arith.constant -2.38197633E+38 : f32
      %121 = vector.broadcast %cst_49 : f32 to vector<12x12xf32>
      %122 = arith.select %38, %120, %121 : vector<12x12xi1>, vector<12x12xf32>
      %c0_50 = arith.constant 0 : index
      %c8 = arith.constant 8 : index
      %123 = vector.load %arg12[%c0_50, %c8] : memref<12x32xf32, #tpu.memory_space<vmem>>, vector<12x8xf32>
      %cst_51 = arith.constant dense<0xFF800000> : vector<12xf32>
      %124 = vector.multi_reduction <maximumf>, %122, %cst_51 [1] : vector<12x12xf32> to vector<12xf32>
      %125 = vector.shape_cast %124 : vector<12xf32> to vector<12x1xf32>
      %126 = vector.broadcast %125 : vector<12x1xf32> to vector<12x8xf32>
      %127 = arith.maximumf %123, %126 : vector<12x8xf32>
      %128 = arith.subf %123, %127 : vector<12x8xf32>
      %129 = math.exp %128 : vector<12x8xf32>
      %130 = vector.extract_strided_slice %127 {offsets = [0, 0], sizes = [12, 1], strides = [1, 1]} : vector<12x8xf32> to vector<12x1xf32>
      %131 = vector.broadcast %130 : vector<12x1xf32> to vector<12x12xf32>
      %132 = arith.subf %122, %131 : vector<12x12xf32>
      %133 = math.exp %132 : vector<12x12xf32>
      %c0_52 = arith.constant 0 : index
      %c8_53 = arith.constant 8 : index
      %134 = vector.load %arg13[%c0_52, %c8_53] : memref<12x32xf32, #tpu.memory_space<vmem>>, vector<12x8xf32>
      %135 = arith.mulf %129, %134 : vector<12x8xf32>
      %cst_54 = arith.constant dense<0.000000e+00> : vector<12xf32>
      %136 = vector.multi_reduction <add>, %133, %cst_54 [1] : vector<12x12xf32> to vector<12xf32>
      %137 = vector.shape_cast %136 : vector<12xf32> to vector<12x1xf32>
      %138 = vector.broadcast %137 : vector<12x1xf32> to vector<12x8xf32>
      %139 = arith.addf %135, %138 : vector<12x8xf32>
      %c0_55 = arith.constant 0 : index
      %c8_56 = arith.constant 8 : index
      %140 = vector.load %arg13[%c0_55, %c8_56] : memref<12x32xf32, #tpu.memory_space<vmem>>, vector<12x8xf32>
      tpu.vector_store %arg13[%c0_55, %c8_56], %139 {strides = array<i32>} : memref<12x32xf32, #tpu.memory_space<vmem>>, vector<12x8xf32>,
      %c0_57 = arith.constant 0 : index
      %c8_58 = arith.constant 8 : index
      %141 = vector.load %arg14[%c0_57, %c8_58] : memref<12x32xf32, #tpu.memory_space<vmem>>, vector<12x8xf32>
      %142 = arith.mulf %129, %141 : vector<12x8xf32>
      %143 = arith.truncf %133 : vector<12x12xf32> to vector<12x12xbf16>
      %144 = vector.extract_strided_slice %19 {offsets = [0, 8], sizes = [12, 8], strides = [1, 1]} : vector<12x32xbf16> to vector<12x8xbf16>
      %cst_59 = arith.constant dense<0.000000e+00> : vector<12x8xf32>
      %145 = tpu.matmul %143, %144, %cst_59 {dimension_numbers = #tpu.dot_dimension_numbers<[1], [0], [0], [1], [0, 0, 1, 1], [], []>} : vector<12x12xbf16>, vector<12x8xbf16>, vector<12x8xf32> -> vector<12x8xf32>
      %146 = arith.addf %142, %145 : vector<12x8xf32>
      %c0_60 = arith.constant 0 : index
      %c8_61 = arith.constant 8 : index
      %147 = vector.load %arg14[%c0_60, %c8_61] : memref<12x32xf32, #tpu.memory_space<vmem>>, vector<12x8xf32>
      tpu.vector_store %arg14[%c0_60, %c8_61], %146 {strides = array<i32>} : memref<12x32xf32, #tpu.memory_space<vmem>>, vector<12x8xf32>,
      %c0_62 = arith.constant 0 : index
      %c8_63 = arith.constant 8 : index
      %148 = vector.load %arg12[%c0_62, %c8_63] : memref<12x32xf32, #tpu.memory_space<vmem>>, vector<12x8xf32>
      tpu.vector_store %arg12[%c0_62, %c8_63], %127 {strides = array<i32>} : memref<12x32xf32, #tpu.memory_space<vmem>>, vector<12x8xf32>,
      %149 = vector.extract_strided_slice %14 {offsets = [0, 16], sizes = [12, 4], strides = [1, 1]} : vector<12x32xf32> to vector<12x4xf32>
      %150 = vector.extract_strided_slice %14 {offsets = [0, 20], sizes = [12, 4], strides = [1, 1]} : vector<12x32xf32> to vector<12x4xf32>
      %151 = vector.extract_strided_slice %17 {offsets = [0, 16], sizes = [12, 4], strides = [1, 1]} : vector<12x32xf32> to vector<12x4xf32>
      %152 = vector.extract_strided_slice %17 {offsets = [0, 20], sizes = [12, 4], strides = [1, 1]} : vector<12x32xf32> to vector<12x4xf32>
      %153 = vector.extract_strided_slice %20 {offsets = [0, 8], sizes = [12, 4], strides = [1, 1]} : vector<12x16xf32> to vector<12x4xf32>
      %154 = vector.extract_strided_slice %21 {offsets = [0, 8], sizes = [12, 4], strides = [1, 1]} : vector<12x16xf32> to vector<12x4xf32>
      %155 = vector.extract_strided_slice %22 {offsets = [0, 8], sizes = [12, 4], strides = [1, 1]} : vector<12x16xf32> to vector<12x4xf32>
      %156 = vector.extract_strided_slice %23 {offsets = [0, 8], sizes = [12, 4], strides = [1, 1]} : vector<12x16xf32> to vector<12x4xf32>
      %157 = arith.mulf %149, %153 : vector<12x4xf32>
      %158 = arith.mulf %150, %154 : vector<12x4xf32>
      %159 = arith.subf %157, %158 : vector<12x4xf32>
      %160 = arith.truncf %159 : vector<12x4xf32> to vector<12x4xbf16>
      %161 = arith.mulf %150, %153 : vector<12x4xf32>
      %162 = arith.mulf %149, %154 : vector<12x4xf32>
      %163 = arith.addf %161, %162 : vector<12x4xf32>
      %164 = arith.truncf %163 : vector<12x4xf32> to vector<12x4xbf16>
      %165 = arith.mulf %151, %155 : vector<12x4xf32>
      %166 = arith.mulf %152, %156 : vector<12x4xf32>
      %167 = arith.subf %165, %166 : vector<12x4xf32>
      %168 = arith.truncf %167 : vector<12x4xf32> to vector<12x4xbf16>
      %169 = arith.mulf %152, %155 : vector<12x4xf32>
      %170 = arith.mulf %151, %156 : vector<12x4xf32>
      %171 = arith.addf %169, %170 : vector<12x4xf32>
      %172 = arith.truncf %171 : vector<12x4xf32> to vector<12x4xbf16>
      %cst_64 = arith.constant dense<0.000000e+00> : vector<12x12xf32>
      %173 = tpu.matmul %160, %168, %cst_64 {dimension_numbers = #tpu.dot_dimension_numbers<[1], [1], [0], [0], [0, 0, 1, 0], [], []>} : vector<12x4xbf16>, vector<12x4xbf16>, vector<12x12xf32> -> vector<12x12xf32>
      %cst_65 = arith.constant dense<0.000000e+00> : vector<12x12xf32>
      %174 = tpu.matmul %164, %172, %cst_65 {dimension_numbers = #tpu.dot_dimension_numbers<[1], [1], [0], [0], [0, 0, 1, 0], [], []>} : vector<12x4xbf16>, vector<12x4xbf16>, vector<12x12xf32> -> vector<12x12xf32>
      %175 = arith.addf %173, %174 : vector<12x12xf32>
      %cst_66 = arith.constant -2.38197633E+38 : f32
      %176 = vector.broadcast %cst_66 : f32 to vector<12x12xf32>
      %177 = arith.select %38, %175, %176 : vector<12x12xi1>, vector<12x12xf32>
      %c0_67 = arith.constant 0 : index
      %c16 = arith.constant 16 : index
      %178 = vector.load %arg12[%c0_67, %c16] : memref<12x32xf32, #tpu.memory_space<vmem>>, vector<12x8xf32>
      %cst_68 = arith.constant dense<0xFF800000> : vector<12xf32>
      %179 = vector.multi_reduction <maximumf>, %177, %cst_68 [1] : vector<12x12xf32> to vector<12xf32>
      %180 = vector.shape_cast %179 : vector<12xf32> to vector<12x1xf32>
      %181 = vector.broadcast %180 : vector<12x1xf32> to vector<12x8xf32>
      %182 = arith.maximumf %178, %181 : vector<12x8xf32>
      %183 = arith.subf %178, %182 : vector<12x8xf32>
      %184 = math.exp %183 : vector<12x8xf32>
      %185 = vector.extract_strided_slice %182 {offsets = [0, 0], sizes = [12, 1], strides = [1, 1]} : vector<12x8xf32> to vector<12x1xf32>
      %186 = vector.broadcast %185 : vector<12x1xf32> to vector<12x12xf32>
      %187 = arith.subf %177, %186 : vector<12x12xf32>
      %188 = math.exp %187 : vector<12x12xf32>
      %c0_69 = arith.constant 0 : index
      %c16_70 = arith.constant 16 : index
      %189 = vector.load %arg13[%c0_69, %c16_70] : memref<12x32xf32, #tpu.memory_space<vmem>>, vector<12x8xf32>
      %190 = arith.mulf %184, %189 : vector<12x8xf32>
      %cst_71 = arith.constant dense<0.000000e+00> : vector<12xf32>
      %191 = vector.multi_reduction <add>, %188, %cst_71 [1] : vector<12x12xf32> to vector<12xf32>
      %192 = vector.shape_cast %191 : vector<12xf32> to vector<12x1xf32>
      %193 = vector.broadcast %192 : vector<12x1xf32> to vector<12x8xf32>
      %194 = arith.addf %190, %193 : vector<12x8xf32>
      %c0_72 = arith.constant 0 : index
      %c16_73 = arith.constant 16 : index
      %195 = vector.load %arg13[%c0_72, %c16_73] : memref<12x32xf32, #tpu.memory_space<vmem>>, vector<12x8xf32>
      tpu.vector_store %arg13[%c0_72, %c16_73], %194 {strides = array<i32>} : memref<12x32xf32, #tpu.memory_space<vmem>>, vector<12x8xf32>,
      %c0_74 = arith.constant 0 : index
      %c16_75 = arith.constant 16 : index
      %196 = vector.load %arg14[%c0_74, %c16_75] : memref<12x32xf32, #tpu.memory_space<vmem>>, vector<12x8xf32>
      %197 = arith.mulf %184, %196 : vector<12x8xf32>
      %198 = arith.truncf %188 : vector<12x12xf32> to vector<12x12xbf16>
      %199 = vector.extract_strided_slice %19 {offsets = [0, 16], sizes = [12, 8], strides = [1, 1]} : vector<12x32xbf16> to vector<12x8xbf16>
      %cst_76 = arith.constant dense<0.000000e+00> : vector<12x8xf32>
      %200 = tpu.matmul %198, %199, %cst_76 {dimension_numbers = #tpu.dot_dimension_numbers<[1], [0], [0], [1], [0, 0, 1, 1], [], []>} : vector<12x12xbf16>, vector<12x8xbf16>, vector<12x8xf32> -> vector<12x8xf32>
      %201 = arith.addf %197, %200 : vector<12x8xf32>
      %c0_77 = arith.constant 0 : index
      %c16_78 = arith.constant 16 : index
      %202 = vector.load %arg14[%c0_77, %c16_78] : memref<12x32xf32, #tpu.memory_space<vmem>>, vector<12x8xf32>
      tpu.vector_store %arg14[%c0_77, %c16_78], %201 {strides = array<i32>} : memref<12x32xf32, #tpu.memory_space<vmem>>, vector<12x8xf32>,
      %c0_79 = arith.constant 0 : index
      %c16_80 = arith.constant 16 : index
      %203 = vector.load %arg12[%c0_79, %c16_80] : memref<12x32xf32, #tpu.memory_space<vmem>>, vector<12x8xf32>
      tpu.vector_store %arg12[%c0_79, %c16_80], %182 {strides = array<i32>} : memref<12x32xf32, #tpu.memory_space<vmem>>, vector<12x8xf32>,
      %204 = vector.extract_strided_slice %14 {offsets = [0, 24], sizes = [12, 4], strides = [1, 1]} : vector<12x32xf32> to vector<12x4xf32>
      %205 = vector.extract_strided_slice %14 {offsets = [0, 28], sizes = [12, 4], strides = [1, 1]} : vector<12x32xf32> to vector<12x4xf32>
      %206 = vector.extract_strided_slice %17 {offsets = [0, 24], sizes = [12, 4], strides = [1, 1]} : vector<12x32xf32> to vector<12x4xf32>
      %207 = vector.extract_strided_slice %17 {offsets = [0, 28], sizes = [12, 4], strides = [1, 1]} : vector<12x32xf32> to vector<12x4xf32>
      %208 = vector.extract_strided_slice %20 {offsets = [0, 12], sizes = [12, 4], strides = [1, 1]} : vector<12x16xf32> to vector<12x4xf32>
      %209 = vector.extract_strided_slice %21 {offsets = [0, 12], sizes = [12, 4], strides = [1, 1]} : vector<12x16xf32> to vector<12x4xf32>
      %210 = vector.extract_strided_slice %22 {offsets = [0, 12], sizes = [12, 4], strides = [1, 1]} : vector<12x16xf32> to vector<12x4xf32>
      %211 = vector.extract_strided_slice %23 {offsets = [0, 12], sizes = [12, 4], strides = [1, 1]} : vector<12x16xf32> to vector<12x4xf32>
      %212 = arith.mulf %204, %208 : vector<12x4xf32>
      %213 = arith.mulf %205, %209 : vector<12x4xf32>
      %214 = arith.subf %212, %213 : vector<12x4xf32>
      %215 = arith.truncf %214 : vector<12x4xf32> to vector<12x4xbf16>
      %216 = arith.mulf %205, %208 : vector<12x4xf32>
      %217 = arith.mulf %204, %209 : vector<12x4xf32>
      %218 = arith.addf %216, %217 : vector<12x4xf32>
      %219 = arith.truncf %218 : vector<12x4xf32> to vector<12x4xbf16>
      %220 = arith.mulf %206, %210 : vector<12x4xf32>
      %221 = arith.mulf %207, %211 : vector<12x4xf32>
      %222 = arith.subf %220, %221 : vector<12x4xf32>
      %223 = arith.truncf %222 : vector<12x4xf32> to vector<12x4xbf16>
      %224 = arith.mulf %207, %210 : vector<12x4xf32>
      %225 = arith.mulf %206, %211 : vector<12x4xf32>
      %226 = arith.addf %224, %225 : vector<12x4xf32>
      %227 = arith.truncf %226 : vector<12x4xf32> to vector<12x4xbf16>
      %cst_81 = arith.constant dense<0.000000e+00> : vector<12x12xf32>
      %228 = tpu.matmul %215, %223, %cst_81 {dimension_numbers = #tpu.dot_dimension_numbers<[1], [1], [0], [0], [0, 0, 1, 0], [], []>} : vector<12x4xbf16>, vector<12x4xbf16>, vector<12x12xf32> -> vector<12x12xf32>
      %cst_82 = arith.constant dense<0.000000e+00> : vector<12x12xf32>
      %229 = tpu.matmul %219, %227, %cst_82 {dimension_numbers = #tpu.dot_dimension_numbers<[1], [1], [0], [0], [0, 0, 1, 0], [], []>} : vector<12x4xbf16>, vector<12x4xbf16>, vector<12x12xf32> -> vector<12x12xf32>
      %230 = arith.addf %228, %229 : vector<12x12xf32>
      %cst_83 = arith.constant -2.38197633E+38 : f32
      %231 = vector.broadcast %cst_83 : f32 to vector<12x12xf32>
      %232 = arith.select %38, %230, %231 : vector<12x12xi1>, vector<12x12xf32>
      %c0_84 = arith.constant 0 : index
      %c24 = arith.constant 24 : index
      %233 = vector.load %arg12[%c0_84, %c24] : memref<12x32xf32, #tpu.memory_space<vmem>>, vector<12x8xf32>
      %cst_85 = arith.constant dense<0xFF800000> : vector<12xf32>
      %234 = vector.multi_reduction <maximumf>, %232, %cst_85 [1] : vector<12x12xf32> to vector<12xf32>
      %235 = vector.shape_cast %234 : vector<12xf32> to vector<12x1xf32>
      %236 = vector.broadcast %235 : vector<12x1xf32> to vector<12x8xf32>
      %237 = arith.maximumf %233, %236 : vector<12x8xf32>
      %238 = arith.subf %233, %237 : vector<12x8xf32>
      %239 = math.exp %238 : vector<12x8xf32>
      %240 = vector.extract_strided_slice %237 {offsets = [0, 0], sizes = [12, 1], strides = [1, 1]} : vector<12x8xf32> to vector<12x1xf32>
      %241 = vector.broadcast %240 : vector<12x1xf32> to vector<12x12xf32>
      %242 = arith.subf %232, %241 : vector<12x12xf32>
      %243 = math.exp %242 : vector<12x12xf32>
      %c0_86 = arith.constant 0 : index
      %c24_87 = arith.constant 24 : index
      %244 = vector.load %arg13[%c0_86, %c24_87] : memref<12x32xf32, #tpu.memory_space<vmem>>, vector<12x8xf32>
      %245 = arith.mulf %239, %244 : vector<12x8xf32>
      %cst_88 = arith.constant dense<0.000000e+00> : vector<12xf32>
      %246 = vector.multi_reduction <add>, %243, %cst_88 [1] : vector<12x12xf32> to vector<12xf32>
      %247 = vector.shape_cast %246 : vector<12xf32> to vector<12x1xf32>
      %248 = vector.broadcast %247 : vector<12x1xf32> to vector<12x8xf32>
      %249 = arith.addf %245, %248 : vector<12x8xf32>
      %c0_89 = arith.constant 0 : index
      %c24_90 = arith.constant 24 : index
      %250 = vector.load %arg13[%c0_89, %c24_90] : memref<12x32xf32, #tpu.memory_space<vmem>>, vector<12x8xf32>
      tpu.vector_store %arg13[%c0_89, %c24_90], %249 {strides = array<i32>} : memref<12x32xf32, #tpu.memory_space<vmem>>, vector<12x8xf32>,
      %c0_91 = arith.constant 0 : index
      %c24_92 = arith.constant 24 : index
      %251 = vector.load %arg14[%c0_91, %c24_92] : memref<12x32xf32, #tpu.memory_space<vmem>>, vector<12x8xf32>
      %252 = arith.mulf %239, %251 : vector<12x8xf32>
      %253 = arith.truncf %243 : vector<12x12xf32> to vector<12x12xbf16>
      %254 = vector.extract_strided_slice %19 {offsets = [0, 24], sizes = [12, 8], strides = [1, 1]} : vector<12x32xbf16> to vector<12x8xbf16>
      %cst_93 = arith.constant dense<0.000000e+00> : vector<12x8xf32>
      %255 = tpu.matmul %253, %254, %cst_93 {dimension_numbers = #tpu.dot_dimension_numbers<[1], [0], [0], [1], [0, 0, 1, 1], [], []>} : vector<12x12xbf16>, vector<12x8xbf16>, vector<12x8xf32> -> vector<12x8xf32>
      %256 = arith.addf %252, %255 : vector<12x8xf32>
      %c0_94 = arith.constant 0 : index
      %c24_95 = arith.constant 24 : index
      %257 = vector.load %arg14[%c0_94, %c24_95] : memref<12x32xf32, #tpu.memory_space<vmem>>, vector<12x8xf32>
      tpu.vector_store %arg14[%c0_94, %c24_95], %256 {strides = array<i32>} : memref<12x32xf32, #tpu.memory_space<vmem>>, vector<12x8xf32>,
      %c0_96 = arith.constant 0 : index
      %c24_97 = arith.constant 24 : index
      %258 = vector.load %arg12[%c0_96, %c24_97] : memref<12x32xf32, #tpu.memory_space<vmem>>, vector<12x8xf32>
      tpu.vector_store %arg12[%c0_96, %c24_97], %237 {strides = array<i32>} : memref<12x32xf32, #tpu.memory_space<vmem>>, vector<12x8xf32>,
    } else {
    }
    %c0_i32_3 = arith.constant 0 : i32
    %9 = arith.cmpi eq, %arg2, %c0_i32_3 : i32
    %10 = arith.extui %9 : i1 to i32
    %c0_i32_4 = arith.constant 0 : i32
    %11 = arith.cmpi ne, %10, %c0_i32_4 : i32
    scf.if %11 {
      %c0 = arith.constant 0 : index
      %c0_5 = arith.constant 0 : index
      %12 = vector.load %arg14[%c0, %c0_5] : memref<12x32xf32, #tpu.memory_space<vmem>>, vector<12x32xf32>
      %c0_6 = arith.constant 0 : index
      %c0_7 = arith.constant 0 : index
      %13 = vector.load %arg13[%c0_6, %c0_7] : memref<12x32xf32, #tpu.memory_space<vmem>>, vector<12x32xf32>
      %14 = tpu.reciprocal %13 {approx = true} : vector<12x32xf32> -> vector<12x32xf32>
      %15 = arith.mulf %12, %14 : vector<12x32xf32>
      %16 = arith.truncf %15 : vector<12x32xf32> to vector<12x32xbf16>
      %c0_8 = arith.constant 0 : index
      %c0_9 = arith.constant 0 : index
      %c0_10 = arith.constant 0 : index
      %17 = vector.load %arg11[%c0_8, %c0_9, %c0_10] : memref<1x12x32xbf16, #tpu.memory_space<vmem>>, vector<1x12x32xbf16>
      %18 = vector.shape_cast %17 : vector<1x12x32xbf16> to vector<12x32xbf16>
      %19 = vector.shape_cast %16 : vector<12x32xbf16> to vector<1x12x32xbf16>
      tpu.vector_store %arg11[%c0_8, %c0_9, %c0_10], %19 {strides = array<i32>} : memref<1x12x32xbf16, #tpu.memory_space<vmem>>, vector<1x12x32xbf16>,
    } else {
    }
    return
  }
  func.func @transform_0(%arg0: i32, %arg1: i32, %arg2: i32) -> (i32, i32, i32) {
    %c0_i32 = arith.constant 0 : i32
    %c0_i32_0 = arith.constant 0 : i32
    return %arg0, %c0_i32, %arg2 : i32, i32, i32
  }
  func.func @transform_1(%arg0: i32, %arg1: i32, %arg2: i32) -> (i32, i32) {
    %c0_i32 = arith.constant 0 : i32
    %c0_i32_0 = arith.constant 0 : i32
    return %arg1, %c0_i32 : i32, i32
  }
  func.func @transform_2(%arg0: i32, %arg1: i32, %arg2: i32) -> (i32, i32) {
    %c0_i32 = arith.constant 0 : i32
    %c0_i32_0 = arith.constant 0 : i32
    return %arg1, %c0_i32 : i32, i32
  }
  func.func @transform_3(%arg0: i32, %arg1: i32, %arg2: i32) -> (i32, i32) {
    %c0_i32 = arith.constant 0 : i32
    %c0_i32_0 = arith.constant 0 : i32
    return %arg2, %c0_i32 : i32, i32
  }
  func.func @transform_4(%arg0: i32, %arg1: i32, %arg2: i32) -> (i32, i32) {
    %c0_i32 = arith.constant 0 : i32
    %c0_i32_0 = arith.constant 0 : i32
    return %arg2, %c0_i32 : i32, i32
  }
  func.func @transform_5(%arg0: i32, %arg1: i32, %arg2: i32) -> (i32, i32, i32, i32) {
    %c0_i32 = arith.constant 0 : i32
    %c0_i32_0 = arith.constant 0 : i32
    %c0_i32_1 = arith.constant 0 : i32
    return %c0_i32, %arg0, %arg1, %c0_i32_0 : i32, i32, i32, i32
  }
  func.func @transform_6(%arg0: i32, %arg1: i32, %arg2: i32) -> (i32, i32, i32, i32) {
    %c1_i32 = arith.constant 1 : i32
    %c0_i32 = arith.constant 0 : i32
    %c0_i32_0 = arith.constant 0 : i32
    return %c1_i32, %arg0, %arg2, %c0_i32 : i32, i32, i32, i32
  }
  func.func @transform_7(%arg0: i32, %arg1: i32, %arg2: i32) -> (i32, i32, i32, i32) {
    %c2_i32 = arith.constant 2 : i32
    %c0_i32 = arith.constant 0 : i32
    %c0_i32_0 = arith.constant 0 : i32
    return %c2_i32, %arg0, %arg2, %c0_i32 : i32, i32, i32, i32
  }
  func.func @transform_8(%arg0: i32, %arg1: i32, %arg2: i32) -> (i32, i32, i32) {
    %c0_i32 = arith.constant 0 : i32
    %c0_i32_0 = arith.constant 0 : i32
    return %arg0, %arg1, %c0_i32 : i32, i32, i32
  }
}

module attributes {stable_mosaic.version = 11 : i64} {
  func.func @kernel(%arg0: i32, %arg1: memref<24x32xbf16, #tpu.memory_space<vmem>>, %arg2: memref<1x32xf32, #tpu.memory_space<vmem>>, %arg3: memref<24x32xbf16, #tpu.memory_space<vmem>>) attributes {dimension_semantics = [#tpu.dimension_semantics<parallel>], iteration_bounds = array<i64: 1>, scalar_prefetch = 0 : i64, scratch_operands = 0 : i64, tpu.core_type = #tpu.core_type<tc>, window_params = [{transform_indices = @transform_0, window_bounds = array<i64: 24, 32>}, {pipeline_mode = #tpu.pipeline_mode<synchronous>, transform_indices = @transform_1, window_bounds = array<i64: 1, 32>}, {transform_indices = @transform_2, window_bounds = array<i64: 24, 32>}]} {
    %c0 = arith.constant 0 : index
    %c0_0 = arith.constant 0 : index
    %0 = vector.load %arg1[%c0, %c0_0] : memref<24x32xbf16, #tpu.memory_space<vmem>>, vector<24x32xbf16>
    %1 = arith.extf %0 : vector<24x32xbf16> to vector<24x32xf32>
    %2 = arith.mulf %1, %1 : vector<24x32xf32>
    %cst = arith.constant dense<0.000000e+00> : vector<24xf32>
    %3 = vector.multi_reduction <add>, %2, %cst [1] : vector<24x32xf32> to vector<24xf32>
    %4 = vector.shape_cast %3 : vector<24xf32> to vector<24x1xf32>
    %cst_1 = arith.constant 3.200000e+01 : f32
    %5 = vector.broadcast %cst_1 : f32 to vector<24x1xf32>
    %6 = arith.divf %4, %5 : vector<24x1xf32>
    %cst_2 = arith.constant 9.99999997E-7 : f32
    %7 = vector.broadcast %cst_2 : f32 to vector<24x1xf32>
    %8 = arith.addf %6, %7 : vector<24x1xf32>
    %9 = math.rsqrt %8 : vector<24x1xf32>
    %10 = vector.broadcast %9 : vector<24x1xf32> to vector<24x32xf32>
    %11 = arith.mulf %1, %10 : vector<24x32xf32>
    %c0_3 = arith.constant 0 : index
    %c0_4 = arith.constant 0 : index
    %12 = vector.load %arg2[%c0_3, %c0_4] : memref<1x32xf32, #tpu.memory_space<vmem>>, vector<1x32xf32>
    %13 = vector.broadcast %12 : vector<1x32xf32> to vector<24x32xf32>
    %14 = arith.mulf %11, %13 : vector<24x32xf32>
    %15 = arith.truncf %14 : vector<24x32xf32> to vector<24x32xbf16>
    %c0_5 = arith.constant 0 : index
    %c0_6 = arith.constant 0 : index
    %16 = vector.load %arg3[%c0_5, %c0_6] : memref<24x32xbf16, #tpu.memory_space<vmem>>, vector<24x32xbf16>
    tpu.vector_store %arg3[%c0_5, %c0_6], %15 {strides = array<i32>} : memref<24x32xbf16, #tpu.memory_space<vmem>>, vector<24x32xbf16>,
    return
  }
  func.func @transform_0(%arg0: i32) -> (i32, i32) {
    %c0_i32 = arith.constant 0 : i32
    %c0_i32_0 = arith.constant 0 : i32
    return %arg0, %c0_i32 : i32, i32
  }
  func.func @transform_1(%arg0: i32) -> (i32, i32) {
    %c0_i32 = arith.constant 0 : i32
    %c0_i32_0 = arith.constant 0 : i32
    %c0_i32_1 = arith.constant 0 : i32
    return %c0_i32, %c0_i32_0 : i32, i32
  }
  func.func @transform_2(%arg0: i32) -> (i32, i32) {
    %c0_i32 = arith.constant 0 : i32
    %c0_i32_0 = arith.constant 0 : i32
    return %arg0, %c0_i32 : i32, i32
  }
}

module attributes {stable_mosaic.version = 11 : i64} {
  func.func @_qkv_kernel(%arg0: i32, %arg1: i32, %arg2: i32, %arg3: i32, %arg4: memref<24x32xbf16, #tpu.memory_space<vmem>>, %arg5: memref<1x32x32xbf16, #tpu.memory_space<vmem>>, %arg6: memref<1x24x32xbf16, #tpu.memory_space<vmem>>, %arg7: memref<24x32xf32, #tpu.memory_space<vmem>>) attributes {dimension_semantics = [#tpu.dimension_semantics<parallel>, #tpu.dimension_semantics<parallel>, #tpu.dimension_semantics<parallel>, #tpu.dimension_semantics<arbitrary>], iteration_bounds = array<i64: 3, 1, 1, 1>, scalar_prefetch = 0 : i64, scratch_operands = 1 : i64, tpu.core_type = #tpu.core_type<tc>, window_params = [{transform_indices = @transform_0, window_bounds = array<i64: 24, 32>}, {transform_indices = @transform_1, window_bounds = array<i64: 1, 32, 32>}, {transform_indices = @transform_2, window_bounds = array<i64: 1, 24, 32>}]} {
    %c0_i32 = arith.constant 0 : i32
    %0 = arith.cmpi eq, %arg3, %c0_i32 : i32
    %1 = arith.extui %0 : i1 to i32
    %c0_i32_0 = arith.constant 0 : i32
    %2 = arith.cmpi ne, %1, %c0_i32_0 : i32
    scf.if %2 {
      %cst_11 = arith.constant 0.000000e+00 : f32
      %13 = vector.broadcast %cst_11 : f32 to vector<24x32xf32>
      %c0_12 = arith.constant 0 : index
      %c0_13 = arith.constant 0 : index
      %14 = vector.load %arg7[%c0_12, %c0_13] : memref<24x32xf32, #tpu.memory_space<vmem>>, vector<24x32xf32>
      tpu.vector_store %arg7[%c0_12, %c0_13], %13 {strides = array<i32>} : memref<24x32xf32, #tpu.memory_space<vmem>>, vector<24x32xf32>,
    } else {
    }
    %c0 = arith.constant 0 : index
    %c0_1 = arith.constant 0 : index
    %3 = vector.load %arg7[%c0, %c0_1] : memref<24x32xf32, #tpu.memory_space<vmem>>, vector<24x32xf32>
    %c0_2 = arith.constant 0 : index
    %c0_3 = arith.constant 0 : index
    %4 = vector.load %arg4[%c0_2, %c0_3] : memref<24x32xbf16, #tpu.memory_space<vmem>>, vector<24x32xbf16>
    %c0_4 = arith.constant 0 : index
    %c0_5 = arith.constant 0 : index
    %c0_6 = arith.constant 0 : index
    %5 = vector.load %arg5[%c0_4, %c0_5, %c0_6] : memref<1x32x32xbf16, #tpu.memory_space<vmem>>, vector<1x32x32xbf16>
    %6 = vector.shape_cast %5 : vector<1x32x32xbf16> to vector<32x32xbf16>
    %cst = arith.constant dense<0.000000e+00> : vector<24x32xf32>
    %7 = tpu.matmul %4, %6, %cst {dimension_numbers = #tpu.dot_dimension_numbers<[1], [0], [0], [1], [0, 0, 1, 1], [], []>} : vector<24x32xbf16>, vector<32x32xbf16>, vector<24x32xf32> -> vector<24x32xf32>
    %8 = arith.addf %3, %7 : vector<24x32xf32>
    %c0_7 = arith.constant 0 : index
    %c0_8 = arith.constant 0 : index
    %9 = vector.load %arg7[%c0_7, %c0_8] : memref<24x32xf32, #tpu.memory_space<vmem>>, vector<24x32xf32>
    tpu.vector_store %arg7[%c0_7, %c0_8], %8 {strides = array<i32>} : memref<24x32xf32, #tpu.memory_space<vmem>>, vector<24x32xf32>,
    %c0_i32_9 = arith.constant 0 : i32
    %10 = arith.cmpi eq, %arg3, %c0_i32_9 : i32
    %11 = arith.extui %10 : i1 to i32
    %c0_i32_10 = arith.constant 0 : i32
    %12 = arith.cmpi ne, %11, %c0_i32_10 : i32
    scf.if %12 {
      %c0_11 = arith.constant 0 : index
      %c0_12 = arith.constant 0 : index
      %13 = vector.load %arg7[%c0_11, %c0_12] : memref<24x32xf32, #tpu.memory_space<vmem>>, vector<24x32xf32>
      %14 = arith.truncf %13 : vector<24x32xf32> to vector<24x32xbf16>
      %c0_13 = arith.constant 0 : index
      %c0_14 = arith.constant 0 : index
      %c0_15 = arith.constant 0 : index
      %15 = vector.load %arg6[%c0_13, %c0_14, %c0_15] : memref<1x24x32xbf16, #tpu.memory_space<vmem>>, vector<1x24x32xbf16>
      %16 = vector.shape_cast %15 : vector<1x24x32xbf16> to vector<24x32xbf16>
      %17 = vector.shape_cast %14 : vector<24x32xbf16> to vector<1x24x32xbf16>
      tpu.vector_store %arg6[%c0_13, %c0_14, %c0_15], %17 {strides = array<i32>} : memref<1x24x32xbf16, #tpu.memory_space<vmem>>, vector<1x24x32xbf16>,
    } else {
    }
    return
  }
  func.func @transform_0(%arg0: i32, %arg1: i32, %arg2: i32, %arg3: i32) -> (i32, i32) {
    %c0_i32 = arith.constant 0 : i32
    return %arg1, %arg3 : i32, i32
  }
  func.func @transform_1(%arg0: i32, %arg1: i32, %arg2: i32, %arg3: i32) -> (i32, i32, i32) {
    %c0_i32 = arith.constant 0 : i32
    return %arg0, %arg3, %arg2 : i32, i32, i32
  }
  func.func @transform_2(%arg0: i32, %arg1: i32, %arg2: i32, %arg3: i32) -> (i32, i32, i32) {
    %c0_i32 = arith.constant 0 : i32
    return %arg0, %arg1, %arg2 : i32, i32, i32
  }
}

module attributes {stable_mosaic.version = 11 : i64} {
  func.func @_mm_kernel_nn(%arg0: i32, %arg1: i32, %arg2: i32, %arg3: memref<24x32xbf16, #tpu.memory_space<vmem>>, %arg4: memref<32x32xbf16, #tpu.memory_space<vmem>>, %arg5: memref<24x32xbf16, #tpu.memory_space<vmem>>, %arg6: memref<24x32xf32, #tpu.memory_space<vmem>>) attributes {dimension_semantics = [#tpu.dimension_semantics<parallel>, #tpu.dimension_semantics<parallel>, #tpu.dimension_semantics<arbitrary>], iteration_bounds = array<i64: 1, 1, 1>, scalar_prefetch = 0 : i64, scratch_operands = 1 : i64, tpu.core_type = #tpu.core_type<tc>, window_params = [{transform_indices = @transform_0, window_bounds = array<i64: 24, 32>}, {transform_indices = @transform_1, window_bounds = array<i64: 32, 32>}, {transform_indices = @transform_2, window_bounds = array<i64: 24, 32>}]} {
    %c0_i32 = arith.constant 0 : i32
    %0 = arith.cmpi eq, %arg2, %c0_i32 : i32
    %1 = arith.extui %0 : i1 to i32
    %c0_i32_0 = arith.constant 0 : i32
    %2 = arith.cmpi ne, %1, %c0_i32_0 : i32
    scf.if %2 {
      %cst_10 = arith.constant 0.000000e+00 : f32
      %12 = vector.broadcast %cst_10 : f32 to vector<24x32xf32>
      %c0_11 = arith.constant 0 : index
      %c0_12 = arith.constant 0 : index
      %13 = vector.load %arg6[%c0_11, %c0_12] : memref<24x32xf32, #tpu.memory_space<vmem>>, vector<24x32xf32>
      tpu.vector_store %arg6[%c0_11, %c0_12], %12 {strides = array<i32>} : memref<24x32xf32, #tpu.memory_space<vmem>>, vector<24x32xf32>,
    } else {
    }
    %c0 = arith.constant 0 : index
    %c0_1 = arith.constant 0 : index
    %3 = vector.load %arg6[%c0, %c0_1] : memref<24x32xf32, #tpu.memory_space<vmem>>, vector<24x32xf32>
    %c0_2 = arith.constant 0 : index
    %c0_3 = arith.constant 0 : index
    %4 = vector.load %arg3[%c0_2, %c0_3] : memref<24x32xbf16, #tpu.memory_space<vmem>>, vector<24x32xbf16>
    %c0_4 = arith.constant 0 : index
    %c0_5 = arith.constant 0 : index
    %5 = vector.load %arg4[%c0_4, %c0_5] : memref<32x32xbf16, #tpu.memory_space<vmem>>, vector<32x32xbf16>
    %cst = arith.constant dense<0.000000e+00> : vector<24x32xf32>
    %6 = tpu.matmul %4, %5, %cst {dimension_numbers = #tpu.dot_dimension_numbers<[1], [0], [0], [1], [0, 0, 1, 1], [], []>} : vector<24x32xbf16>, vector<32x32xbf16>, vector<24x32xf32> -> vector<24x32xf32>
    %7 = arith.addf %3, %6 : vector<24x32xf32>
    %c0_6 = arith.constant 0 : index
    %c0_7 = arith.constant 0 : index
    %8 = vector.load %arg6[%c0_6, %c0_7] : memref<24x32xf32, #tpu.memory_space<vmem>>, vector<24x32xf32>
    tpu.vector_store %arg6[%c0_6, %c0_7], %7 {strides = array<i32>} : memref<24x32xf32, #tpu.memory_space<vmem>>, vector<24x32xf32>,
    %c0_i32_8 = arith.constant 0 : i32
    %9 = arith.cmpi eq, %arg2, %c0_i32_8 : i32
    %10 = arith.extui %9 : i1 to i32
    %c0_i32_9 = arith.constant 0 : i32
    %11 = arith.cmpi ne, %10, %c0_i32_9 : i32
    scf.if %11 {
      %c0_10 = arith.constant 0 : index
      %c0_11 = arith.constant 0 : index
      %12 = vector.load %arg6[%c0_10, %c0_11] : memref<24x32xf32, #tpu.memory_space<vmem>>, vector<24x32xf32>
      %13 = arith.truncf %12 : vector<24x32xf32> to vector<24x32xbf16>
      %c0_12 = arith.constant 0 : index
      %c0_13 = arith.constant 0 : index
      %14 = vector.load %arg5[%c0_12, %c0_13] : memref<24x32xbf16, #tpu.memory_space<vmem>>, vector<24x32xbf16>
      tpu.vector_store %arg5[%c0_12, %c0_13], %13 {strides = array<i32>} : memref<24x32xbf16, #tpu.memory_space<vmem>>, vector<24x32xbf16>,
    } else {
    }
    return
  }
  func.func @transform_0(%arg0: i32, %arg1: i32, %arg2: i32) -> (i32, i32) {
    %c0_i32 = arith.constant 0 : i32
    return %arg0, %arg2 : i32, i32
  }
  func.func @transform_1(%arg0: i32, %arg1: i32, %arg2: i32) -> (i32, i32) {
    %c0_i32 = arith.constant 0 : i32
    return %arg2, %arg1 : i32, i32
  }
  func.func @transform_2(%arg0: i32, %arg1: i32, %arg2: i32) -> (i32, i32) {
    %c0_i32 = arith.constant 0 : i32
    return %arg0, %arg1 : i32, i32
  }
}

module attributes {stable_mosaic.version = 11 : i64} {
  func.func @_swiglu_kernel(%arg0: i32, %arg1: i32, %arg2: i32, %arg3: memref<24x32xbf16, #tpu.memory_space<vmem>>, %arg4: memref<32x64xbf16, #tpu.memory_space<vmem>>, %arg5: memref<32x64xbf16, #tpu.memory_space<vmem>>, %arg6: memref<24x64xbf16, #tpu.memory_space<vmem>>, %arg7: memref<24x64xf32, #tpu.memory_space<vmem>>, %arg8: memref<24x64xf32, #tpu.memory_space<vmem>>) attributes {dimension_semantics = [#tpu.dimension_semantics<parallel>, #tpu.dimension_semantics<parallel>, #tpu.dimension_semantics<arbitrary>], iteration_bounds = array<i64: 1, 1, 1>, scalar_prefetch = 0 : i64, scratch_operands = 2 : i64, tpu.core_type = #tpu.core_type<tc>, window_params = [{transform_indices = @transform_0, window_bounds = array<i64: 24, 32>}, {transform_indices = @transform_1, window_bounds = array<i64: 32, 64>}, {transform_indices = @transform_2, window_bounds = array<i64: 32, 64>}, {transform_indices = @transform_3, window_bounds = array<i64: 24, 64>}]} {
    %c0_i32 = arith.constant 0 : i32
    %0 = arith.cmpi eq, %arg2, %c0_i32 : i32
    %1 = arith.extui %0 : i1 to i32
    %c0_i32_0 = arith.constant 0 : i32
    %2 = arith.cmpi ne, %1, %c0_i32_0 : i32
    scf.if %2 {
      %cst_17 = arith.constant 0.000000e+00 : f32
      %17 = vector.broadcast %cst_17 : f32 to vector<24x64xf32>
      %c0_18 = arith.constant 0 : index
      %c0_19 = arith.constant 0 : index
      %18 = vector.load %arg7[%c0_18, %c0_19] : memref<24x64xf32, #tpu.memory_space<vmem>>, vector<24x64xf32>
      tpu.vector_store %arg7[%c0_18, %c0_19], %17 {strides = array<i32>} : memref<24x64xf32, #tpu.memory_space<vmem>>, vector<24x64xf32>,
      %cst_20 = arith.constant 0.000000e+00 : f32
      %19 = vector.broadcast %cst_20 : f32 to vector<24x64xf32>
      %c0_21 = arith.constant 0 : index
      %c0_22 = arith.constant 0 : index
      %20 = vector.load %arg8[%c0_21, %c0_22] : memref<24x64xf32, #tpu.memory_space<vmem>>, vector<24x64xf32>
      tpu.vector_store %arg8[%c0_21, %c0_22], %19 {strides = array<i32>} : memref<24x64xf32, #tpu.memory_space<vmem>>, vector<24x64xf32>,
    } else {
    }
    %c0 = arith.constant 0 : index
    %c0_1 = arith.constant 0 : index
    %3 = vector.load %arg3[%c0, %c0_1] : memref<24x32xbf16, #tpu.memory_space<vmem>>, vector<24x32xbf16>
    %c0_2 = arith.constant 0 : index
    %c0_3 = arith.constant 0 : index
    %4 = vector.load %arg7[%c0_2, %c0_3] : memref<24x64xf32, #tpu.memory_space<vmem>>, vector<24x64xf32>
    %c0_4 = arith.constant 0 : index
    %c0_5 = arith.constant 0 : index
    %5 = vector.load %arg4[%c0_4, %c0_5] : memref<32x64xbf16, #tpu.memory_space<vmem>>, vector<32x64xbf16>
    %cst = arith.constant dense<0.000000e+00> : vector<24x64xf32>
    %6 = tpu.matmul %3, %5, %cst {dimension_numbers = #tpu.dot_dimension_numbers<[1], [0], [0], [1], [0, 0, 1, 1], [], []>} : vector<24x32xbf16>, vector<32x64xbf16>, vector<24x64xf32> -> vector<24x64xf32>
    %7 = arith.addf %4, %6 : vector<24x64xf32>
    %c0_6 = arith.constant 0 : index
    %c0_7 = arith.constant 0 : index
    %8 = vector.load %arg7[%c0_6, %c0_7] : memref<24x64xf32, #tpu.memory_space<vmem>>, vector<24x64xf32>
    tpu.vector_store %arg7[%c0_6, %c0_7], %7 {strides = array<i32>} : memref<24x64xf32, #tpu.memory_space<vmem>>, vector<24x64xf32>,
    %c0_8 = arith.constant 0 : index
    %c0_9 = arith.constant 0 : index
    %9 = vector.load %arg8[%c0_8, %c0_9] : memref<24x64xf32, #tpu.memory_space<vmem>>, vector<24x64xf32>
    %c0_10 = arith.constant 0 : index
    %c0_11 = arith.constant 0 : index
    %10 = vector.load %arg5[%c0_10, %c0_11] : memref<32x64xbf16, #tpu.memory_space<vmem>>, vector<32x64xbf16>
    %cst_12 = arith.constant dense<0.000000e+00> : vector<24x64xf32>
    %11 = tpu.matmul %3, %10, %cst_12 {dimension_numbers = #tpu.dot_dimension_numbers<[1], [0], [0], [1], [0, 0, 1, 1], [], []>} : vector<24x32xbf16>, vector<32x64xbf16>, vector<24x64xf32> -> vector<24x64xf32>
    %12 = arith.addf %9, %11 : vector<24x64xf32>
    %c0_13 = arith.constant 0 : index
    %c0_14 = arith.constant 0 : index
    %13 = vector.load %arg8[%c0_13, %c0_14] : memref<24x64xf32, #tpu.memory_space<vmem>>, vector<24x64xf32>
    tpu.vector_store %arg8[%c0_13, %c0_14], %12 {strides = array<i32>} : memref<24x64xf32, #tpu.memory_space<vmem>>, vector<24x64xf32>,
    %c0_i32_15 = arith.constant 0 : i32
    %14 = arith.cmpi eq, %arg2, %c0_i32_15 : i32
    %15 = arith.extui %14 : i1 to i32
    %c0_i32_16 = arith.constant 0 : i32
    %16 = arith.cmpi ne, %15, %c0_i32_16 : i32
    scf.if %16 {
      %c0_17 = arith.constant 0 : index
      %c0_18 = arith.constant 0 : index
      %17 = vector.load %arg7[%c0_17, %c0_18] : memref<24x64xf32, #tpu.memory_space<vmem>>, vector<24x64xf32>
      %cst_19 = arith.constant 0.000000e+00 : f32
      %18 = vector.broadcast %cst_19 : f32 to vector<24x64xf32>
      %19 = arith.subf %18, %17 : vector<24x64xf32>
      %20 = math.exp %19 : vector<24x64xf32>
      %cst_20 = arith.constant 1.000000e+00 : f32
      %21 = vector.broadcast %cst_20 : f32 to vector<24x64xf32>
      %22 = arith.addf %21, %20 : vector<24x64xf32>
      %cst_21 = arith.constant 1.000000e+00 : f32
      %23 = vector.broadcast %cst_21 : f32 to vector<24x64xf32>
      %24 = arith.divf %23, %22 : vector<24x64xf32>
      %25 = arith.mulf %17, %24 : vector<24x64xf32>
      %c0_22 = arith.constant 0 : index
      %c0_23 = arith.constant 0 : index
      %26 = vector.load %arg8[%c0_22, %c0_23] : memref<24x64xf32, #tpu.memory_space<vmem>>, vector<24x64xf32>
      %27 = arith.mulf %25, %26 : vector<24x64xf32>
      %28 = arith.truncf %27 : vector<24x64xf32> to vector<24x64xbf16>
      %c0_24 = arith.constant 0 : index
      %c0_25 = arith.constant 0 : index
      %29 = vector.load %arg6[%c0_24, %c0_25] : memref<24x64xbf16, #tpu.memory_space<vmem>>, vector<24x64xbf16>
      tpu.vector_store %arg6[%c0_24, %c0_25], %28 {strides = array<i32>} : memref<24x64xbf16, #tpu.memory_space<vmem>>, vector<24x64xbf16>,
    } else {
    }
    return
  }
  func.func @transform_0(%arg0: i32, %arg1: i32, %arg2: i32) -> (i32, i32) {
    %c0_i32 = arith.constant 0 : i32
    return %arg0, %arg2 : i32, i32
  }
  func.func @transform_1(%arg0: i32, %arg1: i32, %arg2: i32) -> (i32, i32) {
    %c0_i32 = arith.constant 0 : i32
    return %arg2, %arg1 : i32, i32
  }
  func.func @transform_2(%arg0: i32, %arg1: i32, %arg2: i32) -> (i32, i32) {
    %c0_i32 = arith.constant 0 : i32
    return %arg2, %arg1 : i32, i32
  }
  func.func @transform_3(%arg0: i32, %arg1: i32, %arg2: i32) -> (i32, i32) {
    %c0_i32 = arith.constant 0 : i32
    return %arg0, %arg1 : i32, i32
  }
}

module attributes {stable_mosaic.version = 11 : i64} {
  func.func @_mm_kernel_nn(%arg0: i32, %arg1: i32, %arg2: i32, %arg3: memref<24x64xbf16, #tpu.memory_space<vmem>>, %arg4: memref<64x32xbf16, #tpu.memory_space<vmem>>, %arg5: memref<24x32xbf16, #tpu.memory_space<vmem>>, %arg6: memref<24x32xf32, #tpu.memory_space<vmem>>) attributes {dimension_semantics = [#tpu.dimension_semantics<parallel>, #tpu.dimension_semantics<parallel>, #tpu.dimension_semantics<arbitrary>], iteration_bounds = array<i64: 1, 1, 1>, scalar_prefetch = 0 : i64, scratch_operands = 1 : i64, tpu.core_type = #tpu.core_type<tc>, window_params = [{transform_indices = @transform_0, window_bounds = array<i64: 24, 64>}, {transform_indices = @transform_1, window_bounds = array<i64: 64, 32>}, {transform_indices = @transform_2, window_bounds = array<i64: 24, 32>}]} {
    %c0_i32 = arith.constant 0 : i32
    %0 = arith.cmpi eq, %arg2, %c0_i32 : i32
    %1 = arith.extui %0 : i1 to i32
    %c0_i32_0 = arith.constant 0 : i32
    %2 = arith.cmpi ne, %1, %c0_i32_0 : i32
    scf.if %2 {
      %cst_10 = arith.constant 0.000000e+00 : f32
      %12 = vector.broadcast %cst_10 : f32 to vector<24x32xf32>
      %c0_11 = arith.constant 0 : index
      %c0_12 = arith.constant 0 : index
      %13 = vector.load %arg6[%c0_11, %c0_12] : memref<24x32xf32, #tpu.memory_space<vmem>>, vector<24x32xf32>
      tpu.vector_store %arg6[%c0_11, %c0_12], %12 {strides = array<i32>} : memref<24x32xf32, #tpu.memory_space<vmem>>, vector<24x32xf32>,
    } else {
    }
    %c0 = arith.constant 0 : index
    %c0_1 = arith.constant 0 : index
    %3 = vector.load %arg6[%c0, %c0_1] : memref<24x32xf32, #tpu.memory_space<vmem>>, vector<24x32xf32>
    %c0_2 = arith.constant 0 : index
    %c0_3 = arith.constant 0 : index
    %4 = vector.load %arg3[%c0_2, %c0_3] : memref<24x64xbf16, #tpu.memory_space<vmem>>, vector<24x64xbf16>
    %c0_4 = arith.constant 0 : index
    %c0_5 = arith.constant 0 : index
    %5 = vector.load %arg4[%c0_4, %c0_5] : memref<64x32xbf16, #tpu.memory_space<vmem>>, vector<64x32xbf16>
    %cst = arith.constant dense<0.000000e+00> : vector<24x32xf32>
    %6 = tpu.matmul %4, %5, %cst {dimension_numbers = #tpu.dot_dimension_numbers<[1], [0], [0], [1], [0, 0, 1, 1], [], []>} : vector<24x64xbf16>, vector<64x32xbf16>, vector<24x32xf32> -> vector<24x32xf32>
    %7 = arith.addf %3, %6 : vector<24x32xf32>
    %c0_6 = arith.constant 0 : index
    %c0_7 = arith.constant 0 : index
    %8 = vector.load %arg6[%c0_6, %c0_7] : memref<24x32xf32, #tpu.memory_space<vmem>>, vector<24x32xf32>
    tpu.vector_store %arg6[%c0_6, %c0_7], %7 {strides = array<i32>} : memref<24x32xf32, #tpu.memory_space<vmem>>, vector<24x32xf32>,
    %c0_i32_8 = arith.constant 0 : i32
    %9 = arith.cmpi eq, %arg2, %c0_i32_8 : i32
    %10 = arith.extui %9 : i1 to i32
    %c0_i32_9 = arith.constant 0 : i32
    %11 = arith.cmpi ne, %10, %c0_i32_9 : i32
    scf.if %11 {
      %c0_10 = arith.constant 0 : index
      %c0_11 = arith.constant 0 : index
      %12 = vector.load %arg6[%c0_10, %c0_11] : memref<24x32xf32, #tpu.memory_space<vmem>>, vector<24x32xf32>
      %13 = arith.truncf %12 : vector<24x32xf32> to vector<24x32xbf16>
      %c0_12 = arith.constant 0 : index
      %c0_13 = arith.constant 0 : index
      %14 = vector.load %arg5[%c0_12, %c0_13] : memref<24x32xbf16, #tpu.memory_space<vmem>>, vector<24x32xbf16>
      tpu.vector_store %arg5[%c0_12, %c0_13], %13 {strides = array<i32>} : memref<24x32xbf16, #tpu.memory_space<vmem>>, vector<24x32xbf16>,
    } else {
    }
    return
  }
  func.func @transform_0(%arg0: i32, %arg1: i32, %arg2: i32) -> (i32, i32) {
    %c0_i32 = arith.constant 0 : i32
    return %arg0, %arg2 : i32, i32
  }
  func.func @transform_1(%arg0: i32, %arg1: i32, %arg2: i32) -> (i32, i32) {
    %c0_i32 = arith.constant 0 : i32
    return %arg2, %arg1 : i32, i32
  }
  func.func @transform_2(%arg0: i32, %arg1: i32, %arg2: i32) -> (i32, i32) {
    %c0_i32 = arith.constant 0 : i32
    return %arg0, %arg1 : i32, i32
  }
}

module attributes {stable_mosaic.version = 11 : i64} {
  func.func @_mm_kernel_nn(%arg0: i32, %arg1: i32, %arg2: i32, %arg3: memref<8x32xbf16, #tpu.memory_space<vmem>>, %arg4: memref<32x64xbf16, #tpu.memory_space<vmem>>, %arg5: memref<8x64xf32, #tpu.memory_space<vmem>>, %arg6: memref<8x64xf32, #tpu.memory_space<vmem>>) attributes {dimension_semantics = [#tpu.dimension_semantics<parallel>, #tpu.dimension_semantics<parallel>, #tpu.dimension_semantics<arbitrary>], iteration_bounds = array<i64: 1, 1, 1>, scalar_prefetch = 0 : i64, scratch_operands = 1 : i64, tpu.core_type = #tpu.core_type<tc>, window_params = [{transform_indices = @transform_0, window_bounds = array<i64: 8, 32>}, {transform_indices = @transform_1, window_bounds = array<i64: 32, 64>}, {transform_indices = @transform_2, window_bounds = array<i64: 8, 64>}]} {
    %c0_i32 = arith.constant 0 : i32
    %0 = arith.cmpi eq, %arg2, %c0_i32 : i32
    %1 = arith.extui %0 : i1 to i32
    %c0_i32_0 = arith.constant 0 : i32
    %2 = arith.cmpi ne, %1, %c0_i32_0 : i32
    scf.if %2 {
      %cst_10 = arith.constant 0.000000e+00 : f32
      %12 = vector.broadcast %cst_10 : f32 to vector<8x64xf32>
      %c0_11 = arith.constant 0 : index
      %c0_12 = arith.constant 0 : index
      %13 = vector.load %arg6[%c0_11, %c0_12] : memref<8x64xf32, #tpu.memory_space<vmem>>, vector<8x64xf32>
      tpu.vector_store %arg6[%c0_11, %c0_12], %12 {strides = array<i32>} : memref<8x64xf32, #tpu.memory_space<vmem>>, vector<8x64xf32>,
    } else {
    }
    %c0 = arith.constant 0 : index
    %c0_1 = arith.constant 0 : index
    %3 = vector.load %arg6[%c0, %c0_1] : memref<8x64xf32, #tpu.memory_space<vmem>>, vector<8x64xf32>
    %c0_2 = arith.constant 0 : index
    %c0_3 = arith.constant 0 : index
    %4 = vector.load %arg3[%c0_2, %c0_3] : memref<8x32xbf16, #tpu.memory_space<vmem>>, vector<8x32xbf16>
    %c0_4 = arith.constant 0 : index
    %c0_5 = arith.constant 0 : index
    %5 = vector.load %arg4[%c0_4, %c0_5] : memref<32x64xbf16, #tpu.memory_space<vmem>>, vector<32x64xbf16>
    %cst = arith.constant dense<0.000000e+00> : vector<8x64xf32>
    %6 = tpu.matmul %4, %5, %cst {dimension_numbers = #tpu.dot_dimension_numbers<[1], [0], [0], [1], [0, 0, 1, 1], [], []>} : vector<8x32xbf16>, vector<32x64xbf16>, vector<8x64xf32> -> vector<8x64xf32>
    %7 = arith.addf %3, %6 : vector<8x64xf32>
    %c0_6 = arith.constant 0 : index
    %c0_7 = arith.constant 0 : index
    %8 = vector.load %arg6[%c0_6, %c0_7] : memref<8x64xf32, #tpu.memory_space<vmem>>, vector<8x64xf32>
    tpu.vector_store %arg6[%c0_6, %c0_7], %7 {strides = array<i32>} : memref<8x64xf32, #tpu.memory_space<vmem>>, vector<8x64xf32>,
    %c0_i32_8 = arith.constant 0 : i32
    %9 = arith.cmpi eq, %arg2, %c0_i32_8 : i32
    %10 = arith.extui %9 : i1 to i32
    %c0_i32_9 = arith.constant 0 : i32
    %11 = arith.cmpi ne, %10, %c0_i32_9 : i32
    scf.if %11 {
      %c0_10 = arith.constant 0 : index
      %c0_11 = arith.constant 0 : index
      %12 = vector.load %arg6[%c0_10, %c0_11] : memref<8x64xf32, #tpu.memory_space<vmem>>, vector<8x64xf32>
      %c0_12 = arith.constant 0 : index
      %c0_13 = arith.constant 0 : index
      %13 = vector.load %arg5[%c0_12, %c0_13] : memref<8x64xf32, #tpu.memory_space<vmem>>, vector<8x64xf32>
      tpu.vector_store %arg5[%c0_12, %c0_13], %12 {strides = array<i32>} : memref<8x64xf32, #tpu.memory_space<vmem>>, vector<8x64xf32>,
    } else {
    }
    return
  }
  func.func @transform_0(%arg0: i32, %arg1: i32, %arg2: i32) -> (i32, i32) {
    %c0_i32 = arith.constant 0 : i32
    return %arg0, %arg2 : i32, i32
  }
  func.func @transform_1(%arg0: i32, %arg1: i32, %arg2: i32) -> (i32, i32) {
    %c0_i32 = arith.constant 0 : i32
    return %arg2, %arg1 : i32, i32
  }
  func.func @transform_2(%arg0: i32, %arg1: i32, %arg2: i32) -> (i32, i32) {
    %c0_i32 = arith.constant 0 : i32
    return %arg0, %arg1 : i32, i32
  }
}

module attributes {stable_mosaic.version = 11 : i64} {
  func.func @_qkv_kernel(%arg0: i32, %arg1: i32, %arg2: i32, %arg3: i32, %arg4: memref<8x32xbf16, #tpu.memory_space<vmem>>, %arg5: memref<1x32x32xbf16, #tpu.memory_space<vmem>>, %arg6: memref<1x8x32xbf16, #tpu.memory_space<vmem>>, %arg7: memref<8x32xf32, #tpu.memory_space<vmem>>) attributes {dimension_semantics = [#tpu.dimension_semantics<parallel>, #tpu.dimension_semantics<parallel>, #tpu.dimension_semantics<parallel>, #tpu.dimension_semantics<arbitrary>], iteration_bounds = array<i64: 3, 1, 1, 1>, scalar_prefetch = 0 : i64, scratch_operands = 1 : i64, tpu.core_type = #tpu.core_type<tc>, window_params = [{transform_indices = @transform_0, window_bounds = array<i64: 8, 32>}, {transform_indices = @transform_1, window_bounds = array<i64: 1, 32, 32>}, {transform_indices = @transform_2, window_bounds = array<i64: 1, 8, 32>}]} {
    %c0_i32 = arith.constant 0 : i32
    %0 = arith.cmpi eq, %arg3, %c0_i32 : i32
    %1 = arith.extui %0 : i1 to i32
    %c0_i32_0 = arith.constant 0 : i32
    %2 = arith.cmpi ne, %1, %c0_i32_0 : i32
    scf.if %2 {
      %cst_11 = arith.constant 0.000000e+00 : f32
      %13 = vector.broadcast %cst_11 : f32 to vector<8x32xf32>
      %c0_12 = arith.constant 0 : index
      %c0_13 = arith.constant 0 : index
      %14 = vector.load %arg7[%c0_12, %c0_13] : memref<8x32xf32, #tpu.memory_space<vmem>>, vector<8x32xf32>
      tpu.vector_store %arg7[%c0_12, %c0_13], %13 {strides = array<i32>} : memref<8x32xf32, #tpu.memory_space<vmem>>, vector<8x32xf32>,
    } else {
    }
    %c0 = arith.constant 0 : index
    %c0_1 = arith.constant 0 : index
    %3 = vector.load %arg7[%c0, %c0_1] : memref<8x32xf32, #tpu.memory_space<vmem>>, vector<8x32xf32>
    %c0_2 = arith.constant 0 : index
    %c0_3 = arith.constant 0 : index
    %4 = vector.load %arg4[%c0_2, %c0_3] : memref<8x32xbf16, #tpu.memory_space<vmem>>, vector<8x32xbf16>
    %c0_4 = arith.constant 0 : index
    %c0_5 = arith.constant 0 : index
    %c0_6 = arith.constant 0 : index
    %5 = vector.load %arg5[%c0_4, %c0_5, %c0_6] : memref<1x32x32xbf16, #tpu.memory_space<vmem>>, vector<1x32x32xbf16>
    %6 = vector.shape_cast %5 : vector<1x32x32xbf16> to vector<32x32xbf16>
    %cst = arith.constant dense<0.000000e+00> : vector<8x32xf32>
    %7 = tpu.matmul %4, %6, %cst {dimension_numbers = #tpu.dot_dimension_numbers<[1], [0], [0], [1], [0, 0, 1, 1], [], []>} : vector<8x32xbf16>, vector<32x32xbf16>, vector<8x32xf32> -> vector<8x32xf32>
    %8 = arith.addf %3, %7 : vector<8x32xf32>
    %c0_7 = arith.constant 0 : index
    %c0_8 = arith.constant 0 : index
    %9 = vector.load %arg7[%c0_7, %c0_8] : memref<8x32xf32, #tpu.memory_space<vmem>>, vector<8x32xf32>
    tpu.vector_store %arg7[%c0_7, %c0_8], %8 {strides = array<i32>} : memref<8x32xf32, #tpu.memory_space<vmem>>, vector<8x32xf32>,
    %c0_i32_9 = arith.constant 0 : i32
    %10 = arith.cmpi eq, %arg3, %c0_i32_9 : i32
    %11 = arith.extui %10 : i1 to i32
    %c0_i32_10 = arith.constant 0 : i32
    %12 = arith.cmpi ne, %11, %c0_i32_10 : i32
    scf.if %12 {
      %c0_11 = arith.constant 0 : index
      %c0_12 = arith.constant 0 : index
      %13 = vector.load %arg7[%c0_11, %c0_12] : memref<8x32xf32, #tpu.memory_space<vmem>>, vector<8x32xf32>
      %14 = arith.truncf %13 : vector<8x32xf32> to vector<8x32xbf16>
      %c0_13 = arith.constant 0 : index
      %c0_14 = arith.constant 0 : index
      %c0_15 = arith.constant 0 : index
      %15 = vector.load %arg6[%c0_13, %c0_14, %c0_15] : memref<1x8x32xbf16, #tpu.memory_space<vmem>>, vector<1x8x32xbf16>
      %16 = vector.shape_cast %15 : vector<1x8x32xbf16> to vector<8x32xbf16>
      %17 = vector.shape_cast %14 : vector<8x32xbf16> to vector<1x8x32xbf16>
      tpu.vector_store %arg6[%c0_13, %c0_14, %c0_15], %17 {strides = array<i32>} : memref<1x8x32xbf16, #tpu.memory_space<vmem>>, vector<1x8x32xbf16>,
    } else {
    }
    return
  }
  func.func @transform_0(%arg0: i32, %arg1: i32, %arg2: i32, %arg3: i32) -> (i32, i32) {
    %c0_i32 = arith.constant 0 : i32
    return %arg1, %arg3 : i32, i32
  }
  func.func @transform_1(%arg0: i32, %arg1: i32, %arg2: i32, %arg3: i32) -> (i32, i32, i32) {
    %c0_i32 = arith.constant 0 : i32
    return %arg0, %arg3, %arg2 : i32, i32, i32
  }
  func.func @transform_2(%arg0: i32, %arg1: i32, %arg2: i32, %arg3: i32) -> (i32, i32, i32) {
    %c0_i32 = arith.constant 0 : i32
    return %arg0, %arg1, %arg2 : i32, i32, i32
  }
}

module attributes {stable_mosaic.version = 11 : i64} {
  func.func @kernel(%arg0: i32, %arg1: memref<8x32xbf16, #tpu.memory_space<vmem>>, %arg2: memref<1x32xf32, #tpu.memory_space<vmem>>, %arg3: memref<8x32xbf16, #tpu.memory_space<vmem>>) attributes {dimension_semantics = [#tpu.dimension_semantics<parallel>], iteration_bounds = array<i64: 1>, scalar_prefetch = 0 : i64, scratch_operands = 0 : i64, tpu.core_type = #tpu.core_type<tc>, window_params = [{transform_indices = @transform_0, window_bounds = array<i64: 8, 32>}, {pipeline_mode = #tpu.pipeline_mode<synchronous>, transform_indices = @transform_1, window_bounds = array<i64: 1, 32>}, {transform_indices = @transform_2, window_bounds = array<i64: 8, 32>}]} {
    %c0 = arith.constant 0 : index
    %c0_0 = arith.constant 0 : index
    %0 = vector.load %arg1[%c0, %c0_0] : memref<8x32xbf16, #tpu.memory_space<vmem>>, vector<8x32xbf16>
    %1 = arith.extf %0 : vector<8x32xbf16> to vector<8x32xf32>
    %2 = arith.mulf %1, %1 : vector<8x32xf32>
    %cst = arith.constant dense<0.000000e+00> : vector<8xf32>
    %3 = vector.multi_reduction <add>, %2, %cst [1] : vector<8x32xf32> to vector<8xf32>
    %4 = vector.shape_cast %3 : vector<8xf32> to vector<8x1xf32>
    %cst_1 = arith.constant 3.200000e+01 : f32
    %5 = vector.broadcast %cst_1 : f32 to vector<8x1xf32>
    %6 = arith.divf %4, %5 : vector<8x1xf32>
    %cst_2 = arith.constant 9.99999997E-7 : f32
    %7 = vector.broadcast %cst_2 : f32 to vector<8x1xf32>
    %8 = arith.addf %6, %7 : vector<8x1xf32>
    %9 = math.rsqrt %8 : vector<8x1xf32>
    %10 = vector.broadcast %9 : vector<8x1xf32> to vector<8x32xf32>
    %11 = arith.mulf %1, %10 : vector<8x32xf32>
    %c0_3 = arith.constant 0 : index
    %c0_4 = arith.constant 0 : index
    %12 = vector.load %arg2[%c0_3, %c0_4] : memref<1x32xf32, #tpu.memory_space<vmem>>, vector<1x32xf32>
    %13 = vector.broadcast %12 : vector<1x32xf32> to vector<8x32xf32>
    %14 = arith.mulf %11, %13 : vector<8x32xf32>
    %15 = arith.truncf %14 : vector<8x32xf32> to vector<8x32xbf16>
    %c0_5 = arith.constant 0 : index
    %c0_6 = arith.constant 0 : index
    %16 = vector.load %arg3[%c0_5, %c0_6] : memref<8x32xbf16, #tpu.memory_space<vmem>>, vector<8x32xbf16>
    tpu.vector_store %arg3[%c0_5, %c0_6], %15 {strides = array<i32>} : memref<8x32xbf16, #tpu.memory_space<vmem>>, vector<8x32xbf16>,
    return
  }
  func.func @transform_0(%arg0: i32) -> (i32, i32) {
    %c0_i32 = arith.constant 0 : i32
    %c0_i32_0 = arith.constant 0 : i32
    return %arg0, %c0_i32 : i32, i32
  }
  func.func @transform_1(%arg0: i32) -> (i32, i32) {
    %c0_i32 = arith.constant 0 : i32
    %c0_i32_0 = arith.constant 0 : i32
    %c0_i32_1 = arith.constant 0 : i32
    return %c0_i32, %c0_i32_0 : i32, i32
  }
  func.func @transform_2(%arg0: i32) -> (i32, i32) {
    %c0_i32 = arith.constant 0 : i32
    %c0_i32_0 = arith.constant 0 : i32
    return %arg0, %c0_i32 : i32, i32
  }
}

module attributes {stable_mosaic.version = 11 : i64} {
  func.func @kernel(%arg0: i32, %arg1: i32, %arg2: i32, %arg3: memref<1x1x4xi32, #tpu.memory_space<vmem>>, %arg4: memref<4x16xf32, #tpu.memory_space<vmem>>, %arg5: memref<4x16xf32, #tpu.memory_space<vmem>>, %arg6: memref<4x16xf32, #tpu.memory_space<vmem>>, %arg7: memref<4x16xf32, #tpu.memory_space<vmem>>, %arg8: memref<1x1x4x32xbf16, #tpu.memory_space<vmem>>, %arg9: memref<1x1x4x32xbf16, #tpu.memory_space<vmem>>, %arg10: memref<1x1x4x32xbf16, #tpu.memory_space<vmem>>, %arg11: memref<1x4x32xbf16, #tpu.memory_space<vmem>>, %arg12: memref<4x32xf32, #tpu.memory_space<vmem>>, %arg13: memref<4x32xf32, #tpu.memory_space<vmem>>, %arg14: memref<4x32xf32, #tpu.memory_space<vmem>>) attributes {dimension_semantics = [#tpu.dimension_semantics<parallel>, #tpu.dimension_semantics<parallel>, #tpu.dimension_semantics<arbitrary>], iteration_bounds = array<i64: 2, 1, 1>, scalar_prefetch = 0 : i64, scratch_operands = 3 : i64, tpu.core_type = #tpu.core_type<tc>, window_params = [{transform_indices = @transform_0, window_bounds = array<i64: 1, 1, 4>}, {transform_indices = @transform_1, window_bounds = array<i64: 4, 16>}, {transform_indices = @transform_2, window_bounds = array<i64: 4, 16>}, {transform_indices = @transform_3, window_bounds = array<i64: 4, 16>}, {transform_indices = @transform_4, window_bounds = array<i64: 4, 16>}, {transform_indices = @transform_5, window_bounds = array<i64: 1, 1, 4, 32>}, {transform_indices = @transform_6, window_bounds = array<i64: 1, 1, 4, 32>}, {transform_indices = @transform_7, window_bounds = array<i64: 1, 1, 4, 32>}, {transform_indices = @transform_8, window_bounds = array<i64: 1, 4, 32>}]} {
    %c0_i32 = arith.constant 0 : i32
    %0 = arith.cmpi eq, %arg2, %c0_i32 : i32
    %1 = arith.extui %0 : i1 to i32
    %c0_i32_0 = arith.constant 0 : i32
    %2 = arith.cmpi ne, %1, %c0_i32_0 : i32
    scf.if %2 {
      %cst_94 = arith.constant 0xFF800000 : f32
      %250 = vector.broadcast %cst_94 : f32 to vector<4x32xf32>
      %c0_95 = arith.constant 0 : index
      %c0_96 = arith.constant 0 : index
      %251 = vector.load %arg12[%c0_95, %c0_96] : memref<4x32xf32, #tpu.memory_space<vmem>>, vector<4x32xf32>
      tpu.vector_store %arg12[%c0_95, %c0_96], %250 {strides = array<i32>} : memref<4x32xf32, #tpu.memory_space<vmem>>, vector<4x32xf32>,
      %cst_97 = arith.constant 0.000000e+00 : f32
      %252 = vector.broadcast %cst_97 : f32 to vector<4x32xf32>
      %c0_98 = arith.constant 0 : index
      %c0_99 = arith.constant 0 : index
      %253 = vector.load %arg13[%c0_98, %c0_99] : memref<4x32xf32, #tpu.memory_space<vmem>>, vector<4x32xf32>
      tpu.vector_store %arg13[%c0_98, %c0_99], %252 {strides = array<i32>} : memref<4x32xf32, #tpu.memory_space<vmem>>, vector<4x32xf32>,
      %cst_100 = arith.constant 0.000000e+00 : f32
      %254 = vector.broadcast %cst_100 : f32 to vector<4x32xf32>
      %c0_101 = arith.constant 0 : index
      %c0_102 = arith.constant 0 : index
      %255 = vector.load %arg14[%c0_101, %c0_102] : memref<4x32xf32, #tpu.memory_space<vmem>>, vector<4x32xf32>
      tpu.vector_store %arg14[%c0_101, %c0_102], %254 {strides = array<i32>} : memref<4x32xf32, #tpu.memory_space<vmem>>, vector<4x32xf32>,
    } else {
    }
    %c0 = arith.constant 0 : index
    %c0_1 = arith.constant 0 : index
    %c0_2 = arith.constant 0 : index
    %c0_3 = arith.constant 0 : index
    %3 = vector.load %arg8[%c0, %c0_1, %c0_2, %c0_3] : memref<1x1x4x32xbf16, #tpu.memory_space<vmem>>, vector<1x1x4x32xbf16>
    %4 = vector.shape_cast %3 : vector<1x1x4x32xbf16> to vector<4x32xbf16>
    %5 = arith.extf %4 : vector<4x32xbf16> to vector<4x32xf32>
    %c0_4 = arith.constant 0 : index
    %c0_5 = arith.constant 0 : index
    %c0_6 = arith.constant 0 : index
    %c0_7 = arith.constant 0 : index
    %6 = vector.load %arg9[%c0_4, %c0_5, %c0_6, %c0_7] : memref<1x1x4x32xbf16, #tpu.memory_space<vmem>>, vector<1x1x4x32xbf16>
    %7 = vector.shape_cast %6 : vector<1x1x4x32xbf16> to vector<4x32xbf16>
    %8 = arith.extf %7 : vector<4x32xbf16> to vector<4x32xf32>
    %c0_8 = arith.constant 0 : index
    %c0_9 = arith.constant 0 : index
    %c0_10 = arith.constant 0 : index
    %c0_11 = arith.constant 0 : index
    %9 = vector.load %arg10[%c0_8, %c0_9, %c0_10, %c0_11] : memref<1x1x4x32xbf16, #tpu.memory_space<vmem>>, vector<1x1x4x32xbf16>
    %10 = vector.shape_cast %9 : vector<1x1x4x32xbf16> to vector<4x32xbf16>
    %c0_12 = arith.constant 0 : index
    %c0_13 = arith.constant 0 : index
    %11 = vector.load %arg4[%c0_12, %c0_13] : memref<4x16xf32, #tpu.memory_space<vmem>>, vector<4x16xf32>
    %c0_14 = arith.constant 0 : index
    %c0_15 = arith.constant 0 : index
    %12 = vector.load %arg5[%c0_14, %c0_15] : memref<4x16xf32, #tpu.memory_space<vmem>>, vector<4x16xf32>
    %c0_16 = arith.constant 0 : index
    %c0_17 = arith.constant 0 : index
    %13 = vector.load %arg6[%c0_16, %c0_17] : memref<4x16xf32, #tpu.memory_space<vmem>>, vector<4x16xf32>
    %c0_18 = arith.constant 0 : index
    %c0_19 = arith.constant 0 : index
    %14 = vector.load %arg7[%c0_18, %c0_19] : memref<4x16xf32, #tpu.memory_space<vmem>>, vector<4x16xf32>
    %c0_20 = arith.constant 0 : index
    %c0_21 = arith.constant 0 : index
    %c0_22 = arith.constant 0 : index
    %15 = vector.load %arg3[%c0_20, %c0_21, %c0_22] : memref<1x1x4xi32, #tpu.memory_space<vmem>>, vector<1x1x4xi32>
    %16 = vector.shape_cast %15 : vector<1x1x4xi32> to vector<1x4xi32>
    %c0_i32_23 = arith.constant 0 : i32
    %17 = vector.broadcast %c0_i32_23 : i32 to vector<1x4xi32>
    %18 = arith.cmpi sgt, %16, %17 : vector<1x4xi32>
    %19 = vector.extract_strided_slice %5 {offsets = [0, 0], sizes = [4, 4], strides = [1, 1]} : vector<4x32xf32> to vector<4x4xf32>
    %20 = vector.extract_strided_slice %5 {offsets = [0, 4], sizes = [4, 4], strides = [1, 1]} : vector<4x32xf32> to vector<4x4xf32>
    %21 = vector.extract_strided_slice %8 {offsets = [0, 0], sizes = [4, 4], strides = [1, 1]} : vector<4x32xf32> to vector<4x4xf32>
    %22 = vector.extract_strided_slice %8 {offsets = [0, 4], sizes = [4, 4], strides = [1, 1]} : vector<4x32xf32> to vector<4x4xf32>
    %23 = vector.extract_strided_slice %11 {offsets = [0, 0], sizes = [4, 4], strides = [1, 1]} : vector<4x16xf32> to vector<4x4xf32>
    %24 = vector.extract_strided_slice %12 {offsets = [0, 0], sizes = [4, 4], strides = [1, 1]} : vector<4x16xf32> to vector<4x4xf32>
    %25 = vector.extract_strided_slice %13 {offsets = [0, 0], sizes = [4, 4], strides = [1, 1]} : vector<4x16xf32> to vector<4x4xf32>
    %26 = vector.extract_strided_slice %14 {offsets = [0, 0], sizes = [4, 4], strides = [1, 1]} : vector<4x16xf32> to vector<4x4xf32>
    %27 = arith.mulf %19, %23 : vector<4x4xf32>
    %28 = arith.mulf %20, %24 : vector<4x4xf32>
    %29 = arith.subf %27, %28 : vector<4x4xf32>
    %30 = arith.truncf %29 : vector<4x4xf32> to vector<4x4xbf16>
    %31 = arith.mulf %20, %23 : vector<4x4xf32>
    %32 = arith.mulf %19, %24 : vector<4x4xf32>
    %33 = arith.addf %31, %32 : vector<4x4xf32>
    %34 = arith.truncf %33 : vector<4x4xf32> to vector<4x4xbf16>
    %35 = arith.mulf %21, %25 : vector<4x4xf32>
    %36 = arith.mulf %22, %26 : vector<4x4xf32>
    %37 = arith.subf %35, %36 : vector<4x4xf32>
    %38 = arith.truncf %37 : vector<4x4xf32> to vector<4x4xbf16>
    %39 = arith.mulf %22, %25 : vector<4x4xf32>
    %40 = arith.mulf %21, %26 : vector<4x4xf32>
    %41 = arith.addf %39, %40 : vector<4x4xf32>
    %42 = arith.truncf %41 : vector<4x4xf32> to vector<4x4xbf16>
    %cst = arith.constant dense<0.000000e+00> : vector<4x4xf32>
    %43 = tpu.matmul %30, %38, %cst {dimension_numbers = #tpu.dot_dimension_numbers<[1], [1], [0], [0], [0, 0, 1, 0], [], []>} : vector<4x4xbf16>, vector<4x4xbf16>, vector<4x4xf32> -> vector<4x4xf32>
    %cst_24 = arith.constant dense<0.000000e+00> : vector<4x4xf32>
    %44 = tpu.matmul %34, %42, %cst_24 {dimension_numbers = #tpu.dot_dimension_numbers<[1], [1], [0], [0], [0, 0, 1, 0], [], []>} : vector<4x4xbf16>, vector<4x4xbf16>, vector<4x4xf32> -> vector<4x4xf32>
    %45 = arith.addf %43, %44 : vector<4x4xf32>
    %cst_25 = arith.constant -2.38197633E+38 : f32
    %46 = vector.shape_cast %18 : vector<1x4xi1> to vector<1x4xi1>
    %47 = vector.broadcast %46 : vector<1x4xi1> to vector<4x4xi1>
    %48 = vector.broadcast %cst_25 : f32 to vector<4x4xf32>
    %49 = arith.select %47, %45, %48 : vector<4x4xi1>, vector<4x4xf32>
    %c0_26 = arith.constant 0 : index
    %c0_27 = arith.constant 0 : index
    %50 = vector.load %arg12[%c0_26, %c0_27] : memref<4x32xf32, #tpu.memory_space<vmem>>, vector<4x8xf32>
    %cst_28 = arith.constant dense<0xFF800000> : vector<4xf32>
    %51 = vector.multi_reduction <maximumf>, %49, %cst_28 [1] : vector<4x4xf32> to vector<4xf32>
    %52 = vector.shape_cast %51 : vector<4xf32> to vector<4x1xf32>
    %53 = vector.broadcast %52 : vector<4x1xf32> to vector<4x8xf32>
    %54 = arith.maximumf %50, %53 : vector<4x8xf32>
    %55 = arith.subf %50, %54 : vector<4x8xf32>
    %56 = math.exp %55 : vector<4x8xf32>
    %57 = vector.extract_strided_slice %54 {offsets = [0, 0], sizes = [4, 1], strides = [1, 1]} : vector<4x8xf32> to vector<4x1xf32>
    %58 = vector.broadcast %57 : vector<4x1xf32> to vector<4x4xf32>
    %59 = arith.subf %49, %58 : vector<4x4xf32>
    %60 = math.exp %59 : vector<4x4xf32>
    %c0_29 = arith.constant 0 : index
    %c0_30 = arith.constant 0 : index
    %61 = vector.load %arg13[%c0_29, %c0_30] : memref<4x32xf32, #tpu.memory_space<vmem>>, vector<4x8xf32>
    %62 = arith.mulf %56, %61 : vector<4x8xf32>
    %cst_31 = arith.constant dense<0.000000e+00> : vector<4xf32>
    %63 = vector.multi_reduction <add>, %60, %cst_31 [1] : vector<4x4xf32> to vector<4xf32>
    %64 = vector.shape_cast %63 : vector<4xf32> to vector<4x1xf32>
    %65 = vector.broadcast %64 : vector<4x1xf32> to vector<4x8xf32>
    %66 = arith.addf %62, %65 : vector<4x8xf32>
    %c0_32 = arith.constant 0 : index
    %c0_33 = arith.constant 0 : index
    %67 = vector.load %arg13[%c0_32, %c0_33] : memref<4x32xf32, #tpu.memory_space<vmem>>, vector<4x8xf32>
    tpu.vector_store %arg13[%c0_32, %c0_33], %66 {strides = array<i32>} : memref<4x32xf32, #tpu.memory_space<vmem>>, vector<4x8xf32>,
    %c0_34 = arith.constant 0 : index
    %c0_35 = arith.constant 0 : index
    %68 = vector.load %arg14[%c0_34, %c0_35] : memref<4x32xf32, #tpu.memory_space<vmem>>, vector<4x8xf32>
    %69 = arith.mulf %56, %68 : vector<4x8xf32>
    %70 = arith.truncf %60 : vector<4x4xf32> to vector<4x4xbf16>
    %71 = vector.extract_strided_slice %10 {offsets = [0, 0], sizes = [4, 8], strides = [1, 1]} : vector<4x32xbf16> to vector<4x8xbf16>
    %cst_36 = arith.constant dense<0.000000e+00> : vector<4x8xf32>
    %72 = tpu.matmul %70, %71, %cst_36 {dimension_numbers = #tpu.dot_dimension_numbers<[1], [0], [0], [1], [0, 0, 1, 1], [], []>} : vector<4x4xbf16>, vector<4x8xbf16>, vector<4x8xf32> -> vector<4x8xf32>
    %73 = arith.addf %69, %72 : vector<4x8xf32>
    %c0_37 = arith.constant 0 : index
    %c0_38 = arith.constant 0 : index
    %74 = vector.load %arg14[%c0_37, %c0_38] : memref<4x32xf32, #tpu.memory_space<vmem>>, vector<4x8xf32>
    tpu.vector_store %arg14[%c0_37, %c0_38], %73 {strides = array<i32>} : memref<4x32xf32, #tpu.memory_space<vmem>>, vector<4x8xf32>,
    %c0_39 = arith.constant 0 : index
    %c0_40 = arith.constant 0 : index
    %75 = vector.load %arg12[%c0_39, %c0_40] : memref<4x32xf32, #tpu.memory_space<vmem>>, vector<4x8xf32>
    tpu.vector_store %arg12[%c0_39, %c0_40], %54 {strides = array<i32>} : memref<4x32xf32, #tpu.memory_space<vmem>>, vector<4x8xf32>,
    %76 = vector.extract_strided_slice %5 {offsets = [0, 8], sizes = [4, 4], strides = [1, 1]} : vector<4x32xf32> to vector<4x4xf32>
    %77 = vector.extract_strided_slice %5 {offsets = [0, 12], sizes = [4, 4], strides = [1, 1]} : vector<4x32xf32> to vector<4x4xf32>
    %78 = vector.extract_strided_slice %8 {offsets = [0, 8], sizes = [4, 4], strides = [1, 1]} : vector<4x32xf32> to vector<4x4xf32>
    %79 = vector.extract_strided_slice %8 {offsets = [0, 12], sizes = [4, 4], strides = [1, 1]} : vector<4x32xf32> to vector<4x4xf32>
    %80 = vector.extract_strided_slice %11 {offsets = [0, 4], sizes = [4, 4], strides = [1, 1]} : vector<4x16xf32> to vector<4x4xf32>
    %81 = vector.extract_strided_slice %12 {offsets = [0, 4], sizes = [4, 4], strides = [1, 1]} : vector<4x16xf32> to vector<4x4xf32>
    %82 = vector.extract_strided_slice %13 {offsets = [0, 4], sizes = [4, 4], strides = [1, 1]} : vector<4x16xf32> to vector<4x4xf32>
    %83 = vector.extract_strided_slice %14 {offsets = [0, 4], sizes = [4, 4], strides = [1, 1]} : vector<4x16xf32> to vector<4x4xf32>
    %84 = arith.mulf %76, %80 : vector<4x4xf32>
    %85 = arith.mulf %77, %81 : vector<4x4xf32>
    %86 = arith.subf %84, %85 : vector<4x4xf32>
    %87 = arith.truncf %86 : vector<4x4xf32> to vector<4x4xbf16>
    %88 = arith.mulf %77, %80 : vector<4x4xf32>
    %89 = arith.mulf %76, %81 : vector<4x4xf32>
    %90 = arith.addf %88, %89 : vector<4x4xf32>
    %91 = arith.truncf %90 : vector<4x4xf32> to vector<4x4xbf16>
    %92 = arith.mulf %78, %82 : vector<4x4xf32>
    %93 = arith.mulf %79, %83 : vector<4x4xf32>
    %94 = arith.subf %92, %93 : vector<4x4xf32>
    %95 = arith.truncf %94 : vector<4x4xf32> to vector<4x4xbf16>
    %96 = arith.mulf %79, %82 : vector<4x4xf32>
    %97 = arith.mulf %78, %83 : vector<4x4xf32>
    %98 = arith.addf %96, %97 : vector<4x4xf32>
    %99 = arith.truncf %98 : vector<4x4xf32> to vector<4x4xbf16>
    %cst_41 = arith.constant dense<0.000000e+00> : vector<4x4xf32>
    %100 = tpu.matmul %87, %95, %cst_41 {dimension_numbers = #tpu.dot_dimension_numbers<[1], [1], [0], [0], [0, 0, 1, 0], [], []>} : vector<4x4xbf16>, vector<4x4xbf16>, vector<4x4xf32> -> vector<4x4xf32>
    %cst_42 = arith.constant dense<0.000000e+00> : vector<4x4xf32>
    %101 = tpu.matmul %91, %99, %cst_42 {dimension_numbers = #tpu.dot_dimension_numbers<[1], [1], [0], [0], [0, 0, 1, 0], [], []>} : vector<4x4xbf16>, vector<4x4xbf16>, vector<4x4xf32> -> vector<4x4xf32>
    %102 = arith.addf %100, %101 : vector<4x4xf32>
    %cst_43 = arith.constant -2.38197633E+38 : f32
    %103 = vector.shape_cast %18 : vector<1x4xi1> to vector<1x4xi1>
    %104 = vector.broadcast %103 : vector<1x4xi1> to vector<4x4xi1>
    %105 = vector.broadcast %cst_43 : f32 to vector<4x4xf32>
    %106 = arith.select %104, %102, %105 : vector<4x4xi1>, vector<4x4xf32>
    %c0_44 = arith.constant 0 : index
    %c8 = arith.constant 8 : index
    %107 = vector.load %arg12[%c0_44, %c8] : memref<4x32xf32, #tpu.memory_space<vmem>>, vector<4x8xf32>
    %cst_45 = arith.constant dense<0xFF800000> : vector<4xf32>
    %108 = vector.multi_reduction <maximumf>, %106, %cst_45 [1] : vector<4x4xf32> to vector<4xf32>
    %109 = vector.shape_cast %108 : vector<4xf32> to vector<4x1xf32>
    %110 = vector.broadcast %109 : vector<4x1xf32> to vector<4x8xf32>
    %111 = arith.maximumf %107, %110 : vector<4x8xf32>
    %112 = arith.subf %107, %111 : vector<4x8xf32>
    %113 = math.exp %112 : vector<4x8xf32>
    %114 = vector.extract_strided_slice %111 {offsets = [0, 0], sizes = [4, 1], strides = [1, 1]} : vector<4x8xf32> to vector<4x1xf32>
    %115 = vector.broadcast %114 : vector<4x1xf32> to vector<4x4xf32>
    %116 = arith.subf %106, %115 : vector<4x4xf32>
    %117 = math.exp %116 : vector<4x4xf32>
    %c0_46 = arith.constant 0 : index
    %c8_47 = arith.constant 8 : index
    %118 = vector.load %arg13[%c0_46, %c8_47] : memref<4x32xf32, #tpu.memory_space<vmem>>, vector<4x8xf32>
    %119 = arith.mulf %113, %118 : vector<4x8xf32>
    %cst_48 = arith.constant dense<0.000000e+00> : vector<4xf32>
    %120 = vector.multi_reduction <add>, %117, %cst_48 [1] : vector<4x4xf32> to vector<4xf32>
    %121 = vector.shape_cast %120 : vector<4xf32> to vector<4x1xf32>
    %122 = vector.broadcast %121 : vector<4x1xf32> to vector<4x8xf32>
    %123 = arith.addf %119, %122 : vector<4x8xf32>
    %c0_49 = arith.constant 0 : index
    %c8_50 = arith.constant 8 : index
    %124 = vector.load %arg13[%c0_49, %c8_50] : memref<4x32xf32, #tpu.memory_space<vmem>>, vector<4x8xf32>
    tpu.vector_store %arg13[%c0_49, %c8_50], %123 {strides = array<i32>} : memref<4x32xf32, #tpu.memory_space<vmem>>, vector<4x8xf32>,
    %c0_51 = arith.constant 0 : index
    %c8_52 = arith.constant 8 : index
    %125 = vector.load %arg14[%c0_51, %c8_52] : memref<4x32xf32, #tpu.memory_space<vmem>>, vector<4x8xf32>
    %126 = arith.mulf %113, %125 : vector<4x8xf32>
    %127 = arith.truncf %117 : vector<4x4xf32> to vector<4x4xbf16>
    %128 = vector.extract_strided_slice %10 {offsets = [0, 8], sizes = [4, 8], strides = [1, 1]} : vector<4x32xbf16> to vector<4x8xbf16>
    %cst_53 = arith.constant dense<0.000000e+00> : vector<4x8xf32>
    %129 = tpu.matmul %127, %128, %cst_53 {dimension_numbers = #tpu.dot_dimension_numbers<[1], [0], [0], [1], [0, 0, 1, 1], [], []>} : vector<4x4xbf16>, vector<4x8xbf16>, vector<4x8xf32> -> vector<4x8xf32>
    %130 = arith.addf %126, %129 : vector<4x8xf32>
    %c0_54 = arith.constant 0 : index
    %c8_55 = arith.constant 8 : index
    %131 = vector.load %arg14[%c0_54, %c8_55] : memref<4x32xf32, #tpu.memory_space<vmem>>, vector<4x8xf32>
    tpu.vector_store %arg14[%c0_54, %c8_55], %130 {strides = array<i32>} : memref<4x32xf32, #tpu.memory_space<vmem>>, vector<4x8xf32>,
    %c0_56 = arith.constant 0 : index
    %c8_57 = arith.constant 8 : index
    %132 = vector.load %arg12[%c0_56, %c8_57] : memref<4x32xf32, #tpu.memory_space<vmem>>, vector<4x8xf32>
    tpu.vector_store %arg12[%c0_56, %c8_57], %111 {strides = array<i32>} : memref<4x32xf32, #tpu.memory_space<vmem>>, vector<4x8xf32>,
    %133 = vector.extract_strided_slice %5 {offsets = [0, 16], sizes = [4, 4], strides = [1, 1]} : vector<4x32xf32> to vector<4x4xf32>
    %134 = vector.extract_strided_slice %5 {offsets = [0, 20], sizes = [4, 4], strides = [1, 1]} : vector<4x32xf32> to vector<4x4xf32>
    %135 = vector.extract_strided_slice %8 {offsets = [0, 16], sizes = [4, 4], strides = [1, 1]} : vector<4x32xf32> to vector<4x4xf32>
    %136 = vector.extract_strided_slice %8 {offsets = [0, 20], sizes = [4, 4], strides = [1, 1]} : vector<4x32xf32> to vector<4x4xf32>
    %137 = vector.extract_strided_slice %11 {offsets = [0, 8], sizes = [4, 4], strides = [1, 1]} : vector<4x16xf32> to vector<4x4xf32>
    %138 = vector.extract_strided_slice %12 {offsets = [0, 8], sizes = [4, 4], strides = [1, 1]} : vector<4x16xf32> to vector<4x4xf32>
    %139 = vector.extract_strided_slice %13 {offsets = [0, 8], sizes = [4, 4], strides = [1, 1]} : vector<4x16xf32> to vector<4x4xf32>
    %140 = vector.extract_strided_slice %14 {offsets = [0, 8], sizes = [4, 4], strides = [1, 1]} : vector<4x16xf32> to vector<4x4xf32>
    %141 = arith.mulf %133, %137 : vector<4x4xf32>
    %142 = arith.mulf %134, %138 : vector<4x4xf32>
    %143 = arith.subf %141, %142 : vector<4x4xf32>
    %144 = arith.truncf %143 : vector<4x4xf32> to vector<4x4xbf16>
    %145 = arith.mulf %134, %137 : vector<4x4xf32>
    %146 = arith.mulf %133, %138 : vector<4x4xf32>
    %147 = arith.addf %145, %146 : vector<4x4xf32>
    %148 = arith.truncf %147 : vector<4x4xf32> to vector<4x4xbf16>
    %149 = arith.mulf %135, %139 : vector<4x4xf32>
    %150 = arith.mulf %136, %140 : vector<4x4xf32>
    %151 = arith.subf %149, %150 : vector<4x4xf32>
    %152 = arith.truncf %151 : vector<4x4xf32> to vector<4x4xbf16>
    %153 = arith.mulf %136, %139 : vector<4x4xf32>
    %154 = arith.mulf %135, %140 : vector<4x4xf32>
    %155 = arith.addf %153, %154 : vector<4x4xf32>
    %156 = arith.truncf %155 : vector<4x4xf32> to vector<4x4xbf16>
    %cst_58 = arith.constant dense<0.000000e+00> : vector<4x4xf32>
    %157 = tpu.matmul %144, %152, %cst_58 {dimension_numbers = #tpu.dot_dimension_numbers<[1], [1], [0], [0], [0, 0, 1, 0], [], []>} : vector<4x4xbf16>, vector<4x4xbf16>, vector<4x4xf32> -> vector<4x4xf32>
    %cst_59 = arith.constant dense<0.000000e+00> : vector<4x4xf32>
    %158 = tpu.matmul %148, %156, %cst_59 {dimension_numbers = #tpu.dot_dimension_numbers<[1], [1], [0], [0], [0, 0, 1, 0], [], []>} : vector<4x4xbf16>, vector<4x4xbf16>, vector<4x4xf32> -> vector<4x4xf32>
    %159 = arith.addf %157, %158 : vector<4x4xf32>
    %cst_60 = arith.constant -2.38197633E+38 : f32
    %160 = vector.shape_cast %18 : vector<1x4xi1> to vector<1x4xi1>
    %161 = vector.broadcast %160 : vector<1x4xi1> to vector<4x4xi1>
    %162 = vector.broadcast %cst_60 : f32 to vector<4x4xf32>
    %163 = arith.select %161, %159, %162 : vector<4x4xi1>, vector<4x4xf32>
    %c0_61 = arith.constant 0 : index
    %c16 = arith.constant 16 : index
    %164 = vector.load %arg12[%c0_61, %c16] : memref<4x32xf32, #tpu.memory_space<vmem>>, vector<4x8xf32>
    %cst_62 = arith.constant dense<0xFF800000> : vector<4xf32>
    %165 = vector.multi_reduction <maximumf>, %163, %cst_62 [1] : vector<4x4xf32> to vector<4xf32>
    %166 = vector.shape_cast %165 : vector<4xf32> to vector<4x1xf32>
    %167 = vector.broadcast %166 : vector<4x1xf32> to vector<4x8xf32>
    %168 = arith.maximumf %164, %167 : vector<4x8xf32>
    %169 = arith.subf %164, %168 : vector<4x8xf32>
    %170 = math.exp %169 : vector<4x8xf32>
    %171 = vector.extract_strided_slice %168 {offsets = [0, 0], sizes = [4, 1], strides = [1, 1]} : vector<4x8xf32> to vector<4x1xf32>
    %172 = vector.broadcast %171 : vector<4x1xf32> to vector<4x4xf32>
    %173 = arith.subf %163, %172 : vector<4x4xf32>
    %174 = math.exp %173 : vector<4x4xf32>
    %c0_63 = arith.constant 0 : index
    %c16_64 = arith.constant 16 : index
    %175 = vector.load %arg13[%c0_63, %c16_64] : memref<4x32xf32, #tpu.memory_space<vmem>>, vector<4x8xf32>
    %176 = arith.mulf %170, %175 : vector<4x8xf32>
    %cst_65 = arith.constant dense<0.000000e+00> : vector<4xf32>
    %177 = vector.multi_reduction <add>, %174, %cst_65 [1] : vector<4x4xf32> to vector<4xf32>
    %178 = vector.shape_cast %177 : vector<4xf32> to vector<4x1xf32>
    %179 = vector.broadcast %178 : vector<4x1xf32> to vector<4x8xf32>
    %180 = arith.addf %176, %179 : vector<4x8xf32>
    %c0_66 = arith.constant 0 : index
    %c16_67 = arith.constant 16 : index
    %181 = vector.load %arg13[%c0_66, %c16_67] : memref<4x32xf32, #tpu.memory_space<vmem>>, vector<4x8xf32>
    tpu.vector_store %arg13[%c0_66, %c16_67], %180 {strides = array<i32>} : memref<4x32xf32, #tpu.memory_space<vmem>>, vector<4x8xf32>,
    %c0_68 = arith.constant 0 : index
    %c16_69 = arith.constant 16 : index
    %182 = vector.load %arg14[%c0_68, %c16_69] : memref<4x32xf32, #tpu.memory_space<vmem>>, vector<4x8xf32>
    %183 = arith.mulf %170, %182 : vector<4x8xf32>
    %184 = arith.truncf %174 : vector<4x4xf32> to vector<4x4xbf16>
    %185 = vector.extract_strided_slice %10 {offsets = [0, 16], sizes = [4, 8], strides = [1, 1]} : vector<4x32xbf16> to vector<4x8xbf16>
    %cst_70 = arith.constant dense<0.000000e+00> : vector<4x8xf32>
    %186 = tpu.matmul %184, %185, %cst_70 {dimension_numbers = #tpu.dot_dimension_numbers<[1], [0], [0], [1], [0, 0, 1, 1], [], []>} : vector<4x4xbf16>, vector<4x8xbf16>, vector<4x8xf32> -> vector<4x8xf32>
    %187 = arith.addf %183, %186 : vector<4x8xf32>
    %c0_71 = arith.constant 0 : index
    %c16_72 = arith.constant 16 : index
    %188 = vector.load %arg14[%c0_71, %c16_72] : memref<4x32xf32, #tpu.memory_space<vmem>>, vector<4x8xf32>
    tpu.vector_store %arg14[%c0_71, %c16_72], %187 {strides = array<i32>} : memref<4x32xf32, #tpu.memory_space<vmem>>, vector<4x8xf32>,
    %c0_73 = arith.constant 0 : index
    %c16_74 = arith.constant 16 : index
    %189 = vector.load %arg12[%c0_73, %c16_74] : memref<4x32xf32, #tpu.memory_space<vmem>>, vector<4x8xf32>
    tpu.vector_store %arg12[%c0_73, %c16_74], %168 {strides = array<i32>} : memref<4x32xf32, #tpu.memory_space<vmem>>, vector<4x8xf32>,
    %190 = vector.extract_strided_slice %5 {offsets = [0, 24], sizes = [4, 4], strides = [1, 1]} : vector<4x32xf32> to vector<4x4xf32>
    %191 = vector.extract_strided_slice %5 {offsets = [0, 28], sizes = [4, 4], strides = [1, 1]} : vector<4x32xf32> to vector<4x4xf32>
    %192 = vector.extract_strided_slice %8 {offsets = [0, 24], sizes = [4, 4], strides = [1, 1]} : vector<4x32xf32> to vector<4x4xf32>
    %193 = vector.extract_strided_slice %8 {offsets = [0, 28], sizes = [4, 4], strides = [1, 1]} : vector<4x32xf32> to vector<4x4xf32>
    %194 = vector.extract_strided_slice %11 {offsets = [0, 12], sizes = [4, 4], strides = [1, 1]} : vector<4x16xf32> to vector<4x4xf32>
    %195 = vector.extract_strided_slice %12 {offsets = [0, 12], sizes = [4, 4], strides = [1, 1]} : vector<4x16xf32> to vector<4x4xf32>
    %196 = vector.extract_strided_slice %13 {offsets = [0, 12], sizes = [4, 4], strides = [1, 1]} : vector<4x16xf32> to vector<4x4xf32>
    %197 = vector.extract_strided_slice %14 {offsets = [0, 12], sizes = [4, 4], strides = [1, 1]} : vector<4x16xf32> to vector<4x4xf32>
    %198 = arith.mulf %190, %194 : vector<4x4xf32>
    %199 = arith.mulf %191, %195 : vector<4x4xf32>
    %200 = arith.subf %198, %199 : vector<4x4xf32>
    %201 = arith.truncf %200 : vector<4x4xf32> to vector<4x4xbf16>
    %202 = arith.mulf %191, %194 : vector<4x4xf32>
    %203 = arith.mulf %190, %195 : vector<4x4xf32>
    %204 = arith.addf %202, %203 : vector<4x4xf32>
    %205 = arith.truncf %204 : vector<4x4xf32> to vector<4x4xbf16>
    %206 = arith.mulf %192, %196 : vector<4x4xf32>
    %207 = arith.mulf %193, %197 : vector<4x4xf32>
    %208 = arith.subf %206, %207 : vector<4x4xf32>
    %209 = arith.truncf %208 : vector<4x4xf32> to vector<4x4xbf16>
    %210 = arith.mulf %193, %196 : vector<4x4xf32>
    %211 = arith.mulf %192, %197 : vector<4x4xf32>
    %212 = arith.addf %210, %211 : vector<4x4xf32>
    %213 = arith.truncf %212 : vector<4x4xf32> to vector<4x4xbf16>
    %cst_75 = arith.constant dense<0.000000e+00> : vector<4x4xf32>
    %214 = tpu.matmul %201, %209, %cst_75 {dimension_numbers = #tpu.dot_dimension_numbers<[1], [1], [0], [0], [0, 0, 1, 0], [], []>} : vector<4x4xbf16>, vector<4x4xbf16>, vector<4x4xf32> -> vector<4x4xf32>
    %cst_76 = arith.constant dense<0.000000e+00> : vector<4x4xf32>
    %215 = tpu.matmul %205, %213, %cst_76 {dimension_numbers = #tpu.dot_dimension_numbers<[1], [1], [0], [0], [0, 0, 1, 0], [], []>} : vector<4x4xbf16>, vector<4x4xbf16>, vector<4x4xf32> -> vector<4x4xf32>
    %216 = arith.addf %214, %215 : vector<4x4xf32>
    %cst_77 = arith.constant -2.38197633E+38 : f32
    %217 = vector.shape_cast %18 : vector<1x4xi1> to vector<1x4xi1>
    %218 = vector.broadcast %217 : vector<1x4xi1> to vector<4x4xi1>
    %219 = vector.broadcast %cst_77 : f32 to vector<4x4xf32>
    %220 = arith.select %218, %216, %219 : vector<4x4xi1>, vector<4x4xf32>
    %c0_78 = arith.constant 0 : index
    %c24 = arith.constant 24 : index
    %221 = vector.load %arg12[%c0_78, %c24] : memref<4x32xf32, #tpu.memory_space<vmem>>, vector<4x8xf32>
    %cst_79 = arith.constant dense<0xFF800000> : vector<4xf32>
    %222 = vector.multi_reduction <maximumf>, %220, %cst_79 [1] : vector<4x4xf32> to vector<4xf32>
    %223 = vector.shape_cast %222 : vector<4xf32> to vector<4x1xf32>
    %224 = vector.broadcast %223 : vector<4x1xf32> to vector<4x8xf32>
    %225 = arith.maximumf %221, %224 : vector<4x8xf32>
    %226 = arith.subf %221, %225 : vector<4x8xf32>
    %227 = math.exp %226 : vector<4x8xf32>
    %228 = vector.extract_strided_slice %225 {offsets = [0, 0], sizes = [4, 1], strides = [1, 1]} : vector<4x8xf32> to vector<4x1xf32>
    %229 = vector.broadcast %228 : vector<4x1xf32> to vector<4x4xf32>
    %230 = arith.subf %220, %229 : vector<4x4xf32>
    %231 = math.exp %230 : vector<4x4xf32>
    %c0_80 = arith.constant 0 : index
    %c24_81 = arith.constant 24 : index
    %232 = vector.load %arg13[%c0_80, %c24_81] : memref<4x32xf32, #tpu.memory_space<vmem>>, vector<4x8xf32>
    %233 = arith.mulf %227, %232 : vector<4x8xf32>
    %cst_82 = arith.constant dense<0.000000e+00> : vector<4xf32>
    %234 = vector.multi_reduction <add>, %231, %cst_82 [1] : vector<4x4xf32> to vector<4xf32>
    %235 = vector.shape_cast %234 : vector<4xf32> to vector<4x1xf32>
    %236 = vector.broadcast %235 : vector<4x1xf32> to vector<4x8xf32>
    %237 = arith.addf %233, %236 : vector<4x8xf32>
    %c0_83 = arith.constant 0 : index
    %c24_84 = arith.constant 24 : index
    %238 = vector.load %arg13[%c0_83, %c24_84] : memref<4x32xf32, #tpu.memory_space<vmem>>, vector<4x8xf32>
    tpu.vector_store %arg13[%c0_83, %c24_84], %237 {strides = array<i32>} : memref<4x32xf32, #tpu.memory_space<vmem>>, vector<4x8xf32>,
    %c0_85 = arith.constant 0 : index
    %c24_86 = arith.constant 24 : index
    %239 = vector.load %arg14[%c0_85, %c24_86] : memref<4x32xf32, #tpu.memory_space<vmem>>, vector<4x8xf32>
    %240 = arith.mulf %227, %239 : vector<4x8xf32>
    %241 = arith.truncf %231 : vector<4x4xf32> to vector<4x4xbf16>
    %242 = vector.extract_strided_slice %10 {offsets = [0, 24], sizes = [4, 8], strides = [1, 1]} : vector<4x32xbf16> to vector<4x8xbf16>
    %cst_87 = arith.constant dense<0.000000e+00> : vector<4x8xf32>
    %243 = tpu.matmul %241, %242, %cst_87 {dimension_numbers = #tpu.dot_dimension_numbers<[1], [0], [0], [1], [0, 0, 1, 1], [], []>} : vector<4x4xbf16>, vector<4x8xbf16>, vector<4x8xf32> -> vector<4x8xf32>
    %244 = arith.addf %240, %243 : vector<4x8xf32>
    %c0_88 = arith.constant 0 : index
    %c24_89 = arith.constant 24 : index
    %245 = vector.load %arg14[%c0_88, %c24_89] : memref<4x32xf32, #tpu.memory_space<vmem>>, vector<4x8xf32>
    tpu.vector_store %arg14[%c0_88, %c24_89], %244 {strides = array<i32>} : memref<4x32xf32, #tpu.memory_space<vmem>>, vector<4x8xf32>,
    %c0_90 = arith.constant 0 : index
    %c24_91 = arith.constant 24 : index
    %246 = vector.load %arg12[%c0_90, %c24_91] : memref<4x32xf32, #tpu.memory_space<vmem>>, vector<4x8xf32>
    tpu.vector_store %arg12[%c0_90, %c24_91], %225 {strides = array<i32>} : memref<4x32xf32, #tpu.memory_space<vmem>>, vector<4x8xf32>,
    %c0_i32_92 = arith.constant 0 : i32
    %247 = arith.cmpi eq, %arg2, %c0_i32_92 : i32
    %248 = arith.extui %247 : i1 to i32
    %c0_i32_93 = arith.constant 0 : i32
    %249 = arith.cmpi ne, %248, %c0_i32_93 : i32
    scf.if %249 {
      %c0_94 = arith.constant 0 : index
      %c0_95 = arith.constant 0 : index
      %250 = vector.load %arg14[%c0_94, %c0_95] : memref<4x32xf32, #tpu.memory_space<vmem>>, vector<4x32xf32>
      %c0_96 = arith.constant 0 : index
      %c0_97 = arith.constant 0 : index
      %251 = vector.load %arg13[%c0_96, %c0_97] : memref<4x32xf32, #tpu.memory_space<vmem>>, vector<4x32xf32>
      %252 = tpu.reciprocal %251 {approx = true} : vector<4x32xf32> -> vector<4x32xf32>
      %253 = arith.mulf %250, %252 : vector<4x32xf32>
      %254 = arith.truncf %253 : vector<4x32xf32> to vector<4x32xbf16>
      %c0_98 = arith.constant 0 : index
      %c0_99 = arith.constant 0 : index
      %c0_100 = arith.constant 0 : index
      %255 = vector.load %arg11[%c0_98, %c0_99, %c0_100] : memref<1x4x32xbf16, #tpu.memory_space<vmem>>, vector<1x4x32xbf16>
      %256 = vector.shape_cast %255 : vector<1x4x32xbf16> to vector<4x32xbf16>
      %257 = vector.shape_cast %254 : vector<4x32xbf16> to vector<1x4x32xbf16>
      tpu.vector_store %arg11[%c0_98, %c0_99, %c0_100], %257 {strides = array<i32>} : memref<1x4x32xbf16, #tpu.memory_space<vmem>>, vector<1x4x32xbf16>,
    } else {
    }
    return
  }
  func.func @transform_0(%arg0: i32, %arg1: i32, %arg2: i32) -> (i32, i32, i32) {
    %c0_i32 = arith.constant 0 : i32
    %c0_i32_0 = arith.constant 0 : i32
    return %arg0, %c0_i32, %arg2 : i32, i32, i32
  }
  func.func @transform_1(%arg0: i32, %arg1: i32, %arg2: i32) -> (i32, i32) {
    %c0_i32 = arith.constant 0 : i32
    %c0_i32_0 = arith.constant 0 : i32
    return %arg1, %c0_i32 : i32, i32
  }
  func.func @transform_2(%arg0: i32, %arg1: i32, %arg2: i32) -> (i32, i32) {
    %c0_i32 = arith.constant 0 : i32
    %c0_i32_0 = arith.constant 0 : i32
    return %arg1, %c0_i32 : i32, i32
  }
  func.func @transform_3(%arg0: i32, %arg1: i32, %arg2: i32) -> (i32, i32) {
    %c0_i32 = arith.constant 0 : i32
    %c0_i32_0 = arith.constant 0 : i32
    return %arg2, %c0_i32 : i32, i32
  }
  func.func @transform_4(%arg0: i32, %arg1: i32, %arg2: i32) -> (i32, i32) {
    %c0_i32 = arith.constant 0 : i32
    %c0_i32_0 = arith.constant 0 : i32
    return %arg2, %c0_i32 : i32, i32
  }
  func.func @transform_5(%arg0: i32, %arg1: i32, %arg2: i32) -> (i32, i32, i32, i32) {
    %c0_i32 = arith.constant 0 : i32
    %c0_i32_0 = arith.constant 0 : i32
    %c0_i32_1 = arith.constant 0 : i32
    return %c0_i32, %arg0, %arg1, %c0_i32_0 : i32, i32, i32, i32
  }
  func.func @transform_6(%arg0: i32, %arg1: i32, %arg2: i32) -> (i32, i32, i32, i32) {
    %c1_i32 = arith.constant 1 : i32
    %c0_i32 = arith.constant 0 : i32
    %c0_i32_0 = arith.constant 0 : i32
    return %c1_i32, %arg0, %arg2, %c0_i32 : i32, i32, i32, i32
  }
  func.func @transform_7(%arg0: i32, %arg1: i32, %arg2: i32) -> (i32, i32, i32, i32) {
    %c2_i32 = arith.constant 2 : i32
    %c0_i32 = arith.constant 0 : i32
    %c0_i32_0 = arith.constant 0 : i32
    return %c2_i32, %arg0, %arg2, %c0_i32 : i32, i32, i32, i32
  }
  func.func @transform_8(%arg0: i32, %arg1: i32, %arg2: i32) -> (i32, i32, i32) {
    %c0_i32 = arith.constant 0 : i32
    %c0_i32_0 = arith.constant 0 : i32
    return %arg0, %arg1, %c0_i32 : i32, i32, i32
  }
}

module attributes {stable_mosaic.version = 11 : i64} {
  func.func @_mm_kernel_nn(%arg0: i32, %arg1: i32, %arg2: i32, %arg3: memref<8x32xbf16, #tpu.memory_space<vmem>>, %arg4: memref<32x32xbf16, #tpu.memory_space<vmem>>, %arg5: memref<8x32xbf16, #tpu.memory_space<vmem>>, %arg6: memref<8x32xf32, #tpu.memory_space<vmem>>) attributes {dimension_semantics = [#tpu.dimension_semantics<parallel>, #tpu.dimension_semantics<parallel>, #tpu.dimension_semantics<arbitrary>], iteration_bounds = array<i64: 1, 1, 1>, scalar_prefetch = 0 : i64, scratch_operands = 1 : i64, tpu.core_type = #tpu.core_type<tc>, window_params = [{transform_indices = @transform_0, window_bounds = array<i64: 8, 32>}, {transform_indices = @transform_1, window_bounds = array<i64: 32, 32>}, {transform_indices = @transform_2, window_bounds = array<i64: 8, 32>}]} {
    %c0_i32 = arith.constant 0 : i32
    %0 = arith.cmpi eq, %arg2, %c0_i32 : i32
    %1 = arith.extui %0 : i1 to i32
    %c0_i32_0 = arith.constant 0 : i32
    %2 = arith.cmpi ne, %1, %c0_i32_0 : i32
    scf.if %2 {
      %cst_10 = arith.constant 0.000000e+00 : f32
      %12 = vector.broadcast %cst_10 : f32 to vector<8x32xf32>
      %c0_11 = arith.constant 0 : index
      %c0_12 = arith.constant 0 : index
      %13 = vector.load %arg6[%c0_11, %c0_12] : memref<8x32xf32, #tpu.memory_space<vmem>>, vector<8x32xf32>
      tpu.vector_store %arg6[%c0_11, %c0_12], %12 {strides = array<i32>} : memref<8x32xf32, #tpu.memory_space<vmem>>, vector<8x32xf32>,
    } else {
    }
    %c0 = arith.constant 0 : index
    %c0_1 = arith.constant 0 : index
    %3 = vector.load %arg6[%c0, %c0_1] : memref<8x32xf32, #tpu.memory_space<vmem>>, vector<8x32xf32>
    %c0_2 = arith.constant 0 : index
    %c0_3 = arith.constant 0 : index
    %4 = vector.load %arg3[%c0_2, %c0_3] : memref<8x32xbf16, #tpu.memory_space<vmem>>, vector<8x32xbf16>
    %c0_4 = arith.constant 0 : index
    %c0_5 = arith.constant 0 : index
    %5 = vector.load %arg4[%c0_4, %c0_5] : memref<32x32xbf16, #tpu.memory_space<vmem>>, vector<32x32xbf16>
    %cst = arith.constant dense<0.000000e+00> : vector<8x32xf32>
    %6 = tpu.matmul %4, %5, %cst {dimension_numbers = #tpu.dot_dimension_numbers<[1], [0], [0], [1], [0, 0, 1, 1], [], []>} : vector<8x32xbf16>, vector<32x32xbf16>, vector<8x32xf32> -> vector<8x32xf32>
    %7 = arith.addf %3, %6 : vector<8x32xf32>
    %c0_6 = arith.constant 0 : index
    %c0_7 = arith.constant 0 : index
    %8 = vector.load %arg6[%c0_6, %c0_7] : memref<8x32xf32, #tpu.memory_space<vmem>>, vector<8x32xf32>
    tpu.vector_store %arg6[%c0_6, %c0_7], %7 {strides = array<i32>} : memref<8x32xf32, #tpu.memory_space<vmem>>, vector<8x32xf32>,
    %c0_i32_8 = arith.constant 0 : i32
    %9 = arith.cmpi eq, %arg2, %c0_i32_8 : i32
    %10 = arith.extui %9 : i1 to i32
    %c0_i32_9 = arith.constant 0 : i32
    %11 = arith.cmpi ne, %10, %c0_i32_9 : i32
    scf.if %11 {
      %c0_10 = arith.constant 0 : index
      %c0_11 = arith.constant 0 : index
      %12 = vector.load %arg6[%c0_10, %c0_11] : memref<8x32xf32, #tpu.memory_space<vmem>>, vector<8x32xf32>
      %13 = arith.truncf %12 : vector<8x32xf32> to vector<8x32xbf16>
      %c0_12 = arith.constant 0 : index
      %c0_13 = arith.constant 0 : index
      %14 = vector.load %arg5[%c0_12, %c0_13] : memref<8x32xbf16, #tpu.memory_space<vmem>>, vector<8x32xbf16>
      tpu.vector_store %arg5[%c0_12, %c0_13], %13 {strides = array<i32>} : memref<8x32xbf16, #tpu.memory_space<vmem>>, vector<8x32xbf16>,
    } else {
    }
    return
  }
  func.func @transform_0(%arg0: i32, %arg1: i32, %arg2: i32) -> (i32, i32) {
    %c0_i32 = arith.constant 0 : i32
    return %arg0, %arg2 : i32, i32
  }
  func.func @transform_1(%arg0: i32, %arg1: i32, %arg2: i32) -> (i32, i32) {
    %c0_i32 = arith.constant 0 : i32
    return %arg2, %arg1 : i32, i32
  }
  func.func @transform_2(%arg0: i32, %arg1: i32, %arg2: i32) -> (i32, i32) {
    %c0_i32 = arith.constant 0 : i32
    return %arg0, %arg1 : i32, i32
  }
}

module attributes {stable_mosaic.version = 11 : i64} {
  func.func @_mm_kernel_nn(%arg0: i32, %arg1: i32, %arg2: i32, %arg3: memref<8x64xbf16, #tpu.memory_space<vmem>>, %arg4: memref<64x32xbf16, #tpu.memory_space<vmem>>, %arg5: memref<8x32xbf16, #tpu.memory_space<vmem>>, %arg6: memref<8x32xf32, #tpu.memory_space<vmem>>) attributes {dimension_semantics = [#tpu.dimension_semantics<parallel>, #tpu.dimension_semantics<parallel>, #tpu.dimension_semantics<arbitrary>], iteration_bounds = array<i64: 1, 1, 1>, scalar_prefetch = 0 : i64, scratch_operands = 1 : i64, tpu.core_type = #tpu.core_type<tc>, window_params = [{transform_indices = @transform_0, window_bounds = array<i64: 8, 64>}, {transform_indices = @transform_1, window_bounds = array<i64: 64, 32>}, {transform_indices = @transform_2, window_bounds = array<i64: 8, 32>}]} {
    %c0_i32 = arith.constant 0 : i32
    %0 = arith.cmpi eq, %arg2, %c0_i32 : i32
    %1 = arith.extui %0 : i1 to i32
    %c0_i32_0 = arith.constant 0 : i32
    %2 = arith.cmpi ne, %1, %c0_i32_0 : i32
    scf.if %2 {
      %cst_10 = arith.constant 0.000000e+00 : f32
      %12 = vector.broadcast %cst_10 : f32 to vector<8x32xf32>
      %c0_11 = arith.constant 0 : index
      %c0_12 = arith.constant 0 : index
      %13 = vector.load %arg6[%c0_11, %c0_12] : memref<8x32xf32, #tpu.memory_space<vmem>>, vector<8x32xf32>
      tpu.vector_store %arg6[%c0_11, %c0_12], %12 {strides = array<i32>} : memref<8x32xf32, #tpu.memory_space<vmem>>, vector<8x32xf32>,
    } else {
    }
    %c0 = arith.constant 0 : index
    %c0_1 = arith.constant 0 : index
    %3 = vector.load %arg6[%c0, %c0_1] : memref<8x32xf32, #tpu.memory_space<vmem>>, vector<8x32xf32>
    %c0_2 = arith.constant 0 : index
    %c0_3 = arith.constant 0 : index
    %4 = vector.load %arg3[%c0_2, %c0_3] : memref<8x64xbf16, #tpu.memory_space<vmem>>, vector<8x64xbf16>
    %c0_4 = arith.constant 0 : index
    %c0_5 = arith.constant 0 : index
    %5 = vector.load %arg4[%c0_4, %c0_5] : memref<64x32xbf16, #tpu.memory_space<vmem>>, vector<64x32xbf16>
    %cst = arith.constant dense<0.000000e+00> : vector<8x32xf32>
    %6 = tpu.matmul %4, %5, %cst {dimension_numbers = #tpu.dot_dimension_numbers<[1], [0], [0], [1], [0, 0, 1, 1], [], []>} : vector<8x64xbf16>, vector<64x32xbf16>, vector<8x32xf32> -> vector<8x32xf32>
    %7 = arith.addf %3, %6 : vector<8x32xf32>
    %c0_6 = arith.constant 0 : index
    %c0_7 = arith.constant 0 : index
    %8 = vector.load %arg6[%c0_6, %c0_7] : memref<8x32xf32, #tpu.memory_space<vmem>>, vector<8x32xf32>
    tpu.vector_store %arg6[%c0_6, %c0_7], %7 {strides = array<i32>} : memref<8x32xf32, #tpu.memory_space<vmem>>, vector<8x32xf32>,
    %c0_i32_8 = arith.constant 0 : i32
    %9 = arith.cmpi eq, %arg2, %c0_i32_8 : i32
    %10 = arith.extui %9 : i1 to i32
    %c0_i32_9 = arith.constant 0 : i32
    %11 = arith.cmpi ne, %10, %c0_i32_9 : i32
    scf.if %11 {
      %c0_10 = arith.constant 0 : index
      %c0_11 = arith.constant 0 : index
      %12 = vector.load %arg6[%c0_10, %c0_11] : memref<8x32xf32, #tpu.memory_space<vmem>>, vector<8x32xf32>
      %13 = arith.truncf %12 : vector<8x32xf32> to vector<8x32xbf16>
      %c0_12 = arith.constant 0 : index
      %c0_13 = arith.constant 0 : index
      %14 = vector.load %arg5[%c0_12, %c0_13] : memref<8x32xbf16, #tpu.memory_space<vmem>>, vector<8x32xbf16>
      tpu.vector_store %arg5[%c0_12, %c0_13], %13 {strides = array<i32>} : memref<8x32xbf16, #tpu.memory_space<vmem>>, vector<8x32xbf16>,
    } else {
    }
    return
  }
  func.func @transform_0(%arg0: i32, %arg1: i32, %arg2: i32) -> (i32, i32) {
    %c0_i32 = arith.constant 0 : i32
    return %arg0, %arg2 : i32, i32
  }
  func.func @transform_1(%arg0: i32, %arg1: i32, %arg2: i32) -> (i32, i32) {
    %c0_i32 = arith.constant 0 : i32
    return %arg2, %arg1 : i32, i32
  }
  func.func @transform_2(%arg0: i32, %arg1: i32, %arg2: i32) -> (i32, i32) {
    %c0_i32 = arith.constant 0 : i32
    return %arg0, %arg1 : i32, i32
  }
}

module attributes {stable_mosaic.version = 11 : i64} {
  func.func @_swiglu_kernel(%arg0: i32, %arg1: i32, %arg2: i32, %arg3: memref<8x32xbf16, #tpu.memory_space<vmem>>, %arg4: memref<32x64xbf16, #tpu.memory_space<vmem>>, %arg5: memref<32x64xbf16, #tpu.memory_space<vmem>>, %arg6: memref<8x64xbf16, #tpu.memory_space<vmem>>, %arg7: memref<8x64xf32, #tpu.memory_space<vmem>>, %arg8: memref<8x64xf32, #tpu.memory_space<vmem>>) attributes {dimension_semantics = [#tpu.dimension_semantics<parallel>, #tpu.dimension_semantics<parallel>, #tpu.dimension_semantics<arbitrary>], iteration_bounds = array<i64: 1, 1, 1>, scalar_prefetch = 0 : i64, scratch_operands = 2 : i64, tpu.core_type = #tpu.core_type<tc>, window_params = [{transform_indices = @transform_0, window_bounds = array<i64: 8, 32>}, {transform_indices = @transform_1, window_bounds = array<i64: 32, 64>}, {transform_indices = @transform_2, window_bounds = array<i64: 32, 64>}, {transform_indices = @transform_3, window_bounds = array<i64: 8, 64>}]} {
    %c0_i32 = arith.constant 0 : i32
    %0 = arith.cmpi eq, %arg2, %c0_i32 : i32
    %1 = arith.extui %0 : i1 to i32
    %c0_i32_0 = arith.constant 0 : i32
    %2 = arith.cmpi ne, %1, %c0_i32_0 : i32
    scf.if %2 {
      %cst_17 = arith.constant 0.000000e+00 : f32
      %17 = vector.broadcast %cst_17 : f32 to vector<8x64xf32>
      %c0_18 = arith.constant 0 : index
      %c0_19 = arith.constant 0 : index
      %18 = vector.load %arg7[%c0_18, %c0_19] : memref<8x64xf32, #tpu.memory_space<vmem>>, vector<8x64xf32>
      tpu.vector_store %arg7[%c0_18, %c0_19], %17 {strides = array<i32>} : memref<8x64xf32, #tpu.memory_space<vmem>>, vector<8x64xf32>,
      %cst_20 = arith.constant 0.000000e+00 : f32
      %19 = vector.broadcast %cst_20 : f32 to vector<8x64xf32>
      %c0_21 = arith.constant 0 : index
      %c0_22 = arith.constant 0 : index
      %20 = vector.load %arg8[%c0_21, %c0_22] : memref<8x64xf32, #tpu.memory_space<vmem>>, vector<8x64xf32>
      tpu.vector_store %arg8[%c0_21, %c0_22], %19 {strides = array<i32>} : memref<8x64xf32, #tpu.memory_space<vmem>>, vector<8x64xf32>,
    } else {
    }
    %c0 = arith.constant 0 : index
    %c0_1 = arith.constant 0 : index
    %3 = vector.load %arg3[%c0, %c0_1] : memref<8x32xbf16, #tpu.memory_space<vmem>>, vector<8x32xbf16>
    %c0_2 = arith.constant 0 : index
    %c0_3 = arith.constant 0 : index
    %4 = vector.load %arg7[%c0_2, %c0_3] : memref<8x64xf32, #tpu.memory_space<vmem>>, vector<8x64xf32>
    %c0_4 = arith.constant 0 : index
    %c0_5 = arith.constant 0 : index
    %5 = vector.load %arg4[%c0_4, %c0_5] : memref<32x64xbf16, #tpu.memory_space<vmem>>, vector<32x64xbf16>
    %cst = arith.constant dense<0.000000e+00> : vector<8x64xf32>
    %6 = tpu.matmul %3, %5, %cst {dimension_numbers = #tpu.dot_dimension_numbers<[1], [0], [0], [1], [0, 0, 1, 1], [], []>} : vector<8x32xbf16>, vector<32x64xbf16>, vector<8x64xf32> -> vector<8x64xf32>
    %7 = arith.addf %4, %6 : vector<8x64xf32>
    %c0_6 = arith.constant 0 : index
    %c0_7 = arith.constant 0 : index
    %8 = vector.load %arg7[%c0_6, %c0_7] : memref<8x64xf32, #tpu.memory_space<vmem>>, vector<8x64xf32>
    tpu.vector_store %arg7[%c0_6, %c0_7], %7 {strides = array<i32>} : memref<8x64xf32, #tpu.memory_space<vmem>>, vector<8x64xf32>,
    %c0_8 = arith.constant 0 : index
    %c0_9 = arith.constant 0 : index
    %9 = vector.load %arg8[%c0_8, %c0_9] : memref<8x64xf32, #tpu.memory_space<vmem>>, vector<8x64xf32>
    %c0_10 = arith.constant 0 : index
    %c0_11 = arith.constant 0 : index
    %10 = vector.load %arg5[%c0_10, %c0_11] : memref<32x64xbf16, #tpu.memory_space<vmem>>, vector<32x64xbf16>
    %cst_12 = arith.constant dense<0.000000e+00> : vector<8x64xf32>
    %11 = tpu.matmul %3, %10, %cst_12 {dimension_numbers = #tpu.dot_dimension_numbers<[1], [0], [0], [1], [0, 0, 1, 1], [], []>} : vector<8x32xbf16>, vector<32x64xbf16>, vector<8x64xf32> -> vector<8x64xf32>
    %12 = arith.addf %9, %11 : vector<8x64xf32>
    %c0_13 = arith.constant 0 : index
    %c0_14 = arith.constant 0 : index
    %13 = vector.load %arg8[%c0_13, %c0_14] : memref<8x64xf32, #tpu.memory_space<vmem>>, vector<8x64xf32>
    tpu.vector_store %arg8[%c0_13, %c0_14], %12 {strides = array<i32>} : memref<8x64xf32, #tpu.memory_space<vmem>>, vector<8x64xf32>,
    %c0_i32_15 = arith.constant 0 : i32
    %14 = arith.cmpi eq, %arg2, %c0_i32_15 : i32
    %15 = arith.extui %14 : i1 to i32
    %c0_i32_16 = arith.constant 0 : i32
    %16 = arith.cmpi ne, %15, %c0_i32_16 : i32
    scf.if %16 {
      %c0_17 = arith.constant 0 : index
      %c0_18 = arith.constant 0 : index
      %17 = vector.load %arg7[%c0_17, %c0_18] : memref<8x64xf32, #tpu.memory_space<vmem>>, vector<8x64xf32>
      %cst_19 = arith.constant 0.000000e+00 : f32
      %18 = vector.broadcast %cst_19 : f32 to vector<8x64xf32>
      %19 = arith.subf %18, %17 : vector<8x64xf32>
      %20 = math.exp %19 : vector<8x64xf32>
      %cst_20 = arith.constant 1.000000e+00 : f32
      %21 = vector.broadcast %cst_20 : f32 to vector<8x64xf32>
      %22 = arith.addf %21, %20 : vector<8x64xf32>
      %cst_21 = arith.constant 1.000000e+00 : f32
      %23 = vector.broadcast %cst_21 : f32 to vector<8x64xf32>
      %24 = arith.divf %23, %22 : vector<8x64xf32>
      %25 = arith.mulf %17, %24 : vector<8x64xf32>
      %c0_22 = arith.constant 0 : index
      %c0_23 = arith.constant 0 : index
      %26 = vector.load %arg8[%c0_22, %c0_23] : memref<8x64xf32, #tpu.memory_space<vmem>>, vector<8x64xf32>
      %27 = arith.mulf %25, %26 : vector<8x64xf32>
      %28 = arith.truncf %27 : vector<8x64xf32> to vector<8x64xbf16>
      %c0_24 = arith.constant 0 : index
      %c0_25 = arith.constant 0 : index
      %29 = vector.load %arg6[%c0_24, %c0_25] : memref<8x64xbf16, #tpu.memory_space<vmem>>, vector<8x64xbf16>
      tpu.vector_store %arg6[%c0_24, %c0_25], %28 {strides = array<i32>} : memref<8x64xbf16, #tpu.memory_space<vmem>>, vector<8x64xbf16>,
    } else {
    }
    return
  }
  func.func @transform_0(%arg0: i32, %arg1: i32, %arg2: i32) -> (i32, i32) {
    %c0_i32 = arith.constant 0 : i32
    return %arg0, %arg2 : i32, i32
  }
  func.func @transform_1(%arg0: i32, %arg1: i32, %arg2: i32) -> (i32, i32) {
    %c0_i32 = arith.constant 0 : i32
    return %arg2, %arg1 : i32, i32
  }
  func.func @transform_2(%arg0: i32, %arg1: i32, %arg2: i32) -> (i32, i32) {
    %c0_i32 = arith.constant 0 : i32
    return %arg2, %arg1 : i32, i32
  }
  func.func @transform_3(%arg0: i32, %arg1: i32, %arg2: i32) -> (i32, i32) {
    %c0_i32 = arith.constant 0 : i32
    return %arg0, %arg1 : i32, i32
  }
}

module attributes {stable_mosaic.version = 11 : i64} {
  func.func @kernel(%arg0: i32, %arg1: memref<8x32xbf16, #tpu.memory_space<vmem>>, %arg2: memref<1x32xf32, #tpu.memory_space<vmem>>, %arg3: memref<8x32xbf16, #tpu.memory_space<vmem>>) attributes {dimension_semantics = [#tpu.dimension_semantics<parallel>], iteration_bounds = array<i64: 1>, scalar_prefetch = 0 : i64, scratch_operands = 0 : i64, tpu.core_type = #tpu.core_type<tc>, window_params = [{transform_indices = @transform_0, window_bounds = array<i64: 8, 32>}, {pipeline_mode = #tpu.pipeline_mode<synchronous>, transform_indices = @transform_1, window_bounds = array<i64: 1, 32>}, {transform_indices = @transform_2, window_bounds = array<i64: 8, 32>}]} {
    %c0 = arith.constant 0 : index
    %c0_0 = arith.constant 0 : index
    %0 = vector.load %arg1[%c0, %c0_0] : memref<8x32xbf16, #tpu.memory_space<vmem>>, vector<8x32xbf16>
    %1 = arith.extf %0 : vector<8x32xbf16> to vector<8x32xf32>
    %2 = arith.mulf %1, %1 : vector<8x32xf32>
    %cst = arith.constant dense<0.000000e+00> : vector<8xf32>
    %3 = vector.multi_reduction <add>, %2, %cst [1] : vector<8x32xf32> to vector<8xf32>
    %4 = vector.shape_cast %3 : vector<8xf32> to vector<8x1xf32>
    %cst_1 = arith.constant 3.200000e+01 : f32
    %5 = vector.broadcast %cst_1 : f32 to vector<8x1xf32>
    %6 = arith.divf %4, %5 : vector<8x1xf32>
    %cst_2 = arith.constant 9.99999997E-7 : f32
    %7 = vector.broadcast %cst_2 : f32 to vector<8x1xf32>
    %8 = arith.addf %6, %7 : vector<8x1xf32>
    %9 = math.rsqrt %8 : vector<8x1xf32>
    %10 = vector.broadcast %9 : vector<8x1xf32> to vector<8x32xf32>
    %11 = arith.mulf %1, %10 : vector<8x32xf32>
    %c0_3 = arith.constant 0 : index
    %c0_4 = arith.constant 0 : index
    %12 = vector.load %arg2[%c0_3, %c0_4] : memref<1x32xf32, #tpu.memory_space<vmem>>, vector<1x32xf32>
    %13 = vector.broadcast %12 : vector<1x32xf32> to vector<8x32xf32>
    %14 = arith.mulf %11, %13 : vector<8x32xf32>
    %15 = arith.truncf %14 : vector<8x32xf32> to vector<8x32xbf16>
    %c0_5 = arith.constant 0 : index
    %c0_6 = arith.constant 0 : index
    %16 = vector.load %arg3[%c0_5, %c0_6] : memref<8x32xbf16, #tpu.memory_space<vmem>>, vector<8x32xbf16>
    tpu.vector_store %arg3[%c0_5, %c0_6], %15 {strides = array<i32>} : memref<8x32xbf16, #tpu.memory_space<vmem>>, vector<8x32xbf16>,
    return
  }
  func.func @transform_0(%arg0: i32) -> (i32, i32) {
    %c0_i32 = arith.constant 0 : i32
    %c0_i32_0 = arith.constant 0 : i32
    return %arg0, %c0_i32 : i32, i32
  }
  func.func @transform_1(%arg0: i32) -> (i32, i32) {
    %c0_i32 = arith.constant 0 : i32
    %c0_i32_0 = arith.constant 0 : i32
    %c0_i32_1 = arith.constant 0 : i32
    return %c0_i32, %c0_i32_0 : i32, i32
  }
  func.func @transform_2(%arg0: i32) -> (i32, i32) {
    %c0_i32 = arith.constant 0 : i32
    %c0_i32_0 = arith.constant 0 : i32
    return %arg0, %c0_i32 : i32, i32
  }
}

module attributes {stable_mosaic.version = 11 : i64} {
  func.func @_mm_kernel_nn(%arg0: i32, %arg1: i32, %arg2: i32, %arg3: memref<8x32xbf16, #tpu.memory_space<vmem>>, %arg4: memref<32x64xbf16, #tpu.memory_space<vmem>>, %arg5: memref<8x64xf32, #tpu.memory_space<vmem>>, %arg6: memref<8x64xf32, #tpu.memory_space<vmem>>) attributes {dimension_semantics = [#tpu.dimension_semantics<parallel>, #tpu.dimension_semantics<parallel>, #tpu.dimension_semantics<arbitrary>], iteration_bounds = array<i64: 1, 1, 1>, scalar_prefetch = 0 : i64, scratch_operands = 1 : i64, tpu.core_type = #tpu.core_type<tc>, window_params = [{transform_indices = @transform_0, window_bounds = array<i64: 8, 32>}, {transform_indices = @transform_1, window_bounds = array<i64: 32, 64>}, {transform_indices = @transform_2, window_bounds = array<i64: 8, 64>}]} {
    %c0_i32 = arith.constant 0 : i32
    %0 = arith.cmpi eq, %arg2, %c0_i32 : i32
    %1 = arith.extui %0 : i1 to i32
    %c0_i32_0 = arith.constant 0 : i32
    %2 = arith.cmpi ne, %1, %c0_i32_0 : i32
    scf.if %2 {
      %cst_10 = arith.constant 0.000000e+00 : f32
      %12 = vector.broadcast %cst_10 : f32 to vector<8x64xf32>
      %c0_11 = arith.constant 0 : index
      %c0_12 = arith.constant 0 : index
      %13 = vector.load %arg6[%c0_11, %c0_12] : memref<8x64xf32, #tpu.memory_space<vmem>>, vector<8x64xf32>
      tpu.vector_store %arg6[%c0_11, %c0_12], %12 {strides = array<i32>} : memref<8x64xf32, #tpu.memory_space<vmem>>, vector<8x64xf32>,
    } else {
    }
    %c0 = arith.constant 0 : index
    %c0_1 = arith.constant 0 : index
    %3 = vector.load %arg6[%c0, %c0_1] : memref<8x64xf32, #tpu.memory_space<vmem>>, vector<8x64xf32>
    %c0_2 = arith.constant 0 : index
    %c0_3 = arith.constant 0 : index
    %4 = vector.load %arg3[%c0_2, %c0_3] : memref<8x32xbf16, #tpu.memory_space<vmem>>, vector<8x32xbf16>
    %c0_4 = arith.constant 0 : index
    %c0_5 = arith.constant 0 : index
    %5 = vector.load %arg4[%c0_4, %c0_5] : memref<32x64xbf16, #tpu.memory_space<vmem>>, vector<32x64xbf16>
    %cst = arith.constant dense<0.000000e+00> : vector<8x64xf32>
    %6 = tpu.matmul %4, %5, %cst {dimension_numbers = #tpu.dot_dimension_numbers<[1], [0], [0], [1], [0, 0, 1, 1], [], []>} : vector<8x32xbf16>, vector<32x64xbf16>, vector<8x64xf32> -> vector<8x64xf32>
    %7 = arith.addf %3, %6 : vector<8x64xf32>
    %c0_6 = arith.constant 0 : index
    %c0_7 = arith.constant 0 : index
    %8 = vector.load %arg6[%c0_6, %c0_7] : memref<8x64xf32, #tpu.memory_space<vmem>>, vector<8x64xf32>
    tpu.vector_store %arg6[%c0_6, %c0_7], %7 {strides = array<i32>} : memref<8x64xf32, #tpu.memory_space<vmem>>, vector<8x64xf32>,
    %c0_i32_8 = arith.constant 0 : i32
    %9 = arith.cmpi eq, %arg2, %c0_i32_8 : i32
    %10 = arith.extui %9 : i1 to i32
    %c0_i32_9 = arith.constant 0 : i32
    %11 = arith.cmpi ne, %10, %c0_i32_9 : i32
    scf.if %11 {
      %c0_10 = arith.constant 0 : index
      %c0_11 = arith.constant 0 : index
      %12 = vector.load %arg6[%c0_10, %c0_11] : memref<8x64xf32, #tpu.memory_space<vmem>>, vector<8x64xf32>
      %c0_12 = arith.constant 0 : index
      %c0_13 = arith.constant 0 : index
      %13 = vector.load %arg5[%c0_12, %c0_13] : memref<8x64xf32, #tpu.memory_space<vmem>>, vector<8x64xf32>
      tpu.vector_store %arg5[%c0_12, %c0_13], %12 {strides = array<i32>} : memref<8x64xf32, #tpu.memory_space<vmem>>, vector<8x64xf32>,
    } else {
    }
    return
  }
  func.func @transform_0(%arg0: i32, %arg1: i32, %arg2: i32) -> (i32, i32) {
    %c0_i32 = arith.constant 0 : i32
    return %arg0, %arg2 : i32, i32
  }
  func.func @transform_1(%arg0: i32, %arg1: i32, %arg2: i32) -> (i32, i32) {
    %c0_i32 = arith.constant 0 : i32
    return %arg2, %arg1 : i32, i32
  }
  func.func @transform_2(%arg0: i32, %arg1: i32, %arg2: i32) -> (i32, i32) {
    %c0_i32 = arith.constant 0 : i32
    return %arg0, %arg1 : i32, i32
  }
}

</mosaic_0001>

<bundles_post_ra>
// kernel: body.336
= control target key start
LH: loop header
LB: loop body
LE: loop exit
PB: predicated region body
PF: predicated region fallthrough
CT: control target
= control target key end

     0   :  { %vm20_vm0 = vcmask 261120   ;;  %vm66_vm1 = vcmask 257024   ;;  %s124_s0 = inlined_call_operand.vmem [shape: bf16[24,32], index: 0, kind: input, shape index: {}]   ;;  %s125_s1 = inlined_call_operand.vmem [shape: f32[1,32], index: 1, kind: input, shape index: {}]   ;;  %s126_s2 = inlined_call_operand.vmem [shape: bf16[24,32], index: 2, kind: output, shape index: {}]  }
   0x1   :  { %v82_v0 = vld [vmem:[%s124_s0] sm:$0xff]   ;;  %v13_v1 = vld [vmem:[%s124_s0 + $0x8] sm:$0xf] }
   0x2   :  { %v83_v2 = vunpack.c.l.bf16 %v82_v0  ;;  %v16_v3 = vunpack.c.l.bf16 %v13_v1  ;;  %v84_v4 = vunpack.c.h.bf16 %v82_v0  ;;  %v74_v21 = vld [vmem:[%s125_s1] ss:$0 sm:$0xff] }
   0x4   :  { %v17_v5 = vmul.f32 %v83_v2, %v83_v2  ;;  %v19_v6 = vmul.f32 %v16_v3, %v16_v3  ;;  %v18_v7 = vmul.f32 %v84_v4, %v84_v4 }
   0x6   :  { %v21_v8 = vsel %vm20_vm0, %v17_v5, 0.0  ;;  %v27_v9 = vsel %vm20_vm0, %v19_v6, 0.0  ;;  %v24_v10 = vsel %vm20_vm0, %v18_v7, 0.0 }
   0x7   :  { %22 = vadd.xlane.f32.xlu0 %v21_v8  ;;  %28 = vadd.xlane.f32.xlu1 %v27_v9 }
   0xb   :  { %25 = vadd.xlane.f32.xlu0 %v24_v10 }
  0x94   :  { %v23_v11 = vpop.xlane.xlu0 %22  ;;  %v29_v12 = vpop.xlane.xlu1 %28 }
  0x95   :  { %v31_v13 = vmul.f32 0.03125, %v23_v11  ;;  %v33_v14 = vmul.f32 0.03125, %v29_v12 }
  0x97   :  { %v34_v15 = vadd.f32 1e-06, %v31_v13  ;;  %v36_v16 = vadd.f32 1e-06, %v33_v14 }
  0x98   :  { %v26_v17 = vpop.xlane.xlu0 %25 }
  0x99   :  { %85 = vrsqrt.f32 %v34_v15  ;;  %v32_v18 = vmul.f32 0.03125, %v26_v17 }
  0x9a   :  { %87 = vrsqrt.f32 %v36_v16 }
  0x9b   :  { %v35_v19 = vadd.f32 1e-06, %v32_v18 }
  0x9d   :  { %89 = vrsqrt.f32 %v35_v19 }
  0xa3   :  { %v86_v20 = vpop.eup %85 }
  0xa4   :  { %v88_v22 = vpop.eup %87  ;;  %v40_v23 = vmul.f32 %v86_v20, %v83_v2 }
  0xa5   :  { %v42_v24 = vmul.f32 %v88_v22, %v16_v3 }
  0xa6   :  { %v50_v25 = vmul.f32 %v74_v21, %v40_v23 }
  0xa7   :  { %v90_v26 = vpop.eup %89  ;;  %v52_v27 = vmul.f32 %v74_v21, %v42_v24 }
  0xa8   :  { %v78_v28 = vpack.c.bf16 %v50_v25, %v50_v25  ;;  %v41_v29 = vmul.f32 %v90_v26, %v84_v4 }
  0xa9   :  { %v80_v30 = vpack.c.bf16 %v52_v27, %v52_v27 }
  0xaa   :  { %67 = vst.msk [vmem:[%s126_s2] sm:$0xf] %vm66_vm1, %v78_v28  ;;  %v51_v31 = vmul.f32 %v74_v21, %v41_v29 }
  0xab   :  { %69 = vst.msk [vmem:[%s126_s2 + $0x8] sm:$0xf] %vm66_vm1, %v80_v30 }
  0xac   :  { %v79_v32 = vpack.c.bf16 %v51_v31, %v51_v31 }
  0xae   :  { %68 = vst.msk [vmem:[%s126_s2 + $0x4] sm:$0xf] %vm66_vm1, %v79_v32 }

// kernel: body.337
= control target key start
LH: loop header
LB: loop body
LE: loop exit
PB: predicated region body
PF: predicated region fallthrough
CT: control target
= control target key end

     0   :  { %s602_s9 = smov 0   ;;  %s604_s10 = smov 0   ;;  %s653_s0 = inlined_call_operand.vmem [shape: bf16[24,32], index: 0, kind: input, shape index: {}]   ;;  %s654_s1 = inlined_call_operand.vmem [shape: bf16[3,32,32], index: 1, kind: input, shape index: {}]   ;;  %s655_s2 = inlined_call_operand.vmem [shape: bf16[3,24,32], index: 2, kind: output, shape index: {}]  }
   0x1   :  { %s606_s11 = smov 0  }
   0x2 LB: > { %s38_s12 = sadd.s32 1, %s580_s10  ;;  %p501_p0 = scmp.ge.s32.totalorder %s584_s11, 1  ;;  %s584_s11 = sphi %s606_s11, %s12_s11   ;;  %s580_s10 = sphi %s604_s10, %s657_s10   ;;  %s576_s9 = sphi %s602_s9, %s656_s9  }
   0x3   : > { %p40_p1 = scmp.ge.s32.totalorder %s38_s12, 3  ;;  %p170_p2 = scmp.lt.s32.totalorder %s584_s11, 4 }
   0x5   : > { %s659_s12 = smov (%p40_p1, %s38_s12), 0  ;;  %p171_p3 = pnand %p501_p0, %p170_p2 }
   0x6   : > { %p224_p4 = scmp.lt.s32.totalorder (!%p171_p3), %s576_s9, 2  ;;  %vm254_vm0 = vcmask (!%p171_p3), 261120   ;;  %v560_v0 = vld [vmem:[%s653_s0] sm:$0xff] (!%p171_p3)   ;;  %v586_v1 = vmov (!%p171_p3), 0.0   ;;  %v561_v4 = vld [vmem:[%s653_s0 + $0x8] ss:$0 sps:$4 sm:$0xff] (!%p171_p3)  }
   0x7   : > { %174 = sbr.rel (%p171_p3) target bundleno = 254 (0xfe), region = 28  ;;  %257 = vst.msk [vmem:[#allocation2 + $0x10] sm:$0xff] (!%p171_p3), %vm254_vm0, %v586_v1  ;;  %255 = vst.msk [vmem:[#allocation2] sm:$0xff] (!%p171_p3), %vm254_vm0, %v586_v1  ;;  %528 = vmatprep.mubr.msk.bf16.mxu0 (!%p171_p3), %vm254_vm0, %v560_v0  ;;  %vm368_vm1 = vcmask (!%p171_p3), 257024  }
   0x8   : > { %256 = vst.msk [vmem:[#allocation2 + $0x8] sm:$0xff] (!%p171_p3), %vm254_vm0, %v586_v1 }
   0xe   : > { %s661_s9 = smov (!%p224_p4, %s576_s9), 2  ;;  %v260_v5 = vld [vmem:[#allocation2 + $0x10] sm:$0xff]  ;;  %v258_v6 = vld [vmem:[#allocation2] sm:$0xff] }
   0xf   : > { %s516_s15 = sshll.u32 %s661_s9, 4  ;;  %v259_v10 = vld [vmem:[#allocation2 + $0x8] sm:$0xff]  ;;  %s532_s21 = smul.u32 12, %s661_s9 }
  0x10   : > { %s234_s18 = scalar_lea.vmem %s654_s1, %s516_s15 }
  0x11   : > { %v558_v2 = vld [vmem:[%s234_s18] sm:$0xff]   ;;  %v559_v3 = vld [vmem:[%s234_s18 + $0x8] sm:$0xff]   ;;  %s247_s24 = scalar_lea.vmem %s655_s2, %s532_s21 }
  0x12   : > { %524 = vmatprep.subr.bf16.mxu0 %v558_v2 }
  0x13   : > { %525 = vmatpush3.bf16.msra.mxu0 %v558_v2 }
  0x14   : > { %526 = vmatprep.subr.bf16.mxu0 %v559_v3 }
  0x17   : > { %527 = vmatpush3.bf16.msra.mxu0 %v559_v3 }
  0x1a   : > { %529 = vmatmul.mubr.msk.bf16.vlgmr.msra.gmra.mrb[0].mxu0 %vm254_vm0, %v561_v4 }
  0xed   : > { %v530_v7 = vpop.f32.mrb[0].mxu0 }
  0xee   : > { %v345_v8 = vadd.f32 %v530_v7, %v260_v5  ;;  %v329_v9 = vpop.f32.mrb[1].mxu0 }
  0xef   : > { %v343_v11 = vadd.f32 %v329_v9, %v258_v6  ;;  %v531_v12 = vpop.f32.mrb[2].mxu0 }
  0xf0   : > { %348 = vst.msk [vmem:[#allocation2 + $0x10] sm:$0xff] %vm254_vm0, %v345_v8  ;;  %v332_v13 = vpop.f32.mrb[3].mxu0 }
  0xf1   : > { %346 = vst.msk [vmem:[#allocation2] sm:$0xff] %vm254_vm0, %v343_v11  ;;  %v344_v14 = vadd.f32 %v332_v13, %v259_v10 }
  0xf3   : > { %347 = vst.msk [vmem:[#allocation2 + $0x8] sm:$0xff] %vm254_vm0, %v344_v14 }
  0xf7   : > { %v354_v15 = vld [vmem:[#allocation2 + $0x10] sm:$0xff] }
  0xf8   : > { %v519_v16 = vpack.c.bf16 %v354_v15, %v354_v15  ;;  %v352_v17 = vld [vmem:[#allocation2] sm:$0xff] }
  0xf9   : > { %v517_v18 = vpack.c.bf16 %v352_v17, %v352_v17 }
  0xfa   : > { %371 = vst.msk [vmem:[%s247_s24 + $0x8] sm:$0xf] %vm368_vm1, %v519_v16  ;;  %v353_v19 = vld [vmem:[#allocation2 + $0x8] sm:$0xff] }
  0xfb   : > { %369 = vst.msk [vmem:[%s247_s24] sm:$0xf] %vm368_vm1, %v517_v18  ;;  %v518_v20 = vpack.c.bf16 %v353_v19, %v353_v19 }
  0xfd   : > { %370 = vst.msk [vmem:[%s247_s24 + $0x4] sm:$0xf] %vm368_vm1, %v518_v20 }
  0xfe PF: > { %s12_s11 = sadd.s32 1, %s584_s11   ;;  %s656_s9 = smov %s580_s10 }
  0xff   : > { %p9_p5 = scmp.ge.s32.totalorder %s12_s11, 5   ;;  %s657_s10 = smov %s659_s12 }
 0x101   :  { %11 = sbr.rel (!%p9_p5) target bundleno = 2 (0x2), region = 69 }

// kernel: body.339
= control target key start
LH: loop header
LB: loop body
LE: loop exit
PB: predicated region body
PF: predicated region fallthrough
CT: control target
= control target key end

     0   :  { %vm16_vm0 = vcmask 261120   ;;  %v167_v1 = vmov 0.0   ;;  %vm130_vm1 = vcmask 257024   ;;  %s212_s1 = inlined_call_operand.vmem [shape: bf16[32,32], index: 1, kind: input, shape index: {}]   ;;  %s213_s0 = inlined_call_operand.vmem [shape: bf16[24,32], index: 0, kind: input, shape index: {}]   ;;  %s214_s2 = inlined_call_operand.vmem [shape: bf16[24,32], index: 2, kind: output, shape index: {}]  }
   0x1   :  { %v163_v0 = vld [vmem:[%s212_s1] sm:$0xff]   ;;  %19 = vst.msk [vmem:[#allocation2 + $0x10] sm:$0xff] %vm16_vm0, %v167_v1  ;;  %17 = vst.msk [vmem:[#allocation2] sm:$0xff] %vm16_vm0, %v167_v1  ;;  %v164_v2 = vld [vmem:[%s212_s1 + $0x8] sm:$0xff]  }
   0x2   :  { %18 = vst.msk [vmem:[#allocation2 + $0x8] sm:$0xff] %vm16_vm0, %v167_v1  ;;  %154 = vmatprep.subr.bf16.mxu0 %v163_v0  ;;  %v165_v3 = vld [vmem:[%s213_s0] sm:$0xff]   ;;  %v166_v4 = vld [vmem:[%s213_s0 + $0x8] ss:$0 sps:$4 sm:$0xff]  }
   0x3   :  { %155 = vmatpush3.bf16.msra.mxu0 %v163_v0  ;;  %158 = vmatprep.mubr.msk.bf16.mxu0 %vm16_vm0, %v165_v3 }
   0x4   :  { %156 = vmatprep.subr.bf16.mxu0 %v164_v2 }
   0x7   :  { %157 = vmatpush3.bf16.msra.mxu0 %v164_v2 }
   0x8   :  { %v22_v5 = vld [vmem:[#allocation2 + $0x10] sm:$0xff]  ;;  %v20_v6 = vld [vmem:[#allocation2] sm:$0xff] }
   0x9   :  { %v21_v10 = vld [vmem:[#allocation2 + $0x8] sm:$0xff] }
   0xa   :  { %159 = vmatmul.mubr.msk.bf16.vlgmr.msra.gmra.mrb[0].mxu0 %vm16_vm0, %v166_v4 }
  0xdd   :  { %v160_v7 = vpop.f32.mrb[0].mxu0 }
  0xde   :  { %v107_v8 = vadd.f32 %v160_v7, %v22_v5  ;;  %v91_v9 = vpop.f32.mrb[1].mxu0 }
  0xdf   :  { %v105_v11 = vadd.f32 %v91_v9, %v20_v6  ;;  %v161_v12 = vpop.f32.mrb[2].mxu0 }
  0xe0   :  { %110 = vst.msk [vmem:[#allocation2 + $0x10] sm:$0xff] %vm16_vm0, %v107_v8  ;;  %v94_v13 = vpop.f32.mrb[3].mxu0 }
  0xe1   :  { %108 = vst.msk [vmem:[#allocation2] sm:$0xff] %vm16_vm0, %v105_v11  ;;  %v106_v14 = vadd.f32 %v94_v13, %v21_v10 }
  0xe3   :  { %109 = vst.msk [vmem:[#allocation2 + $0x8] sm:$0xff] %vm16_vm0, %v106_v14 }
  0xe7   :  { %v116_v15 = vld [vmem:[#allocation2 + $0x10] sm:$0xff] }
  0xe8   :  { %v149_v16 = vpack.c.bf16 %v116_v15, %v116_v15  ;;  %v114_v17 = vld [vmem:[#allocation2] sm:$0xff] }
  0xe9   :  { %v147_v18 = vpack.c.bf16 %v114_v17, %v114_v17 }
  0xea   :  { %133 = vst.msk [vmem:[%s214_s2 + $0x8] sm:$0xf] %vm130_vm1, %v149_v16  ;;  %v115_v19 = vld [vmem:[#allocation2 + $0x8] sm:$0xff] }
  0xeb   :  { %131 = vst.msk [vmem:[%s214_s2] sm:$0xf] %vm130_vm1, %v147_v18  ;;  %v148_v20 = vpack.c.bf16 %v115_v19, %v115_v19 }
  0xed   :  { %132 = vst.msk [vmem:[%s214_s2 + $0x4] sm:$0xf] %vm130_vm1, %v148_v20 }

// kernel: body.338
= control target key start
LH: loop header
LB: loop body
LE: loop exit
PB: predicated region body
PF: predicated region fallthrough
CT: control target
= control target key end

     0   :  { %s2358_s27 = smov 0   ;;  %s2360_s28 = smov 0   ;;  %s2970_s0 = inlined_call_operand.vmem [shape: s32[2,1,12], index: 0, kind: input, shape index: {}]   ;;  %s2971_s1 = inlined_call_operand.vmem [shape: f32[12,16], index: 1, kind: input, shape index: {}]   ;;  %s2972_s2 = inlined_call_operand.vmem [shape: f32[12,16], index: 2, kind: input, shape index: {}]   ;;  %s2973_s3 = inlined_call_operand.vmem [shape: f32[12,16], index: 3, kind: input, shape index: {}]   ;;  %s2974_s4 = inlined_call_operand.vmem [shape: f32[12,16], index: 4, kind: input, shape index: {}]   ;;  %s2975_s5 = inlined_call_operand.vmem [shape: bf16[3,2,12,32], index: 5, kind: input, shape index: {}, may-alias: {5,6,7}]   ;;  %s2976_s6 = inlined_call_operand.vmem [shape: bf16[3,2,12,32], index: 6, kind: input, shape index: {}, may-alias: {5,6,7}]   ;;  %s2977_s7 = inlined_call_operand.vmem [shape: bf16[3,2,12,32], index: 7, kind: input, shape index: {}, may-alias: {5,6,7}]   ;;  %s2978_s8 = inlined_call_operand.vmem [shape: bf16[2,12,32], index: 8, kind: output, shape index: {}]  }
   0x1   :  { %s2362_s29 = smov 0  }
   0x2 LB: > { %s37_s30 = sadd.s32 1, %s2288_s28  ;;  %p2035_p0 = scmp.ge.s32.totalorder %s2292_s29, 1  ;;  %s2292_s29 = sphi %s2362_s29, %s18_s29   ;;  %s2288_s28 = sphi %s2360_s28, %s2984_s28   ;;  %s2284_s27 = sphi %s2358_s27, %s2983_s27  }
   0x3   : > { %p39_p1 = scmp.ge.s32.totalorder %s37_s30, 2  ;;  %p383_p2 = scmp.lt.s32.totalorder %s2292_s29, 3 }
   0x5   : > { %s2986_s30 = smov (%p39_p1, %s37_s30), 0  ;;  %p384_p3 = pnand %p2035_p0, %p383_p2 }
   0x6   : > { %v2379_v0 = vld [vmem:[%s2973_s3] sm:$0xff] (!%p384_p3)  ;;  %p471_p4 = scmp.lt.s32.totalorder (!%p384_p3), %s2284_s27, 1  ;;  %s2294_s11 = smov (!%p384_p3), 4   ;;  %v2386_v1 = vld [vmem:[%s2973_s3 + $0x8] sm:$0xf] (!%p384_p3)  ;;  %v2295_v22 = vmov (!%p384_p3), 0.0  }
   0x7   : > { %387 = sbr.rel (%p384_p3) target bundleno = 2269 (0x8dd), region = 52  ;;  %674 = vrot.lane.b32.xlu0 (!%p384_p3), %v2379_v0, %s2294_s11  ;;  %v2402_v2 = vld [vmem:[%s2974_s4] sm:$0xff] (!%p384_p3)  ;;  %v2427_v11 = vld [vmem:[%s2974_s4 + $0x8] sm:$0xf] (!%p384_p3)  ;;  %2095 = vmatprep.subr.bf16.mxu0 (!%p384_p3), %v2295_v22  ;;  %vm2296_vm0 = vmmov (!%p384_p3), 0   ;;  %s2298_s18 = smov (!%p384_p3), 8  }
   0x8   : > { %v2407_v3 = vld [vmem:[%s2971_s1] sm:$0xff] (!%p384_p3)  ;;  %v2445_v17 = vld [vmem:[%s2971_s1 + $0x8] sm:$0xf] (!%p384_p3)  ;;  %2107 = vmatprep.subr.bf16.mxu1 (!%p384_p3), %v2295_v22  ;;  %2097 = vmatprep.mubr.msk.bf16.mxu0 (!%p384_p3), %vm2296_vm0, %v2295_v22  ;;  %s2299_s19 = smov (!%p384_p3), 12   ;;  %v2300_v47 = vmov (!%p384_p3), 0   ;;  %vm701_vm1 = vcmask (!%p384_p3), 31744  }
   0x9   : > { %v2416_v4 = vld [vmem:[%s2972_s2] sm:$0xff] (!%p384_p3)  ;;  %v2450_v18 = vld [vmem:[%s2972_s2 + $0x8] sm:$0xf] (!%p384_p3)  ;;  %2109 = vmatprep.mubr.msk.bf16.mxu1 (!%p384_p3), %vm2296_vm0, %v2295_v22  ;;  %2226 = vset.pattern.permute.xlu0 (!%p384_p3), %v2300_v47  ;;  %vm548_vm2 = vcmask (!%p384_p3), 261120   ;;  %vm800_vm8 = vcmask (!%p384_p3), 97280   ;;  %vm804_vm10 = vcmask (!%p384_p3), 93184  }
   0xa   : > { %2227 = vset.pattern.permute.xlu1 (!%p384_p3), %v2300_v47  ;;  %552 = vst.msk [vmem:[#allocation3] sm:$0xff] (!%p384_p3), %vm548_vm2, %v2295_v22  ;;  %554 = vst.msk [vmem:[#allocation4] sm:$0xff] (!%p384_p3), %vm548_vm2, %v2295_v22  ;;  %vm550_vm11 = vcmask (!%p384_p3), 257024   ;;  %vm844_vm12 = vcmask (!%p384_p3), 64512   ;;  %vm846_vm13 = vcmask (!%p384_p3), 60416   ;;  %vm861_vm14 = vcmask (!%p384_p3), 1045504  }
   0xb   : > { %676 = vrot.lane.b32.xlu0 (!%p384_p3), %v2386_v1, %s2294_s11  ;;  %553 = vst.msk [vmem:[#allocation3 + $0x8] sm:$0xf] (!%p384_p3), %vm550_vm11, %v2295_v22  ;;  %555 = vst.msk [vmem:[#allocation4 + $0x8] sm:$0xf] (!%p384_p3), %vm550_vm11, %v2295_v22  ;;  %s2302_s25 = smov (!%p384_p3), 116   ;;  %s2303_s26 = smov (!%p384_p3), 120  }
   0xc   : > { %s2304_s9 = smov (!%p384_p3), 108   ;;  %s2305_s10 = smov (!%p384_p3), 112   ;;  %vm1136_vm15 = vcmask (!%p384_p3), 130112  }
   0xd   : > { %s2306_s12 = smov (!%p384_p3), 16   ;;  %s2310_s13 = smov (!%p384_p3), 104  }
   0xe   : > { %s2988_s27 = smov (!%p471_p4, %s2284_s27), 1  ;;  %s2312_s15 = smov 24  }
   0xf   : > { %s2391_s14 = sshll.u32 %s2988_s27, 3  ;;  %628 = vrot.lane.b32.xlu0 %v2407_v3, %s2294_s11  ;;  %s476_s22 = scalar_lea.vmem %s2970_s0, %s2988_s27 }
  0x10   : > { %s1922_s17 = scalar_lea.vmem %s2976_s6, %s2391_s14  ;;  %s509_s24 = scalar_lea.vmem %s2975_s5, %s2391_s14 }
  0x11   : > { %v2044_v5 = vld [vmem:[%s1922_s17 + $0x10] sm:$0xf]  ;;  %v2045_v6 = vld [vmem:[%s1922_s17 + $0x14] sm:$0x3]  ;;  %v563_v7 = vld [vmem:[%s509_s24] sm:$0xf] }
  0x12   : > { %v2418_v8 = vunpack.c.l.bf16 %v2044_v5  ;;  %v2420_v9 = vunpack.c.l.bf16 %v2045_v6  ;;  %v2422_v10 = vunpack.c.l.bf16 %v563_v7  ;;  %v564_v15 = vld [vmem:[%s509_s24 + $0x4] sm:$0x3]  ;;  %s2297_s17 = smov 124   ;;  %v2301_v7 = vmov -inf   ;;  %s1927_s24 = scalar_lea.vmem %s2977_s7, %s2391_s14 }
  0x13   : > { %v2440_v16 = vunpack.c.l.bf16 %v564_v15  ;;  %549 = vst.msk [vmem:[#allocation2] sm:$0xff] %vm548_vm2, %v2301_v7  ;;  %vm1138_vm2 = vcmask 126016  }
  0x14   : > { %v682_v12 = vmul.f32 %v2402_v2, %v2418_v8  ;;  %v636_v13 = vmul.f32 %v2416_v4, %v2422_v10  ;;  %v683_v14 = vmul.f32 %v2427_v11, %v2420_v9  ;;  %v649_v51 = vmul.f32 %v2379_v0, %v2418_v8  ;;  %551 = vst.msk [vmem:[#allocation2 + $0x8] sm:$0xf] %vm550_vm11, %v2301_v7 }
  0x15   : > { %v637_v19 = vmul.f32 %v2450_v18, %v2440_v16  ;;  %v650_v52 = vmul.f32 %v2386_v1, %v2420_v9  ;;  %v604_v57 = vmul.f32 %v2445_v17, %v2440_v16  ;;  %v603_v58 = vmul.f32 %v2407_v3, %v2422_v10 }
  0x16   : > { %686 = vrot.lane.b32.xlu1 %v682_v12, %s2294_s11  ;;  %640 = vrot.lane.b32.xlu0 %v636_v13, %s2294_s11  ;;  %v583_v12 = vlaneseq  ;;  %v581_v13 = vld [vmem:[%s476_s22] sm:$0x1] }
  0x17   : > { %vm582_vm3 = vcmp.gt.s32.totalorder %v581_v13, 0 }
  0x1a   : > { %688 = vrot.lane.b32.xlu1 %v683_v14, %s2294_s11  ;;  %653 = vrot.lane.b32.xlu0 %v2402_v2, %s2294_s11  ;;  %v584_v14 = vshrl.u32 %v583_v12, 7 }
  0x1c   : > { %v598_v15 = vsub.s32 0, %v584_v14 }
  0x1e   : > { %630 = vrot.lane.b32.xlu1 %v2445_v17, %s2294_s11  ;;  %607 = vrot.lane.b32.xlu0 %v2416_v4, %s2294_s11 }
  0x22   : > { %642 = vrot.lane.b32.xlu1 %v637_v19, %s2294_s11  ;;  %v595_v19 = vsel %vm582_vm3, 1, %v2300_v47  ;;  %vm1432_vm3 = vcmask 195712  }
  0x26   : > { %655 = vrot.lane.b32.xlu1 %v2427_v11, %s2294_s11 }
  0x2a   : > { %609 = vrot.lane.b32.xlu1 %v2450_v18, %s2294_s11 }
  0x79   : > { %v675_v20 = vpop.permute.xlu0 %674 }
  0x7a   : > { %v2472_v26 = vmul.f32 %v675_v20, %v2418_v8  ;;  %v590_v20 = vand.u32 127, %v583_v12 }
  0x7c   : > { %vm593_vm4 = vcmp.ge.s32.totalorder %v584_v14, %v590_v20 }
  0x7d   : > { %v677_v21 = vpop.permute.xlu0 %676 }
  0x7e   : > { %v2475_v27 = vmul.f32 %v677_v21, %v2420_v9  ;;  %v599_v21 = vrot.slane %v595_v19, %v598_v15 }
  0x80   : > { %vm600_vm5 = vcmp.eq.s32.totalorder %v599_v21, 1 }
  0x81   : > { %v629_v23 = vpop.permute.xlu0 %628  ;;  %vm2551_vm7 = vmand %vm593_vm4, %vm600_vm5  ;;  %vm1434_vm4 = vcmask 191616  }
  0x82   : > { %v2483_v35 = vmul.f32 %v629_v23, %v2422_v10  ;;  %v585_v23 = vadd.s32 8, %v584_v14 }
  0x84   : > { %vm594_vm6 = vcmp.ge.s32.totalorder %v585_v23, %v590_v20  ;;  %v2662_v23 = vld [vmem:[%s1927_s24 + $0x20] sm:$0x3f]  }
  0x85   : > { %vm2555_vm9 = vmand %vm594_vm6, %vm600_vm5  ;;  %vm1821_vm5 = vcmask 254976  }
  0x88   : > { %v687_v24 = vpop.permute.xlu1 %686  ;;  %v641_v25 = vpop.permute.xlu0 %640 }
  0x89   : > { %v692_v29 = vadd.f32 %v687_v24, %v2472_v26  ;;  %v646_v38 = vadd.f32 %v641_v25, %v2483_v35 }
  0x8c   : > { %v689_v28 = vpop.permute.xlu1 %688  ;;  %v654_v31 = vpop.permute.xlu0 %653 }
  0x8d   : > { %v693_v30 = vadd.f32 %v689_v28, %v2475_v27  ;;  %v2480_v33 = vmul.f32 %v654_v31, %v2418_v8 }
  0x8f   : > { %v694_v32 = vpack.c.bf16 %v693_v30, %v692_v29  ;;  %663 = vrot.lane.b32.xlu1 %v2480_v33, %s2297_s17 }
  0x90   : > { %v631_v34 = vpop.permute.xlu1 %630  ;;  %v608_v42 = vpop.permute.xlu0 %607 }
  0x91   : > { %699 = vrot.lane.b32.xlu0 %v694_v32, %s2297_s17  ;;  %v2489_v36 = vmul.f32 %v631_v34, %v2440_v16  ;;  %v2497_v44 = vmul.f32 %v608_v42, %v2422_v10 }
  0x94   : > { %v643_v37 = vpop.permute.xlu1 %642 }
  0x95   : > { %v647_v39 = vadd.f32 %v643_v37, %v2489_v36 }
  0x97   : > { %v648_v40 = vpack.c.bf16 %v647_v39, %v646_v38 }
  0x98   : > { %v656_v41 = vpop.permute.xlu1 %655 }
  0x99   : > { %v660_v43 = vmul.f32 %v656_v41, %v2420_v9  ;;  %696 = vrot.lane.b32.xlu1 %v648_v40, %s2297_s17 }
  0x9b   : > { %665 = vrot.lane.b32.xlu0 %v660_v43, %s2297_s17 }
  0x9c   : > { %v610_v45 = vpop.permute.xlu1 %609 }
  0x9d   : > { %v2500_v46 = vmul.f32 %v610_v45, %v2440_v16 }
  0x9f   : > { %619 = vrot.lane.b32.xlu1 %v2500_v46, %s2297_s17  ;;  %617 = vrot.lane.b32.xlu0 %v2497_v44, %s2297_s17 }
  0xa3   : > { %950 = vrot.lane.b32.xlu1 %v2427_v11, %s2298_s18  ;;  %948 = vrot.lane.b32.xlu0 %v2402_v2, %s2298_s18 }
  0xa7   : > { %914 = vrot.lane.b32.xlu1 %v2450_v18, %s2298_s18  ;;  %912 = vrot.lane.b32.xlu0 %v2416_v4, %s2298_s18 }
  0xab   : > { %1246 = vrot.lane.b32.xlu1 %v2427_v11, %s2299_s19  ;;  %1244 = vrot.lane.b32.xlu0 %v2402_v2, %s2299_s19 }
  0xaf   : > { %1210 = vrot.lane.b32.xlu1 %v2450_v18, %s2299_s19  ;;  %1208 = vrot.lane.b32.xlu0 %v2416_v4, %s2299_s19 }
  0xb3   : > { %969 = vrot.lane.b32.xlu1 %v2386_v1, %s2298_s18  ;;  %967 = vrot.lane.b32.xlu0 %v2379_v0, %s2298_s18 }
  0xb7   : > { %977 = vrot.lane.b32.xlu1 %v660_v43, %s2294_s11 }
 0x101   : > { %v664_v50 = vpop.permute.xlu1 %663 }
 0x102   : > { %v669_v55 = vsub.f32 %v649_v51, %v664_v50 }
 0x103   : > { %v700_v48 = vpop.permute.xlu0 %699 }
 0x104   : > { %v706_v49 = vsel %vm701_vm1, %v700_v48, 0 }
 0x105   : > { %2096 = vmatpush3.bf16.xpose.msra.mxu0 %v706_v49 }
 0x106   : > { %2101 = vmatprep.subr.bf16.mxu0 %v2295_v22 }
 0x10b   : > { %v697_v53 = vpop.permute.xlu1 %696 }
 0x10c   : > { %2098 = vmatmul.mubr.msk.bf16.vlgmr.msra.gmra.mrb[0].mxu0 %vm701_vm1, %v697_v53 }
 0x10d   : > { %v666_v54 = vpop.permute.xlu0 %665  ;;  %2103 = vmatprep.mubr.msk.bf16.mxu0 %vm2296_vm0, %v2295_v22 }
 0x10e   : > { %v670_v56 = vsub.f32 %v650_v52, %v666_v54 }
 0x110   : > { %v671_v59 = vpack.c.bf16 %v670_v56, %v669_v55  ;;  %v2616_v55 = vld [vmem:[#allocation2] sm:$0xff] }
 0x111   : > { %v620_v60 = vpop.permute.xlu1 %619  ;;  %v618_v61 = vpop.permute.xlu0 %617 }
 0x112   : > { %v624_v62 = vsub.f32 %v604_v57, %v620_v60  ;;  %v753_v63 = vsel %vm701_vm1, %v671_v59, 0  ;;  %v623_v5 = vsub.f32 %v603_v58, %v618_v61  ;;  %v2618_v57 = vld [vmem:[#allocation2 + $0x8] sm:$0xf] }
 0x113   : > { %2102 = vmatpush3.bf16.xpose.msra.mxu0 %v753_v63 }
 0x114   : > { %2125 = vmatprep.subr.bf16.mxu0 %v2295_v22  ;;  %v625_v6 = vpack.c.bf16 %v624_v62, %v623_v5 }
 0x115   : > { %v951_v39 = vpop.permute.xlu1 %950  ;;  %v949_v41 = vpop.permute.xlu0 %948 }
 0x116   : > { %v955_v40 = vmul.f32 %v951_v39, %v2420_v9  ;;  %v954_v43 = vmul.f32 %v949_v41, %v2418_v8 }
 0x119   : > { %v915_v42 = vpop.permute.xlu1 %914 }
 0x11a   : > { %2104 = vmatmul.mubr.msk.bf16.vlgmr.msra.gmra.mrb[0].mxu0 %vm701_vm1, %v625_v6  ;;  %v919_v45 = vmul.f32 %v915_v42, %v2440_v16 }
 0x11b   : > { %2127 = vmatprep.mubr.msk.bf16.mxu0 %vm2296_vm0, %v2295_v22 }
 0x1ed   : > { %v789_v25 = vpop.f32.mrb[0].mxu0 }
 0x1ee   : > { %v2561_v29 = vsel %vm2551_vm7, %v789_v25, -2.3819763e+38  ;;  %v2105_v30 = vpop.f32.mrb[1].mxu0 }
 0x1ef   : > { %v792_v31 = vpop.f32.mrb[2].mxu0  ;;  %v801_v32 = vsel %vm800_vm8, %v2561_v29, -inf }
 0x1f0   : > { %v2567_v34 = vsel %vm2555_vm9, %v792_v31, -2.3819763e+38  ;;  %v2106_v37 = vpop.f32.mrb[3].mxu0  ;;  %802 = vmax.xlane.f32.xlu0 %v801_v32  ;;  %v863_v31 = vsel %vm861_vm14, %v2662_v23, 0 }
 0x1f1   : > { %v805_v38 = vsel %vm804_vm10, %v2567_v34, -inf  ;;  %2108 = vmatpush3.bf16.msra.mxu1 %v863_v31 }
 0x1f2   : > { %806 = vmax.xlane.f32.xlu1 %v805_v38  ;;  %2113 = vmatprep.subr.bf16.mxu1 %v2295_v22 }
 0x203   : > { %933 = vrot.lane.b32.xlu1 %v2445_v17, %s2298_s18 }
 0x206   : > { %975 = vrot.lane.b32.xlu0 %v2480_v33, %s2294_s11  ;;  %v913_v33 = vpop.permute.xlu0 %912 }
 0x207   : > { %941 = vrot.lane.b32.xlu1 %v2500_v46, %s2294_s11  ;;  %v918_v46 = vmul.f32 %v913_v33, %v2422_v10 }
 0x20a   : > { %931 = vrot.lane.b32.xlu0 %v2407_v3, %s2298_s18  ;;  %v1245_v48 = vpop.permute.xlu0 %1244 }
 0x20b   : > { %960 = vrot.lane.b32.xlu1 %v955_v40, %s2297_s17  ;;  %v2612_v49 = vmul.f32 %v1245_v48, %v2418_v8 }
 0x20e   : > { %939 = vrot.lane.b32.xlu0 %v2497_v44, %s2294_s11  ;;  %v1247_v44 = vpop.permute.xlu1 %1246  ;;  %v1209_v51 = vpop.permute.xlu0 %1208 }
 0x20f   : > { %1265 = vrot.lane.b32.xlu1 %v2386_v1, %s2299_s19  ;;  %v2603_v47 = vmul.f32 %v1247_v44, %v2420_v9  ;;  %v2644_v12 = vmul.f32 %v1209_v51, %v2422_v10 }
 0x212   : > { %958 = vrot.lane.b32.xlu0 %v954_v43, %s2297_s17  ;;  %v1211_v50 = vpop.permute.xlu1 %1210  ;;  %v968_v53 = vpop.permute.xlu0 %967 }
 0x213   : > { %924 = vrot.lane.b32.xlu1 %v919_v45, %s2297_s17  ;;  %v2632_v63 = vmul.f32 %v1211_v50, %v2440_v16  ;;  %v2638_v6 = vmul.f32 %v968_v53, %v2418_v8 }
 0x216   : > { %1263 = vrot.lane.b32.xlu0 %v2379_v0, %s2299_s19  ;;  %v970_v52 = vpop.permute.xlu1 %969 }
 0x217   : > { %1273 = vrot.lane.b32.xlu1 %v955_v40, %s2294_s11  ;;  %v2635_v5 = vmul.f32 %v970_v52, %v2420_v9 }
 0x21a   : > { %922 = vrot.lane.b32.xlu0 %v918_v46, %s2297_s17  ;;  %v978_v54 = vpop.permute.xlu1 %977 }
 0x21b   : > { %1229 = vrot.lane.b32.xlu1 %v2445_v17, %s2299_s19  ;;  %v982_v15 = vadd.f32 %v978_v54, %v2635_v5 }
 0x21e   : > { %1271 = vrot.lane.b32.xlu0 %v954_v43, %s2294_s11 }
 0x21f   : > { %1237 = vrot.lane.b32.xlu1 %v919_v45, %s2294_s11 }
 0x222   : > { %1227 = vrot.lane.b32.xlu0 %v2407_v3, %s2299_s19 }
 0x223   : > { %1256 = vrot.lane.b32.xlu1 %v2603_v47, %s2297_s17 }
 0x226   : > { %1235 = vrot.lane.b32.xlu0 %v918_v46, %s2294_s11 }
 0x22a   : > { %1254 = vrot.lane.b32.xlu0 %v2612_v49, %s2297_s17 }
 0x27d   : > { %v803_v56 = vpop.xlane.xlu0 %802 }
 0x27e   : > { %v2621_v58 = vmax.f32 %v2616_v55, %v803_v56 }
 0x27f   : > { %v807_v59 = vpop.xlane.xlu1 %806 }
 0x280   : > { %v810_v60 = vsub.f32 %v2616_v55, %v2621_v58  ;;  %910 = vst.msk [vmem:[#allocation2] sm:$0xff] %vm844_vm12, %v2621_v58  ;;  %v2628_v61 = vmax.f32 %v2618_v57, %v807_v59  ;;  %818 = vperm.xlu0 %2226, %v2621_v58  }
 0x281   : > { %v976_v62 = vpop.permute.xlu0 %975 }
 0x282   : > { %911 = vst.msk [vmem:[#allocation2 + $0x8] sm:$0xf] %vm846_vm13, %v2628_v61  ;;  %823 = vperm.xlu1 %2227, %v2628_v61   ;;  %v981_v13 = vadd.f32 %v976_v62, %v2638_v6 }
 0x283   : > { %v934_v7 = vpop.permute.xlu1 %933 }
 0x284   : > { %1220 = vrot.lane.b32.xlu0 %v2632_v63, %s2297_s17  ;;  %v2651_v19 = vmul.f32 %v934_v7, %v2440_v16  ;;  %v983_v25 = vpack.c.bf16 %v982_v15, %v981_v13 }
 0x285   : > { %v932_v14 = vpop.permute.xlu0 %931 }
 0x286   : > { %v2654_v20 = vmul.f32 %v932_v14, %v2422_v10  ;;  %1218 = vrot.lane.b32.xlu1 %v2644_v12, %s2297_s17 }
 0x287   : > { %v942_v21 = vpop.permute.xlu1 %941 }
 0x288   : > { %v946_v32 = vadd.f32 %v942_v21, %v2651_v19 }
 0x289   : > { %v940_v30 = vpop.permute.xlu0 %939 }
 0x28a   : > { %v945_v37 = vadd.f32 %v940_v30, %v2654_v20  ;;  %988 = vrot.lane.b32.xlu1 %v983_v25, %s2302_s25 }
 0x28b   : > { %v961_v38 = vpop.permute.xlu1 %960 }
 0x28c   : > { %v947_v39 = vpack.c.bf16 %v946_v32, %v945_v37  ;;  %v965_v41 = vsub.f32 %v2475_v27, %v961_v38 }
 0x28d   : > { %v959_v40 = vpop.permute.xlu0 %958 }
 0x28e   : > { %v964_v42 = vsub.f32 %v2472_v26, %v959_v40  ;;  %985 = vrot.lane.b32.xlu0 %v947_v39, %s2302_s25 }
 0x28f   : > { %v1266_v43 = vpop.permute.xlu1 %1265 }
 0x290   : > { %v966_v45 = vpack.c.bf16 %v965_v41, %v964_v42  ;;  %v2673_v44 = vmul.f32 %v1266_v43, %v2420_v9 }
 0x291   : > { %v1264_v33 = vpop.permute.xlu0 %1263 }
 0x292   : > { %1041 = vrot.lane.b32.xlu1 %v966_v45, %s2303_s26  ;;  %v2676_v50 = vmul.f32 %v1264_v33, %v2418_v8 }
 0x293   : > { %v925_v46 = vpop.permute.xlu1 %924 }
 0x294   : > { %v929_v51 = vsub.f32 %v2489_v36, %v925_v46 }
 0x295   : > { %v923_v48 = vpop.permute.xlu0 %922 }
 0x296   : > { %v928_v27 = vsub.f32 %v2483_v35, %v923_v48 }
 0x297   : > { %v1274_v26 = vpop.permute.xlu1 %1273 }
 0x298   : > { %v930_v52 = vpack.c.bf16 %v929_v51, %v928_v27  ;;  %v1278_v53 = vadd.f32 %v1274_v26, %v2673_v44 }
 0x299   : > { %v1272_v54 = vpop.permute.xlu0 %1271 }
 0x29a   : > { %v1277_v56 = vadd.f32 %v1272_v54, %v2676_v50  ;;  %1038 = vrot.lane.b32.xlu0 %v930_v52, %s2303_s26 }
 0x29b   : > { %v1230_v59 = vpop.permute.xlu1 %1229 }
 0x29c   : > { %v1279_v62 = vpack.c.bf16 %v1278_v53, %v1277_v56  ;;  %v2684_v7 = vmul.f32 %v1230_v59, %v2440_v16 }
 0x29d   : > { %v1228_v13 = vpop.permute.xlu0 %1227 }
 0x29e   : > { %v2687_v14 = vmul.f32 %v1228_v13, %v2422_v10  ;;  %1284 = vrot.lane.b32.xlu1 %v1279_v62, %s2304_s9  ;;  %v811_v13 = vsub.f32 %v2618_v57, %v2628_v61 }
 0x29f   : > { %v1238_v35 = vpop.permute.xlu1 %1237 }
 0x2a0   : > { %v1242_v36 = vadd.f32 %v1238_v35, %v2684_v7  ;;  %v812_v35 = vmul.f32 1.442695, %v810_v60 }
 0x2a1   : > { %v1236_v15 = vpop.permute.xlu0 %1235 }
 0x2a2   : > { %v1241_v21 = vadd.f32 %v1236_v15, %v2687_v14 }
 0x2a3   : > { %v1257_v25 = vpop.permute.xlu1 %1256 }
 0x2a4   : > { %v1243_v30 = vpack.c.bf16 %v1242_v36, %v1241_v21  ;;  %v1261_v32 = vsub.f32 %v2635_v5, %v1257_v25  ;;  %v814_v36 = vmul.f32 1.442695, %v811_v13  ;;  %v848_v21 = vld [vmem:[#allocation4] sm:$0xff] }
 0x2a5   : > { %v1255_v31 = vpop.permute.xlu0 %1254 }
 0x2a6   : > { %v1260_v37 = vsub.f32 %v2638_v6, %v1255_v31  ;;  %1281 = vrot.lane.b32.xlu0 %v1243_v30, %s2304_s9  ;;  %v849_v30 = vld [vmem:[#allocation4 + $0x8] sm:$0xf] }
 0x2a8   : > { %v1262_v38 = vpack.c.bf16 %v1261_v32, %v1260_v37 }
 0x2aa   : > { %1337 = vrot.lane.b32.xlu1 %v1262_v38, %s2305_s10 }
 0x2ae   : > { %1540 = vrot.lane.b32.xlu1 %v2402_v2, %s2306_s12 }
 0x2ff   : > { %v819_v39 = vpop.permute.xlu0 %818 }
 0x300   : > { %v826_v40 = vsub.f32 %v2561_v29, %v819_v39 }
 0x301   : > { %v824_v41 = vpop.permute.xlu1 %823 }
 0x302   : > { %v828_v42 = vmul.f32 1.442695, %v826_v40  ;;  %v827_v43 = vsub.f32 %v2567_v34, %v824_v41 }
 0x303   : > { %v1221_v45 = vpop.permute.xlu0 %1220 }
 0x304   : > { %v830_v5 = vmul.f32 1.442695, %v827_v43  ;;  %2234 = vpow2.f32 %v828_v42  ;;  %v1225_v33 = vsub.f32 %v2651_v19, %v1221_v45 }
 0x305   : > { %v1219_v6 = vpop.permute.xlu1 %1218 }
 0x306   : > { %2236 = vpow2.f32 %v830_v5  ;;  %v1224_v46 = vsub.f32 %v2654_v20, %v1219_v6  ;;  %v2307_v6 = vmov 8  }
 0x307   : > { %2238 = vpow2.f32 %v812_v35  ;;  %2229 = vset.pattern.permute.xlu0 %v2307_v6  ;;  %2228 = vset.pattern.permute.xlu1 %v2307_v6 }
 0x308   : > { %v1226_v48 = vpack.c.bf16 %v1225_v33, %v1224_v46  ;;  %2240 = vpow2.f32 %v814_v36 }
 0x309   : > { %v989_v34 = vpop.permute.xlu1 %988 }
 0x30a   : > { %1334 = vrot.lane.b32.xlu0 %v1226_v48, %s2305_s10  ;;  %v994_v27 = vsel %vm701_vm1, %v989_v34, 0 }
 0x30d   : > { %v1042_v19 = vpop.permute.xlu1 %1041 }
 0x30e   : > { %1542 = vrot.lane.b32.xlu0 %v2427_v11, %s2306_s12  ;;  %v2703_v2 = vpop.eup %2234  ;;  %v986_v11 = vpop.permute.xlu0 %985  ;;  %v1047_v20 = vsel %vm701_vm1, %v1042_v19, 0 }
 0x310   : > { %v2705_v29 = vpop.eup %2236 }
 0x311   : > { %v852_v51 = vpack.c.bf16 %v2705_v29, %v2703_v2  ;;  %v1285_v26 = vpop.permute.xlu1 %1284  ;;  %v2737_v15 = vpop.eup %2238 }
 0x312   : > { %v1039_v52 = vpop.permute.xlu0 %1038  ;;  %v1290_v53 = vsel %vm701_vm1, %v1285_v26, 0  ;;  %v2739_v25 = vpop.eup %2240  ;;  %v850_v31 = vmul.f32 %v2737_v15, %v848_v21 }
 0x313   : > { %2110 = vmatmul.mubr.msk.bf16.vlgmr.msra.gmra.mrb[0].mxu1 %vm800_vm8, %v852_v51  ;;  %v851_v57 = vmul.f32 %v2739_v25, %v849_v30 }
 0x314   : > { %2114 = vmatpush3.bf16.xpose.msra.mxu1 %v994_v27  ;;  %2115 = vmatprep.mubr.msk.bf16.mxu1 %vm2296_vm0, %v2295_v22 }
 0x315   : > { %2119 = vmatprep.subr.bf16.mxu1 %v2295_v22 }
 0x318   : > { %v1282_v56 = vpop.permute.xlu0 %1281 }
 0x31b   : > { %2116 = vmatmul.mubr.msk.bf16.vlgmr.msra.gmra.mrb[4].mxu1 %vm701_vm1, %v986_v11 }
 0x31c   : > { %2120 = vmatpush3.bf16.xpose.msra.mxu1 %v1047_v20  ;;  %2121 = vmatprep.mubr.msk.bf16.mxu1 %vm2296_vm0, %v2295_v22  ;;  %v1338_v54 = vpop.permute.xlu1 %1337 }
 0x31d   : > { %2131 = vmatprep.subr.bf16.mxu1 %v2295_v22  ;;  %v1343_v59 = vsel %vm701_vm1, %v1338_v54, 0 }
 0x327   : > { %2122 = vmatmul.mubr.msk.bf16.vlgmr.msra.gmra.mrb[4].mxu1 %vm701_vm1, %v1039_v52 }
 0x328   : > { %2132 = vmatpush3.bf16.xpose.msra.mxu1 %v1290_v53  ;;  %2133 = vmatprep.mubr.msk.bf16.mxu1 %vm2296_vm0, %v2295_v22 }
 0x329   : > { %2137 = vmatprep.subr.bf16.mxu1 %v2295_v22 }
 0x32f   : > { %2134 = vmatmul.mubr.msk.bf16.vlgmr.msra.gmra.mrb[8].mxu1 %vm701_vm1, %v1282_v56  ;;  %v2308_v56 = vmov 16  }
 0x330   : > { %2138 = vmatpush3.bf16.xpose.msra.mxu1 %v1343_v59  ;;  %2139 = vmatprep.mubr.msk.bf16.mxu1 %vm2296_vm0, %v2295_v22 }
 0x331   : > { %2161 = vmatprep.subr.bf16.mxu1 %v2295_v22 }
 0x37c   : > { %v1335_v62 = vpop.permute.xlu0 %1334 }
 0x37d   : > { %2140 = vmatmul.mubr.msk.bf16.vlgmr.msra.gmra.mrb[8].mxu1 %vm701_vm1, %v1335_v62 }
 0x37e   : > { %2163 = vmatprep.mubr.msk.bf16.mxu1 %vm2296_vm0, %v2295_v22 }
 0x3e6   : > { %v899_v32 = vpop.f32.mrb[0].mxu1 }
 0x3e7   : > { %v906_v37 = vadd.f32 %v899_v32, %v850_v31  ;;  %v2111_v38 = vpop.f32.mrb[1].mxu1 }
 0x3e8   : > { %v902_v61 = vpop.f32.mrb[2].mxu1 }
 0x3e9   : > { %908 = vst.msk [vmem:[#allocation4] sm:$0xff] %vm844_vm12, %v906_v37  ;;  %v907_v55 = vadd.f32 %v902_v61, %v851_v57  ;;  %v2112_v58 = vpop.f32.mrb[3].mxu1 }
 0x3eb   : > { %909 = vst.msk [vmem:[#allocation4 + $0x8] sm:$0xf] %vm846_vm13, %v907_v55 }
 0x3fa   : > { %v1083_v60 = vpop.f32.mrb[4].mxu1 }
 0x3fb   : > { %v2747_v39 = vsel %vm2551_vm7, %v1083_v60, -2.3819763e+38  ;;  %v2123_v40 = vpop.f32.mrb[5].mxu1 }
 0x3fc   : > { %v1086_v41 = vpop.f32.mrb[6].mxu1  ;;  %v1094_v42 = vsel %vm800_vm8, %v2747_v39, -inf }
 0x3fd   : > { %v2753_v43 = vsel %vm2555_vm9, %v1086_v41, -2.3819763e+38  ;;  %1095 = vmax.xlane.f32.xlu1 %v1094_v42  ;;  %v2124_v45 = vpop.f32.mrb[7].mxu1 }
 0x3fe   : > { %v1097_v5 = vsel %vm804_vm10, %v2753_v43, -inf }
 0x3ff   : > { %1098 = vmax.xlane.f32.xlu0 %v1097_v5 }
 0x40e   : > { %1506 = vrot.lane.b32.xlu1 %v2450_v18, %s2306_s12 }
 0x415   : > { %1504 = vrot.lane.b32.xlu0 %v2416_v4, %s2306_s12  ;;  %v1541_v4 = vpop.permute.xlu1 %1540 }
 0x416   : > { %v1546_v11 = vmul.f32 %v1541_v4, %v2418_v8 }
 0x450   : > { %v1379_v33 = vpop.f32.mrb[8].mxu1 }
 0x451   : > { %v2763_v46 = vsel %vm2551_vm7, %v1379_v33, -2.3819763e+38  ;;  %v2141_v48 = vpop.f32.mrb[9].mxu1 }
 0x452   : > { %v1382_v34 = vpop.f32.mrb[10].mxu1  ;;  %v1390_v51 = vsel %vm800_vm8, %v2763_v46, -inf }
 0x453   : > { %v2769_v27 = vsel %vm2555_vm9, %v1382_v34, -2.3819763e+38  ;;  %1391 = vmax.xlane.f32.xlu1 %v1390_v51  ;;  %v2142_v18 = vpop.f32.mrb[11].mxu1 }
 0x454   : > { %v1393_v19 = vsel %vm804_vm10, %v2769_v27, -inf }
 0x455   : > { %1394 = vmax.xlane.f32.xlu0 %v1393_v19 }
 0x464   : > { %1561 = vrot.lane.b32.xlu1 %v2386_v1, %s2306_s12  ;;  %v1543_v1 = vpop.permute.xlu0 %1542 }
 0x468   : > { %1567 = vrot.lane.b32.xlu1 %v2612_v49, %s2294_s11 }
 0x46b   : > { %1559 = vrot.lane.b32.xlu0 %v2379_v0, %s2306_s12  ;;  %v1547_v0 = vmul.f32 %v1543_v1, %v2420_v9 }
 0x46c   : > { %1523 = vrot.lane.b32.xlu1 %v2407_v3, %s2306_s12  ;;  %v2793_v3 = vld [vmem:[#allocation2] sm:$0xff] }
 0x46f   : > { %1569 = vrot.lane.b32.xlu0 %v2603_v47, %s2294_s11 }
 0x470   : > { %1531 = vrot.lane.b32.xlu1 %v2644_v12, %s2294_s11  ;;  %v2798_v12 = vld [vmem:[#allocation2 + $0x8] sm:$0xf] }
 0x473   : > { %1525 = vrot.lane.b32.xlu0 %v2445_v17, %s2306_s12 }
 0x474   : > { %1550 = vrot.lane.b32.xlu1 %v1546_v11, %s2297_s17 }
 0x477   : > { %1533 = vrot.lane.b32.xlu0 %v2632_v63, %s2294_s11  ;;  %s2309_s11 = smov 100  }
 0x47b   : > { %1552 = vrot.lane.b32.xlu0 %v1547_v0, %s2297_s17 }
 0x48a   : > { %v1096_v47 = vpop.xlane.xlu1 %1095 }
 0x48b   : > { %v2796_v49 = vmax.f32 %v2793_v3, %v1096_v47 }
 0x48c   : > { %v1099_v17 = vpop.xlane.xlu0 %1098 }
 0x48d   : > { %v1102_v20 = vsub.f32 %v2793_v3, %v2796_v49  ;;  %1206 = vst.msk [vmem:[#allocation2] sm:$0xff] %vm1136_vm15, %v2796_v49  ;;  %v2805_v63 = vmax.f32 %v2798_v12, %v1099_v17  ;;  %v1140_v3 = vld [vmem:[#allocation4] sm:$0xff] }
 0x48e   : > { %v1507_v26 = vpop.permute.xlu1 %1506 }
 0x48f   : > { %1207 = vst.msk [vmem:[#allocation2 + $0x8] sm:$0xf] %vm1138_vm2, %v2805_v63  ;;  %v1511_v52 = vmul.f32 %v1507_v26, %v2440_v16 }
 0x490   : > { %v1505_v53 = vpop.permute.xlu0 %1504 }
 0x491   : > { %v1510_v54 = vmul.f32 %v1505_v53, %v2422_v10  ;;  %1516 = vrot.lane.b32.xlu0 %v1511_v52, %s2297_s17 }
 0x493   : > { %1514 = vrot.lane.b32.xlu1 %v1510_v54, %s2297_s17 }
 0x494   : > { %v2817_v59 = vld [vmem:[#allocation2] sm:$0xff] }
 0x495   : > { %1115 = vperm.xlu0 %2229, %v2805_v63  }
 0x496   : > { %v2822_v35 = vld [vmem:[#allocation2 + $0x8] sm:$0xf] }
 0x497   : > { %1110 = vperm.xlu1 %2228, %v2796_v49  }
 0x499   : > { %1145 = vrot.lane.b32.xlu0 %v2662_v23, %s2303_s26 }
 0x49b   : > { %2230 = vset.pattern.permute.xlu1 %v2308_v56 }
 0x4e0   : > { %v1392_v62 = vpop.xlane.xlu1 %1391 }
 0x4e1   : > { %v2820_v13 = vmax.f32 %v2817_v59, %v1392_v62 }
 0x4e2   : > { %v1395_v36 = vpop.xlane.xlu0 %1394 }
 0x4e3   : > { %v1398_v21 = vsub.f32 %v2817_v59, %v2820_v13  ;;  %1502 = vst.msk [vmem:[#allocation2] sm:$0xff] %vm1432_vm3, %v2820_v13  ;;  %v2829_v30 = vmax.f32 %v2822_v35, %v1395_v36  ;;  %1406 = vperm.xlu1 %2230, %v2820_v13  }
 0x4e4   : > { %v1562_v31 = vpop.permute.xlu1 %1561 }
 0x4e5   : > { %1503 = vst.msk [vmem:[#allocation2 + $0x8] sm:$0xf] %vm1434_vm4, %v2829_v30  ;;  %v1566_v37 = vmul.f32 %v1562_v31, %v2420_v9 }
 0x4e6   : > { %v1560_v32 = vpop.permute.xlu0 %1559 }
 0x4e7   : > { %v1565_v38 = vmul.f32 %v1560_v32, %v2418_v8  ;;  %1411 = vperm.xlu1 %2230, %v2829_v30  }
 0x4e8   : > { %v1568_v57 = vpop.permute.xlu1 %1567 }
 0x4e9   : > { %v1573_v55 = vadd.f32 %v1568_v57, %v1565_v38 }
 0x4ea   : > { %v1570_v61 = vpop.permute.xlu0 %1569 }
 0x4eb   : > { %v1574_v58 = vadd.f32 %v1570_v61, %v1566_v37  ;;  %1441 = vrot.lane.b32.xlu1 %v2662_v23, %s2305_s10 }
 0x4ec   : > { %v1524_v60 = vpop.permute.xlu1 %1523 }
 0x4ed   : > { %v1575_v40 = vpack.c.bf16 %v1574_v58, %v1573_v55  ;;  %v1529_v42 = vmul.f32 %v1524_v60, %v2422_v10 }
 0x4ee   : > { %v1526_v41 = vpop.permute.xlu0 %1525 }
 0x4ef   : > { %v1530_v45 = vmul.f32 %v1526_v41, %v2440_v16  ;;  %1580 = vrot.lane.b32.xlu0 %v1575_v40, %s2309_s11 }
 0x4f0   : > { %v1532_v9 = vpop.permute.xlu1 %1531 }
 0x4f1   : > { %v1537_v5 = vadd.f32 %v1532_v9, %v1529_v42 }
 0x4f2   : > { %v1534_v8 = vpop.permute.xlu0 %1533 }
 0x4f3   : > { %v1538_v6 = vadd.f32 %v1534_v8, %v1530_v45 }
 0x4f4   : > { %v1551_v33 = vpop.permute.xlu1 %1550 }
 0x4f5   : > { %v1539_v48 = vpack.c.bf16 %v1538_v6, %v1537_v5  ;;  %v1556_v51 = vsub.f32 %v2676_v50, %v1551_v33 }
 0x4f6   : > { %v1553_v34 = vpop.permute.xlu0 %1552 }
 0x4f7   : > { %v1557_v18 = vsub.f32 %v2673_v44, %v1553_v34  ;;  %1577 = vrot.lane.b32.xlu1 %v1539_v48, %s2309_s11 }
 0x4f9   : > { %v1558_v19 = vpack.c.bf16 %v1557_v18, %v1556_v51 }
 0x4fb   : > { %1633 = vrot.lane.b32.xlu0 %v1558_v19, %s2310_s13 }
 0x503   : > { %v1517_v10 = vpop.permute.xlu0 %1516 }
 0x504   : > { %v1521_v4 = vsub.f32 %v2684_v7, %v1517_v10 }
 0x505   : > { %v1515_v16 = vpop.permute.xlu1 %1514 }
 0x506   : > { %v1520_v11 = vsub.f32 %v2687_v14, %v1515_v16 }
 0x508   : > { %v1522_v1 = vpack.c.bf16 %v1521_v4, %v1520_v11  ;;  %v2311_v4 = vmov 24   ;;  %v2883_v11 = vld [vmem:[#allocation2] sm:$0xff] }
 0x509   : > { %2231 = vset.pattern.permute.xlu0 %v2311_v4  ;;  %2232 = vset.pattern.permute.xlu1 %v2311_v4  ;;  %v1400_v4 = vmul.f32 1.442695, %v1398_v21 }
 0x50a   : > { %1630 = vrot.lane.b32.xlu1 %v1522_v1, %s2310_s13 }
 0x514   : > { %v1116_v0 = vpop.permute.xlu0 %1115 }
 0x515   : > { %v1119_v47 = vsub.f32 %v2753_v43, %v1116_v0  ;;  %v2888_v0 = vld [vmem:[#allocation2 + $0x8] sm:$0xf] }
 0x516   : > { %v1111_v50 = vpop.permute.xlu1 %1110 }
 0x517   : > { %v1122_v17 = vmul.f32 1.442695, %v1119_v47  ;;  %v1118_v44 = vsub.f32 %v2747_v39, %v1111_v50 }
 0x518   : > { %v1146_v26 = vpop.permute.xlu0 %1145 }
 0x519   : > { %v1120_v52 = vmul.f32 1.442695, %v1118_v44  ;;  %v1151_v53 = vsel %vm861_vm14, %v1146_v26, 0  ;;  %2242 = vpow2.f32 %v1122_v17  ;;  %v839_v44 = vsel %vm804_vm10, %v2705_v29, 0.0 }
 0x51a   : > { %2126 = vmatpush3.bf16.msra.mxu0 %v1151_v53  ;;  %v836_v26 = vsel %vm800_vm8, %v2703_v2, 0.0 }
 0x51b   : > { %2244 = vpow2.f32 %v1120_v52  ;;  %2143 = vmatprep.subr.bf16.mxu0 %v2295_v22 }
 0x523   : > { %v2851_v7 = vpop.eup %2242 }
 0x524   : > { %v1131_v53 = vsel %vm804_vm10, %v2851_v7, 0.0 }
 0x525   : > { %v2853_v14 = vpop.eup %2244 }
 0x526   : > { %v1144_v43 = vpack.c.bf16 %v2851_v7, %v2853_v14  ;;  %v1128_v52 = vsel %vm800_vm8, %v2853_v14, 0.0 }
 0x528   : > { %2128 = vmatmul.mubr.msk.bf16.vlgmr.msra.gmra.mrb[4].mxu0 %vm800_vm8, %v1144_v43 }
 0x529   : > { %2145 = vmatprep.mubr.msk.bf16.mxu0 %vm2296_vm0, %v2295_v22 }
 0x561   : > { %v1581_v61 = vpop.permute.xlu0 %1580 }
 0x562   : > { %v1407_v39 = vpop.permute.xlu1 %1406 }
 0x563   : > { %v1414_v54 = vsub.f32 %v2763_v46, %v1407_v39  ;;  %v1586_v46 = vsel %vm701_vm1, %v1581_v61, 0 }
 0x565   : > { %v1416_v56 = vmul.f32 1.442695, %v1414_v54 }
 0x566   : > { %v1412_v62 = vpop.permute.xlu1 %1411 }
 0x567   : > { %v1415_v36 = vsub.f32 %v2769_v27, %v1412_v62  ;;  %2246 = vpow2.f32 %v1416_v56 }
 0x569   : > { %v1418_v31 = vmul.f32 1.442695, %v1415_v36 }
 0x56a   : > { %v1442_v32 = vpop.permute.xlu1 %1441 }
 0x56b   : > { %2248 = vpow2.f32 %v1418_v31  ;;  %v1447_v37 = vsel %vm861_vm14, %v1442_v32, 0 }
 0x56c   : > { %2144 = vmatpush3.bf16.msra.mxu0 %v1447_v37  ;;  %v1103_v37 = vsub.f32 %v2798_v12, %v2805_v63  ;;  %v1104_v12 = vmul.f32 1.442695, %v1102_v20 }
 0x56d   : > { %2149 = vmatprep.subr.bf16.mxu0 %v2295_v22  ;;  %v1634_v27 = vpop.permute.xlu0 %1633 }
 0x56e   : > { %v1578_v58 = vpop.permute.xlu1 %1577  ;;  %v1639_v60 = vsel %vm701_vm1, %v1634_v27, 0 }
 0x571   : > { %v2864_v38 = vpop.eup %2246 }
 0x572   : > { %v1424_v29 = vsel %vm800_vm8, %v2864_v38, 0.0 }
 0x575   : > { %v2249_v57 = vpop.eup %2248 }
 0x576   : > { %v1440_v55 = vpack.c.bf16 %v2249_v57, %v2864_v38 }
 0x578   : > { %2146 = vmatmul.mubr.msk.bf16.vlgmr.msra.gmra.mrb[8].mxu0 %vm800_vm8, %v1440_v55  ;;  %v833_v55 = vld [vmem:[#allocation3 + $0x8] sm:$0xf] }
 0x579   : > { %2150 = vmatpush3.bf16.xpose.msra.mxu0 %v1586_v46  ;;  %2151 = vmatprep.mubr.msk.bf16.mxu0 %vm2296_vm0, %v2295_v22  ;;  %v835_v46 = vmul.f32 %v2739_v25, %v833_v55 }
 0x57a   : > { %2155 = vmatprep.subr.bf16.mxu0 %v2295_v22 }
 0x57c   : > { %v1631_v40 = vpop.permute.xlu1 %1630 }
 0x580   : > { %2152 = vmatmul.mubr.msk.bf16.vlgmr.msra.gmra.mrb[12].mxu0 %vm701_vm1, %v1578_v58 }
 0x581   : > { %2156 = vmatpush3.bf16.xpose.msra.mxu0 %v1639_v60  ;;  %2157 = vmatprep.mubr.msk.bf16.mxu0 %vm2296_vm0, %v2295_v22  ;;  %vm1728_vm0 = vcmask 261312  }
 0x58c   : > { %2158 = vmatmul.mubr.msk.bf16.vlgmr.msra.gmra.mrb[12].mxu0 %vm701_vm1, %v1631_v40  ;;  %vm1730_vm1 = vcmask 257216   ;;  %v1141_v40 = vld [vmem:[#allocation4 + $0x8] sm:$0xf] }
 0x5fb   : > { %v1187_v41 = vpop.f32.mrb[4].mxu0 }
 0x5fc   : > { %v2129_v42 = vpop.f32.mrb[5].mxu0 }
 0x5fd   : > { %v1190_v45 = vpop.f32.mrb[6].mxu0 }
 0x5fe   : > { %v2130_v9 = vpop.f32.mrb[7].mxu0 }
 0x64b   : > { %v1483_v8 = vpop.f32.mrb[8].mxu0 }
 0x64c   : > { %v2147_v5 = vpop.f32.mrb[9].mxu0 }
 0x64d   : > { %v1486_v6 = vpop.f32.mrb[10].mxu0 }
 0x64e   : > { %v2148_v33 = vpop.f32.mrb[11].mxu0 }
 0x65f   : > { %v1675_v48 = vpop.f32.mrb[12].mxu0 }
 0x660   : > { %v1682_v34 = vsel %vm2551_vm7, %v1675_v48, -2.3819763e+38  ;;  %v2159_v51 = vpop.f32.mrb[13].mxu0 }
 0x661   : > { %v1678_v18 = vpop.f32.mrb[14].mxu0  ;;  %v1686_v19 = vsel %vm800_vm8, %v1682_v34, -inf }
 0x662   : > { %v1683_v22 = vsel %vm2555_vm9, %v1678_v18, -2.3819763e+38  ;;  %1687 = vmax.xlane.f32.xlu0 %v1686_v19  ;;  %v2160_v10 = vpop.f32.mrb[15].mxu0 }
 0x663   : > { %v1689_v16 = vsel %vm804_vm10, %v1683_v22, -inf }
 0x664   : > { %1690 = vmax.xlane.f32.xlu1 %v1689_v16 }
 0x6ef   : > { %v1688_v24 = vpop.xlane.xlu0 %1687 }
 0x6f0   : > { %v2886_v1 = vmax.f32 %v2883_v11, %v1688_v24 }
 0x6f1   : > { %v1691_v28 = vpop.xlane.xlu1 %1690 }
 0x6f2   : > { %v1694_v47 = vsub.f32 %v2883_v11, %v2886_v1  ;;  %1798 = vst.msk [vmem:[#allocation2] sm:$0xff] %vm1728_vm0, %v2886_v1  ;;  %v2895_v50 = vmax.f32 %v2888_v0, %v1691_v28  ;;  %1702 = vperm.xlu0 %2231, %v2886_v1  }
 0x6f4   : > { %v1695_v17 = vsub.f32 %v2888_v0, %v2895_v50  ;;  %1799 = vst.msk [vmem:[#allocation2 + $0x8] sm:$0xf] %vm1730_vm1, %v2895_v50  ;;  %1707 = vperm.xlu1 %2232, %v2895_v50  }
 0x6f8   : > { %1737 = vrot.lane.b32.xlu1 %v2662_v23, %s2310_s13  ;;  %v1427_v23 = vsel %vm804_vm10, %v2249_v57, 0.0  ;;  %v1106_v57 = vmul.f32 1.442695, %v1103_v37 }
 0x711   : > { %840 = vadd.xlane.f32.xlu0 %v839_v44 }
 0x71c   : > { %837 = vadd.xlane.f32.xlu1 %v836_v26 }
 0x720   : > { %1129 = vadd.xlane.f32.xlu1 %v1128_v52 }
 0x724   : > { %1132 = vadd.xlane.f32.xlu1 %v1131_v53 }
 0x727   : > { %1198 = vrot.lane.b32.xlu0 %v1190_v45, %s2298_s18  ;;  %v832_v45 = vld [vmem:[#allocation3] sm:$0xff] }
 0x728   : > { %v834_v9 = vmul.f32 %v2737_v15, %v832_v45  ;;  %v1399_v15 = vsub.f32 %v2822_v35, %v2829_v30 }
 0x72a   : > { %v1402_v16 = vmul.f32 1.442695, %v1399_v15 }
 0x735   : > { %1196 = vrot.lane.b32.xlu1 %v1187_v41, %s2298_s18  ;;  %s541_s18 = scalar_lea.vmem %s2978_s8, %s2391_s14 }
 0x746   : > { %1428 = vadd.xlane.f32.xlu0 %v1427_v23 }
 0x759   : > { %1425 = vadd.xlane.f32.xlu1 %v1424_v29 }
 0x75c   : > { %1492 = vrot.lane.b32.xlu0 %v1483_v8, %s2306_s12 }
 0x76a   : > { %1494 = vrot.lane.b32.xlu1 %v1486_v6, %s2306_s12 }
 0x771   : > { %v1703_v2 = vpop.permute.xlu0 %1702 }
 0x772   : > { %v1710_v14 = vsub.f32 %v1682_v34, %v1703_v2 }
 0x773   : > { %v1708_v43 = vpop.permute.xlu1 %1707 }
 0x774   : > { %v1712_v7 = vmul.f32 1.442695, %v1710_v14  ;;  %v1711_v39 = vsub.f32 %v1683_v22, %v1708_v43 }
 0x776   : > { %v1714_v54 = vmul.f32 1.442695, %v1711_v39  ;;  %2250 = vpow2.f32 %v1712_v7 }
 0x777   : > { %v1738_v56 = vpop.permute.xlu1 %1737 }
 0x778   : > { %2252 = vpow2.f32 %v1714_v54  ;;  %v1743_v62 = vsel %vm861_vm14, %v1738_v56, 0  ;;  %v1696_v54 = vmul.f32 1.442695, %v1694_v47  ;;  %v1698_v56 = vmul.f32 1.442695, %v1695_v17 }
 0x779   : > { %2162 = vmatpush3.bf16.msra.mxu1 %v1743_v62  ;;  %2254 = vpow2.f32 %v1106_v57 }
 0x77a   : > { %2256 = vpow2.f32 %v1104_v12 }
 0x77b   : > { %2258 = vpow2.f32 %v1402_v16 }
 0x77c   : > { %2260 = vpow2.f32 %v1400_v4 }
 0x77d   : > { %2262 = vpow2.f32 %v1696_v54 }
 0x77e   : > { %2264 = vpow2.f32 %v1698_v56 }
 0x780   : > { %v2251_v36 = vpop.eup %2250 }
 0x781   : > { %v1720_v38 = vsel %vm800_vm8, %v2251_v36, 0.0 }
 0x782   : > { %v2253_v31 = vpop.eup %2252 }
 0x783   : > { %v1736_v32 = vpack.c.bf16 %v2253_v31, %v2251_v36  ;;  %v1723_v61 = vsel %vm804_vm10, %v2253_v31, 0.0  ;;  %v2255_v27 = vpop.eup %2254 }
 0x784   : > { %v1143_v41 = vmul.f32 %v2255_v27, %v1141_v40  ;;  %v2257_v48 = vpop.eup %2256 }
 0x785   : > { %2164 = vmatmul.mubr.msk.bf16.vlgmr.msra.gmra.mrb[12].mxu1 %vm800_vm8, %v1736_v32  ;;  %v1142_v20 = vmul.f32 %v2257_v48, %v1140_v3  ;;  %v2259_v28 = vpop.eup %2258 }
 0x786   : > { %v2261_v23 = vpop.eup %2260 }
 0x787   : > { %v2263_v36 = vpop.eup %2262 }
 0x788   : > { %v2265_v57 = vpop.eup %2264 }
 0x78e   : > { %1721 = vadd.xlane.f32.xlu1 %v1720_v38 }
 0x792   : > { %1724 = vadd.xlane.f32.xlu1 %v1723_v61 }
 0x79e   : > { %v841_v58 = vpop.xlane.xlu0 %840 }
 0x79f   : > { %v843_v60 = vadd.f32 %v841_v58, %v835_v46 }
 0x7a1   : > { %847 = vst.msk [vmem:[#allocation3 + $0x8] sm:$0xf] %vm846_vm13, %v843_v60 }
 0x7a2   : > { %v1199_v42 = vpop.permute.xlu0 %1198 }
 0x7a3   : > { %v1203_v63 = vadd.f32 %v1199_v42, %v1143_v41 }
 0x7a5   : > { %1205 = vst.msk [vmem:[#allocation4 + $0x8] sm:$0xf] %vm1138_vm2, %v1203_v63 }
 0x7a8   : > { %v1125_v6 = vld [vmem:[#allocation3 + $0x8] sm:$0xf] }
 0x7a9   : > { %v838_v25 = vpop.xlane.xlu1 %837  ;;  %v1127_v33 = vmul.f32 %v2255_v27, %v1125_v6 }
 0x7aa   : > { %v842_v8 = vadd.f32 %v838_v25, %v834_v9 }
 0x7ac   : > { %845 = vst.msk [vmem:[#allocation3] sm:$0xff] %vm844_vm12, %v842_v8  ;;  %v1437_v13 = vld [vmem:[#allocation4 + $0x8] sm:$0xf] }
 0x7ad   : > { %v1130_v5 = vpop.xlane.xlu1 %1129  ;;  %v1439_v43 = vmul.f32 %v2259_v28, %v1437_v13 }
 0x7b1   : > { %v1133_v34 = vpop.xlane.xlu1 %1132 }
 0x7b2   : > { %v1135_v51 = vadd.f32 %v1133_v34, %v1127_v33 }
 0x7b3   : > { %v1124_v18 = vld [vmem:[#allocation3] sm:$0xff] }
 0x7b4   : > { %v1126_v49 = vmul.f32 %v2257_v48, %v1124_v18  ;;  %1139 = vst.msk [vmem:[#allocation3 + $0x8] sm:$0xf] %vm1138_vm2, %v1135_v51 }
 0x7b5   : > { %v1197_v19 = vpop.permute.xlu1 %1196 }
 0x7b6   : > { %v1134_v22 = vadd.f32 %v1130_v5, %v1126_v49  ;;  %v1202_v10 = vadd.f32 %v1197_v19, %v1142_v20 }
 0x7b8   : > { %1137 = vst.msk [vmem:[#allocation3] sm:$0xff] %vm1136_vm15, %v1134_v22  ;;  %1204 = vst.msk [vmem:[#allocation4] sm:$0xff] %vm1136_vm15, %v1202_v10 }
 0x7bb   : > { %v1421_v24 = vld [vmem:[#allocation3 + $0x8] sm:$0xf] }
 0x7bc   : > { %v1423_v44 = vmul.f32 %v2259_v28, %v1421_v24 }
 0x7bf   : > { %v1436_v52 = vld [vmem:[#allocation4] sm:$0xff]  ;;  %v1420_v35 = vld [vmem:[#allocation3] sm:$0xff] }
 0x7c0   : > { %v1438_v29 = vmul.f32 %v2261_v23, %v1436_v52  ;;  %v1422_v30 = vmul.f32 %v2261_v23, %v1420_v35 }
 0x7d3   : > { %v1429_v26 = vpop.xlane.xlu0 %1428 }
 0x7d4   : > { %v1431_v53 = vadd.f32 %v1429_v26, %v1423_v44 }
 0x7d6   : > { %1435 = vst.msk [vmem:[#allocation3 + $0x8] sm:$0xf] %vm1434_vm4, %v1431_v53 }
 0x7d7   : > { %v1493_v2 = vpop.permute.xlu0 %1492 }
 0x7d8   : > { %v1498_v14 = vadd.f32 %v1493_v2, %v1438_v29 }
 0x7da   : > { %1500 = vst.msk [vmem:[#allocation4] sm:$0xff] %vm1432_vm3, %v1498_v14 }
 0x7dd   : > { %v1717_v37 = vld [vmem:[#allocation3 + $0x8] sm:$0xf] }
 0x7de   : > { %v1719_v61 = vmul.f32 %v2265_v57, %v1717_v37 }
 0x7e1   : > { %v1732_v50 = vld [vmem:[#allocation4] sm:$0xff] }
 0x7e2   : > { %v1734_v60 = vmul.f32 %v2263_v36, %v1732_v50 }
 0x7e6   : > { %v1426_v59 = vpop.xlane.xlu1 %1425 }
 0x7e7   : > { %v1430_v21 = vadd.f32 %v1426_v59, %v1422_v30 }
 0x7e9   : > { %1433 = vst.msk [vmem:[#allocation3] sm:$0xff] %vm1432_vm3, %v1430_v21 }
 0x7ea   : > { %v1495_v7 = vpop.permute.xlu1 %1494 }
 0x7eb   : > { %v1499_v39 = vadd.f32 %v1495_v7, %v1439_v43 }
 0x7ed   : > { %1501 = vst.msk [vmem:[#allocation4 + $0x8] sm:$0xf] %vm1434_vm4, %v1499_v39 }
 0x7f0   : > { %v1716_v62 = vld [vmem:[#allocation3] sm:$0xff] }
 0x7f1   : > { %v1718_v31 = vmul.f32 %v2263_v36, %v1716_v62 }
 0x7f4   : > { %v1733_v27 = vld [vmem:[#allocation4 + $0x8] sm:$0xf] }
 0x7f5   : > { %v1735_v42 = vmul.f32 %v2265_v57, %v1733_v27 }
 0x81b   : > { %v1722_v32 = vpop.xlane.xlu1 %1721 }
 0x81c   : > { %v1726_v38 = vadd.f32 %v1722_v32, %v1718_v31 }
 0x81e   : > { %1729 = vst.msk [vmem:[#allocation3] sm:$0xff] %vm1728_vm0, %v1726_v38 }
 0x81f   : > { %v1725_v55 = vpop.xlane.xlu1 %1724 }
 0x820   : > { %v1727_v46 = vadd.f32 %v1725_v55, %v1719_v61 }
 0x822   : > { %1731 = vst.msk [vmem:[#allocation3 + $0x8] sm:$0xf] %vm1730_vm1, %v1727_v46 }
 0x825   : > { %v1805_v17 = vld [vmem:[#allocation3] sm:$0xff] }
 0x826   : > { %2266 = vrcp.f32 %v1805_v17 }
 0x829   : > { %v1806_v58 = vld [vmem:[#allocation3 + $0x8] sm:$0xf] }
 0x82a   : > { %2268 = vrcp.f32 %v1806_v58 }
 0x830   : > { %v2267_v45 = vpop.eup %2266 }
 0x834   : > { %v2269_v8 = vpop.eup %2268 }
 0x858   : > { %v1779_v11 = vpop.f32.mrb[12].mxu1 }
 0x859   : > { %1788 = vrot.lane.b32.xlu1 %v1779_v11, %s2312_s15  ;;  %v2165_v1 = vpop.f32.mrb[13].mxu1 }
 0x85a   : > { %v1782_v0 = vpop.f32.mrb[14].mxu1 }
 0x85b   : > { %1790 = vrot.lane.b32.xlu0 %v1782_v0, %s2312_s15  ;;  %v2166_v47 = vpop.f32.mrb[15].mxu1 }
 0x8cb   : > { %v1789_v40 = vpop.permute.xlu1 %1788 }
 0x8cc   : > { %v1794_v41 = vadd.f32 %v1789_v40, %v1734_v60 }
 0x8cd   : > { %v1791_v12 = vpop.permute.xlu0 %1790 }
 0x8ce   : > { %1796 = vst.msk [vmem:[#allocation4] sm:$0xff] %vm1728_vm0, %v1794_v41  ;;  %v1795_v63 = vadd.f32 %v1791_v12, %v1735_v42 }
 0x8d0   : > { %1797 = vst.msk [vmem:[#allocation4 + $0x8] sm:$0xf] %vm1730_vm1, %v1795_v63 }
 0x8d5   : > { %v1803_v9 = vld [vmem:[#allocation4] sm:$0xff] }
 0x8d6   : > { %v1809_v25 = vmul.f32 %v2267_v45, %v1803_v9 }
 0x8d7   : > { %v1804_v5 = vld [vmem:[#allocation4 + $0x8] sm:$0xf] }
 0x8d8   : > { %v2069_v6 = vpack.c.bf16 %v1809_v25, %v1809_v25  ;;  %v1810_v33 = vmul.f32 %v2269_v8, %v1804_v5 }
 0x8da   : > { %1820 = vst.msk [vmem:[%s541_s18] sm:$0xf] %vm550_vm11, %v2069_v6  ;;  %v2070_v48 = vpack.c.bf16 %v1810_v33, %v1810_v33 }
 0x8dc   : > { %1822 = vst.msk [vmem:[%s541_s18 + $0x4] sm:$0x3] %vm1821_vm5, %v2070_v48 }
 0x8dd PF: > { %s18_s29 = sadd.s32 1, %s2292_s29   ;;  %s2983_s27 = smov %s2288_s28 }
 0x8de   : > { %p15_p5 = scmp.ge.s32.totalorder %s18_s29, 4   ;;  %s2984_s28 = smov %s2986_s30 }
 0x8e0   :  { %17 = sbr.rel (!%p15_p5) target bundleno = 2 (0x2), region = 115 }

// kernel: body.342
= control target key start
LH: loop header
LB: loop body
LE: loop exit
PB: predicated region body
PF: predicated region fallthrough
CT: control target
= control target key end

     0   :  { %vm16_vm0 = vcmask 261120   ;;  %v194_v1 = vmov 0.0   ;;  %vm66_vm1 = vcmask 523264   ;;  %vm147_vm2 = vcmask 257024   ;;  %s243_s1 = inlined_call_operand.vmem [shape: bf16[64,32], index: 1, kind: input, shape index: {}]   ;;  %s244_s0 = inlined_call_operand.vmem [shape: bf16[24,64], index: 0, kind: input, shape index: {}]   ;;  %s245_s2 = inlined_call_operand.vmem [shape: bf16[24,32], index: 2, kind: output, shape index: {}]  }
   0x1   :  { %v188_v0 = vld [vmem:[%s243_s1] sm:$0xff]   ;;  %19 = vst.msk [vmem:[#allocation2 + $0x10] sm:$0xff] %vm16_vm0, %v194_v1  ;;  %17 = vst.msk [vmem:[#allocation2] sm:$0xff] %vm16_vm0, %v194_v1  ;;  %v189_v2 = vld [vmem:[%s243_s1 + $0x8] sm:$0xff]  }
   0x2   :  { %18 = vst.msk [vmem:[#allocation2 + $0x8] sm:$0xff] %vm16_vm0, %v194_v1  ;;  %175 = vmatprep.subr.bf16.mxu0 %v188_v0  ;;  %v190_v3 = vld [vmem:[%s243_s1 + $0x10] sm:$0xff]   ;;  %v192_v4 = vld [vmem:[%s244_s0] sm:$0xff]   ;;  %v191_v5 = vld [vmem:[%s243_s1 + $0x18] sm:$0xff]  }
   0x3   :  { %176 = vmatpush3.bf16.msra.mxu0 %v188_v0  ;;  %183 = vmatprep.mubr.msk.bf16.mxu0 %vm66_vm1, %v192_v4  ;;  %v193_v6 = vld [vmem:[%s244_s0 + $0x8] ss:$0 sps:$4 sm:$0xff]  }
   0x4   :  { %177 = vmatprep.subr.bf16.mxu0 %v189_v2 }
   0x7   :  { %178 = vmatpush3.bf16.msra.mxu0 %v189_v2 }
   0x8   :  { %179 = vmatprep.subr.bf16.mxu0 %v190_v3  ;;  %v22_v7 = vld [vmem:[#allocation2 + $0x10] sm:$0xff]  ;;  %v20_v8 = vld [vmem:[#allocation2] sm:$0xff] }
   0x9   :  { %v21_v12 = vld [vmem:[#allocation2 + $0x8] sm:$0xff] }
   0xb   :  { %180 = vmatpush3.bf16.msra.mxu0 %v190_v3 }
   0xc   :  { %181 = vmatprep.subr.bf16.mxu0 %v191_v5 }
   0xf   :  { %182 = vmatpush3.bf16.msra.mxu0 %v191_v5 }
  0x12   :  { %184 = vmatmul.mubr.msk.bf16.vlgmr.msra.gmra.mrb[0].mxu0 %vm66_vm1, %v193_v6 }
  0xe5   :  { %v185_v9 = vpop.f32.mrb[0].mxu0 }
  0xe6   :  { %v123_v10 = vadd.f32 %v185_v9, %v22_v7  ;;  %v107_v11 = vpop.f32.mrb[1].mxu0 }
  0xe7   :  { %v121_v13 = vadd.f32 %v107_v11, %v20_v8  ;;  %v186_v14 = vpop.f32.mrb[2].mxu0 }
  0xe8   :  { %127 = vst.msk [vmem:[#allocation2 + $0x10] sm:$0xff] %vm16_vm0, %v123_v10  ;;  %v110_v15 = vpop.f32.mrb[3].mxu0 }
  0xe9   :  { %125 = vst.msk [vmem:[#allocation2] sm:$0xff] %vm16_vm0, %v121_v13  ;;  %v122_v16 = vadd.f32 %v110_v15, %v21_v12 }
  0xeb   :  { %126 = vst.msk [vmem:[#allocation2 + $0x8] sm:$0xff] %vm16_vm0, %v122_v16 }
  0xef   :  { %v133_v17 = vld [vmem:[#allocation2 + $0x10] sm:$0xff] }
  0xf0   :  { %v168_v18 = vpack.c.bf16 %v133_v17, %v133_v17  ;;  %v131_v19 = vld [vmem:[#allocation2] sm:$0xff] }
  0xf1   :  { %v166_v20 = vpack.c.bf16 %v131_v19, %v131_v19 }
  0xf2   :  { %150 = vst.msk [vmem:[%s245_s2 + $0x8] sm:$0xf] %vm147_vm2, %v168_v18  ;;  %v132_v21 = vld [vmem:[#allocation2 + $0x8] sm:$0xff] }
  0xf3   :  { %148 = vst.msk [vmem:[%s245_s2] sm:$0xf] %vm147_vm2, %v166_v20  ;;  %v167_v22 = vpack.c.bf16 %v132_v21, %v132_v21 }
  0xf5   :  { %149 = vst.msk [vmem:[%s245_s2 + $0x4] sm:$0xf] %vm147_vm2, %v167_v22 }

// kernel: body.351
= control target key start
LH: loop header
LB: loop body
LE: loop exit
PB: predicated region body
PF: predicated region fallthrough
CT: control target
= control target key end

     0   :  { %vm16_vm0 = vcmask 523264   ;;  %v110_v0 = vmov 0.0   ;;  %vm111_vm1 = vmmov 0   ;;  %vm36_vm2 = vcmask 261120   ;;  %s142_s1 = inlined_call_operand.vmem [shape: bf16[32,64], index: 1, kind: input, shape index: {}]   ;;  %s143_s0 = inlined_call_operand.vmem [shape: bf16[8,32], index: 0, kind: input, shape index: {}]   ;;  %s144_s2 = inlined_call_operand.vmem [shape: f32[8,64], index: 2, kind: output, shape index: {}]  }
   0x1   :  { %17 = vst.msk [vmem:[#allocation2] sm:$0xff] %vm16_vm0, %v110_v0  ;;  %98 = vmatprep.subr.bf16.mxu0 %v110_v0  ;;  %v108_v1 = vld [vmem:[%s142_s1] sm:$0xff]   ;;  %102 = vmatprep.mubr.msk.bf16.mxu0 %vm111_vm1, %v110_v0  ;;  %v109_v2 = vld [vmem:[%s142_s1 + $0x8] sm:$0xff]  }
   0x2   :  { %99 = vmatpush3.bf16.msra.mxu0 %v108_v1  ;;  %v19_v3 = vld [vmem:[%s143_s0] sm:$0xf] }
   0x3   :  { %100 = vmatprep.subr.bf16.mxu0 %v110_v0 }
   0x6   :  { %101 = vmatpush3.bf16.msra.mxu0 %v109_v2 }
   0x8   :  { %v18_v4 = vld [vmem:[#allocation2] sm:$0xff] }
   0x9   :  { %103 = vmatmul.mubr.msk.bf16.vlgmr.msra.gmra.mrb[0].mxu0 %vm36_vm2, %v19_v3 }
  0xdc   :  { %v74_v5 = vpop.f32.mrb[0].mxu0 }
  0xdd   :  { %v80_v6 = vadd.f32 %v74_v5, %v18_v4  ;;  %v104_v7 = vpop.f32.mrb[1].mxu0 }
  0xde   :  { %v77_v8 = vpop.f32.mrb[2].mxu0 }
  0xdf   :  { %82 = vst.msk [vmem:[#allocation2] sm:$0xff] %vm16_vm0, %v80_v6  ;;  %v105_v9 = vpop.f32.mrb[3].mxu0 }
  0xe6   :  { %v86_v10 = vld [vmem:[#allocation2] sm:$0xff] }
  0xe7   :  { %87 = vst.msk [vmem:[%s144_s2] sm:$0xff] %vm16_vm0, %v86_v10 }

// kernel: body.341
= control target key start
LH: loop header
LB: loop body
LE: loop exit
PB: predicated region body
PF: predicated region fallthrough
CT: control target
= control target key end

     0   :  { %vm19_vm0 = vcmask 523264   ;;  %v304_v1 = vmov 0.0   ;;  %vm56_vm1 = vcmask 261120   ;;  %vm237_vm2 = vcmask 519168   ;;  %s368_s1 = inlined_call_operand.vmem [shape: bf16[32,64], index: 1, kind: input, shape index: {}]   ;;  %s369_s0 = inlined_call_operand.vmem [shape: bf16[24,32], index: 0, kind: input, shape index: {}]   ;;  %s370_s2 = inlined_call_operand.vmem [shape: bf16[32,64], index: 2, kind: input, shape index: {}]   ;;  %s371_s3 = inlined_call_operand.vmem [shape: bf16[24,64], index: 3, kind: output, shape index: {}]  }
   0x1   :  { %v286_v0 = vld [vmem:[%s368_s1] sm:$0xff]   ;;  %22 = vst.msk [vmem:[#allocation2 + $0x10] sm:$0xff] %vm19_vm0, %v304_v1  ;;  %20 = vst.msk [vmem:[#allocation2] sm:$0xff] %vm19_vm0, %v304_v1  ;;  %v287_v2 = vld [vmem:[%s368_s1 + $0x8] sm:$0xff]  }
   0x2   :  { %21 = vst.msk [vmem:[#allocation2 + $0x8] sm:$0xff] %vm19_vm0, %v304_v1  ;;  %23 = vst.msk [vmem:[#allocation3] sm:$0xff] %vm19_vm0, %v304_v1  ;;  %269 = vmatprep.subr.bf16.mxu0 %v286_v0  ;;  %v288_v3 = vld [vmem:[%s369_s0] sm:$0xff]   ;;  %v291_v5 = vld [vmem:[%s370_s2 + $0x8] sm:$0xff]  }
   0x3   :  { %24 = vst.msk [vmem:[#allocation3 + $0x8] sm:$0xff] %vm19_vm0, %v304_v1  ;;  %25 = vst.msk [vmem:[#allocation3 + $0x10] sm:$0xff] %vm19_vm0, %v304_v1  ;;  %270 = vmatpush3.bf16.msra.mxu0 %v286_v0  ;;  %v290_v4 = vld [vmem:[%s370_s2] sm:$0xff]   ;;  %273 = vmatprep.mubr.msk.bf16.mxu0 %vm56_vm1, %v288_v3  ;;  %v289_v6 = vld [vmem:[%s369_s0 + $0x8] ss:$0 sps:$4 sm:$0xff]  }
   0x4   :  { %271 = vmatprep.subr.bf16.mxu0 %v287_v2  ;;  %281 = vmatprep.mubr.msk.bf16.mxu1 %vm56_vm1, %v288_v3 }
   0x5   :  { %277 = vmatprep.subr.bf16.mxu1 %v290_v4 }
   0x6   :  { %278 = vmatpush3.bf16.msra.mxu1 %v290_v4 }
   0x7   :  { %272 = vmatpush3.bf16.msra.mxu0 %v287_v2  ;;  %279 = vmatprep.subr.bf16.mxu1 %v291_v5 }
   0x8   :  { %v31_v7 = vld [vmem:[#allocation2 + $0x10] sm:$0xff]  ;;  %v29_v8 = vld [vmem:[#allocation2] sm:$0xff] }
   0x9   :  { %v30_v12 = vld [vmem:[#allocation2 + $0x8] sm:$0xff]  ;;  %v118_v17 = vld [vmem:[#allocation3] sm:$0xff] }
   0xa   :  { %274 = vmatmul.mubr.msk.bf16.vlgmr.msra.gmra.mrb[0].mxu0 %vm56_vm1, %v289_v6  ;;  %280 = vmatpush3.bf16.msra.mxu1 %v291_v5  ;;  %v120_v15 = vld [vmem:[#allocation3 + $0x10] sm:$0xff]  ;;  %v119_v22 = vld [vmem:[#allocation3 + $0x8] sm:$0xff] }
   0xd   :  { %282 = vmatmul.mubr.msk.bf16.vlgmr.msra.gmra.mrb[0].mxu1 %vm56_vm1, %v289_v6 }
  0xdd   :  { %v275_v9 = vpop.f32.mrb[0].mxu0 }
  0xde   :  { %v113_v10 = vadd.f32 %v275_v9, %v31_v7  ;;  %v97_v11 = vpop.f32.mrb[1].mxu0 }
  0xdf   :  { %v111_v13 = vadd.f32 %v97_v11, %v29_v8  ;;  %v276_v14 = vpop.f32.mrb[2].mxu0 }
  0xe0   :  { %117 = vst.msk [vmem:[#allocation2 + $0x10] sm:$0xff] %vm19_vm0, %v113_v10  ;;  %v100_v16 = vpop.f32.mrb[3].mxu0  ;;  %v283_v19 = vpop.f32.mrb[0].mxu1 }
  0xe1   :  { %115 = vst.msk [vmem:[#allocation2] sm:$0xff] %vm19_vm0, %v111_v13  ;;  %v112_v18 = vadd.f32 %v100_v16, %v30_v12  ;;  %v187_v20 = vadd.f32 %v283_v19, %v120_v15  ;;  %v171_v21 = vpop.f32.mrb[1].mxu1 }
  0xe2   :  { %v185_v23 = vadd.f32 %v171_v21, %v118_v17  ;;  %v284_v24 = vpop.f32.mrb[2].mxu1 }
  0xe3   :  { %116 = vst.msk [vmem:[#allocation2 + $0x8] sm:$0xff] %vm19_vm0, %v112_v18  ;;  %190 = vst.msk [vmem:[#allocation3 + $0x10] sm:$0xff] %vm19_vm0, %v187_v20  ;;  %v174_v25 = vpop.f32.mrb[3].mxu1 }
  0xe4   :  { %188 = vst.msk [vmem:[#allocation3] sm:$0xff] %vm19_vm0, %v185_v23  ;;  %v186_v26 = vadd.f32 %v174_v25, %v119_v22 }
  0xe6   :  { %189 = vst.msk [vmem:[#allocation3 + $0x8] sm:$0xff] %vm19_vm0, %v186_v26 }
  0xe7   :  { %v196_v27 = vld [vmem:[#allocation2 + $0x10] sm:$0xff] }
  0xe8   :  { %v199_v28 = vsub.f32 0.0, %v196_v27  ;;  %v194_v29 = vld [vmem:[#allocation2] sm:$0xff] }
  0xe9   :  { %v197_v30 = vsub.f32 0.0, %v194_v29 }
  0xea   :  { %v204_v31 = vmul.f32 1.442695, %v199_v28  ;;  %v195_v32 = vld [vmem:[#allocation2 + $0x8] sm:$0xff] }
  0xeb   :  { %v200_v33 = vmul.f32 1.442695, %v197_v30  ;;  %v198_v34 = vsub.f32 0.0, %v195_v32  ;;  %v220_v43 = vld [vmem:[#allocation3 + $0x10] sm:$0xff]  ;;  %v218_v46 = vld [vmem:[#allocation3] sm:$0xff] }
  0xec   :  { %292 = vpow2.f32 %v204_v31 }
  0xed   :  { %294 = vpow2.f32 %v200_v33  ;;  %v202_v35 = vmul.f32 1.442695, %v198_v34  ;;  %v219_v53 = vld [vmem:[#allocation3 + $0x8] sm:$0xff] }
  0xef   :  { %296 = vpow2.f32 %v202_v35 }
  0xf6   :  { %v293_v36 = vpop.eup %292 }
  0xf7   :  { %v295_v37 = vpop.eup %294  ;;  %v208_v38 = vadd.f32 1.0, %v293_v36 }
  0xf8   :  { %v206_v39 = vadd.f32 1.0, %v295_v37 }
  0xf9   :  { %v297_v40 = vpop.eup %296  ;;  %298 = vrcp.f32 %v208_v38 }
  0xfa   :  { %300 = vrcp.f32 %v206_v39  ;;  %v207_v41 = vadd.f32 1.0, %v297_v40 }
  0xfc   :  { %302 = vrcp.f32 %v207_v41 }
 0x103   :  { %v299_v42 = vpop.eup %298 }
 0x104   :  { %v301_v44 = vpop.eup %300  ;;  %v217_v45 = vmul.f32 %v299_v42, %v196_v27 }
 0x105   :  { %v215_v47 = vmul.f32 %v301_v44, %v194_v29 }
 0x106   :  { %v303_v48 = vpop.eup %302  ;;  %v223_v49 = vmul.f32 %v220_v43, %v217_v45 }
 0x107   :  { %v216_v50 = vmul.f32 %v303_v48, %v195_v32  ;;  %v221_v51 = vmul.f32 %v218_v46, %v215_v47 }
 0x108   :  { %v260_v52 = vpack.c.bf16 %v223_v49, %v223_v49 }
 0x109   :  { %v258_v54 = vpack.c.bf16 %v221_v51, %v221_v51  ;;  %v222_v55 = vmul.f32 %v219_v53, %v216_v50 }
 0x10a   :  { %240 = vst.msk [vmem:[%s371_s3 + $0x8] sm:$0xf] %vm237_vm2, %v260_v52 }
 0x10b   :  { %238 = vst.msk [vmem:[%s371_s3] sm:$0xf] %vm237_vm2, %v258_v54  ;;  %v259_v56 = vpack.c.bf16 %v222_v55, %v222_v55 }
 0x10d   :  { %239 = vst.msk [vmem:[%s371_s3 + $0x4] sm:$0xf] %vm237_vm2, %v259_v56 }

// kernel: tile.62
= control target key start
LH: loop header
LB: loop body
LE: loop exit
PB: predicated region body
PF: predicated region fallthrough
CT: control target
= control target key end

     0   :  { %vm21_vm0 = vcmask 31744   ;;  %s56_s14 = smov 4   ;;  %s57_s15 = smov 8   ;;  %vm27_vm1 = vcmask 130144   ;;  %vm33_vm2 = vcmask 97344   ;;  %vm39_vm3 = vcmask 64544   ;;  %s83_s0 = inlined_call_operand.vmem [shape: f32[4,4,4], index: 0, kind: input, shape index: {}]   ;;  %s84_s1 = inlined_call_operand.vmem [shape: f32[4,16], index: 1, kind: output, shape index: {}]  }
   0x1   :  { %v49_v0 = vld [vmem:[%s83_s0 + $0xc] sm:$0xf]  ;;  %v50_v1 = vld [vmem:[%s83_s0 + $0x8] sm:$0xf]  ;;  %v51_v2 = vld [vmem:[%s83_s0 + $0x4] sm:$0xf] }
   0x2   :  { %8 = vst [vmem:[#allocation1 + $0x18] sm:$0xf] %v49_v0  ;;  %13 = vst [vmem:[#allocation1 + $0x10] sm:$0xf] %v50_v1  ;;  %v18_v3 = vld [vmem:[%s83_s0] sm:$0xf] }
   0x3   :  { %17 = vst [vmem:[#allocation1 + $0x8] sm:$0xf] %v51_v2  ;;  %19 = vst [vmem:[#allocation1] sm:$0xf] %v18_v3  ;;  %s55_s0 = smov 12  }
   0xa   :  { %v24_v4 = vld [vmem:[#allocation1 + $0x3] ss:$8 sm:$0xf]   ;;  %v36_v5 = vld [vmem:[#allocation1 + $0x1] ss:$8 sm:$0xf]  }
   0xb   :  { %25 = vrot.lane.b32.xlu0 %v24_v4, %s55_s0  ;;  %v20_v6 = vld [vmem:[#allocation1] ss:$8 sm:$0xf]   ;;  %v30_v7 = vld [vmem:[#allocation1 + $0x2] ss:$8 sm:$0xf]   ;;  %37 = vrot.lane.b32.xlu1 %v36_v5, %s56_s14 }
   0xc   :  { %22 = vst.msk [vmem:[#allocation0] sm:$0xf] %vm21_vm0, %v20_v6  }
   0xf   :  { %31 = vrot.lane.b32.xlu0 %v30_v7, %s57_s15 }
  0x7d   :  { %v26_v8 = vpop.permute.xlu0 %25   ;;  %v38_v9 = vpop.permute.xlu1 %37  }
  0x7e   :  { %28 = vst.msk [vmem:[#allocation0] sm:$0xf] %vm27_vm1, %v26_v8  }
  0x81   :  { %v32_v10 = vpop.permute.xlu0 %31  }
  0x82   :  { %34 = vst.msk [vmem:[#allocation0] sm:$0xf] %vm33_vm2, %v32_v10  }
  0x83   :  { %40 = vst.msk [vmem:[#allocation0] sm:$0xf] %vm39_vm3, %v38_v9  }
  0x8a   :  { %v44_v11 = vld [vmem:[#allocation0] sm:$0xf] }
  0x8b   :  { %46 = vst [vmem:[%s84_s1] sm:$0xf] %v44_v11 }

// kernel: body.353
= control target key start
LH: loop header
LB: loop body
LE: loop exit
PB: predicated region body
PF: predicated region fallthrough
CT: control target
= control target key end

     0   :  { %s527_s9 = smov 0   ;;  %s529_s10 = smov 0   ;;  %s566_s0 = inlined_call_operand.vmem [shape: bf16[8,32], index: 0, kind: input, shape index: {}]   ;;  %s567_s1 = inlined_call_operand.vmem [shape: bf16[3,32,32], index: 1, kind: input, shape index: {}]   ;;  %s568_s2 = inlined_call_operand.vmem [shape: bf16[3,8,32], index: 2, kind: output, shape index: {}]  }
   0x1   :  { %s531_s11 = smov 0  }
   0x2 LB: > { %s38_s12 = sadd.s32 1, %s504_s10  ;;  %p437_p0 = scmp.ge.s32.totalorder %s508_s11, 1  ;;  %s508_s11 = sphi %s531_s11, %s12_s11   ;;  %s504_s10 = sphi %s529_s10, %s570_s10   ;;  %s500_s9 = sphi %s527_s9, %s569_s9  }
   0x3   : > { %p40_p1 = scmp.ge.s32.totalorder %s38_s12, 3  ;;  %p168_p2 = scmp.lt.s32.totalorder %s508_s11, 4 }
   0x5   : > { %s572_s12 = smov (%p40_p1, %s38_s12), 0  ;;  %p169_p3 = pnand %p437_p0, %p168_p2 }
   0x6   : > { %p217_p4 = scmp.lt.s32.totalorder (!%p169_p3), %s500_s9, 2  ;;  %vm244_vm0 = vcmask (!%p169_p3), 261120   ;;  %v510_v0 = vmov (!%p169_p3), 0.0   ;;  %vm511_vm1 = vmmov (!%p169_p3), 0   ;;  %v247_v3 = vld [vmem:[%s566_s0] sm:$0xf] (!%p169_p3) }
   0x7   : > { %172 = sbr.rel (%p169_p3) target bundleno = 250 (0xfa), region = 28  ;;  %450 = vmatprep.subr.bf16.mxu0 (!%p169_p3), %v510_v0  ;;  %454 = vmatprep.mubr.msk.bf16.mxu0 (!%p169_p3), %vm511_vm1, %v510_v0  ;;  %245 = vst.msk [vmem:[#allocation2] sm:$0xff] (!%p169_p3), %vm244_vm0, %v510_v0  ;;  %vm315_vm2 = vcmask (!%p169_p3), 257024  }
   0xe   : > { %s574_s9 = smov (!%p217_p4, %s500_s9), 2  ;;  %v246_v4 = vld [vmem:[#allocation2] sm:$0xff] }
   0xf   : > { %s446_s13 = sshll.u32 %s574_s9, 4  ;;  %s440_s19 = sshll.u32 %s574_s9, 2 }
  0x10   : > { %s227_s16 = scalar_lea.vmem %s567_s1, %s446_s13  ;;  %s238_s22 = scalar_lea.vmem %s568_s2, %s440_s19 }
  0x11   : > { %v484_v1 = vld [vmem:[%s227_s16] sm:$0xff]   ;;  %v485_v2 = vld [vmem:[%s227_s16 + $0x8] sm:$0xff]  }
  0x12   : > { %451 = vmatpush3.bf16.msra.mxu0 %v484_v1 }
  0x13   : > { %452 = vmatprep.subr.bf16.mxu0 %v510_v0 }
  0x16   : > { %453 = vmatpush3.bf16.msra.mxu0 %v485_v2 }
  0x19   : > { %455 = vmatmul.mubr.msk.bf16.vlgmr.msra.gmra.mrb[0].mxu0 %vm244_vm0, %v247_v3 }
  0xec   : > { %v302_v5 = vpop.f32.mrb[0].mxu0 }
  0xed   : > { %v308_v6 = vadd.f32 %v302_v5, %v246_v4  ;;  %v456_v7 = vpop.f32.mrb[1].mxu0 }
  0xee   : > { %v305_v8 = vpop.f32.mrb[2].mxu0 }
  0xef   : > { %309 = vst.msk [vmem:[#allocation2] sm:$0xff] %vm244_vm0, %v308_v6  ;;  %v457_v9 = vpop.f32.mrb[3].mxu0 }
  0xf6   : > { %v313_v10 = vld [vmem:[#allocation2] sm:$0xff] }
  0xf7   : > { %v314_v11 = vpack.c.bf16 %v313_v10, %v313_v10 }
  0xf9   : > { %316 = vst.msk [vmem:[%s238_s22] sm:$0xf] %vm315_vm2, %v314_v11 }
  0xfa PF: > { %s12_s11 = sadd.s32 1, %s508_s11   ;;  %s569_s9 = smov %s504_s10 }
  0xfb   : > { %p9_p5 = scmp.ge.s32.totalorder %s12_s11, 5   ;;  %s570_s10 = smov %s572_s12 }
  0xfd   :  { %11 = sbr.rel (!%p9_p5) target bundleno = 2 (0x2), region = 69 }

// kernel: body.352
= control target key start
LH: loop header
LB: loop body
LE: loop exit
PB: predicated region body
PF: predicated region fallthrough
CT: control target
= control target key end

     0   :  { %vm14_vm0 = vcmask 261120   ;;  %vm32_vm1 = vcmask 257024   ;;  %s65_s0 = inlined_call_operand.vmem [shape: bf16[8,32], index: 0, kind: input, shape index: {}]   ;;  %s66_s1 = inlined_call_operand.vmem [shape: f32[1,32], index: 1, kind: input, shape index: {}]   ;;  %s67_s2 = inlined_call_operand.vmem [shape: bf16[8,32], index: 2, kind: output, shape index: {}]  }
   0x1   :  { %v11_v0 = vld [vmem:[%s65_s0] sm:$0xf] }
   0x2   :  { %v12_v1 = vunpack.c.l.bf16 %v11_v0  ;;  %v38_v8 = vld [vmem:[%s66_s1] ss:$0 sm:$0xff] }
   0x4   :  { %v13_v2 = vmul.f32 %v12_v1, %v12_v1 }
   0x6   :  { %v15_v3 = vsel %vm14_vm0, %v13_v2, 0.0 }
   0x7   :  { %16 = vadd.xlane.f32.xlu0 %v15_v3 }
  0x94   :  { %v17_v4 = vpop.xlane.xlu0 %16 }
  0x95   :  { %v19_v5 = vmul.f32 0.03125, %v17_v4 }
  0x97   :  { %v20_v6 = vadd.f32 1e-06, %v19_v5 }
  0x99   :  { %39 = vrsqrt.f32 %v20_v6 }
  0xa3   :  { %v40_v7 = vpop.eup %39 }
  0xa4   :  { %v22_v9 = vmul.f32 %v40_v7, %v12_v1 }
  0xa6   :  { %v30_v10 = vmul.f32 %v38_v8, %v22_v9 }
  0xa8   :  { %v31_v11 = vpack.c.bf16 %v30_v10, %v30_v10 }
  0xaa   :  { %33 = vst.msk [vmem:[%s67_s2] sm:$0xf] %vm32_vm1, %v31_v11 }

// kernel: body.355
= control target key start
LH: loop header
LB: loop body
LE: loop exit
PB: predicated region body
PF: predicated region fallthrough
CT: control target
= control target key end

     0   :  { %vm16_vm0 = vcmask 261120   ;;  %v111_v0 = vmov 0.0   ;;  %vm112_vm1 = vmmov 0   ;;  %vm87_vm2 = vcmask 257024   ;;  %s143_s1 = inlined_call_operand.vmem [shape: bf16[32,32], index: 1, kind: input, shape index: {}]   ;;  %s144_s0 = inlined_call_operand.vmem [shape: bf16[8,32], index: 0, kind: input, shape index: {}]   ;;  %s145_s2 = inlined_call_operand.vmem [shape: bf16[8,32], index: 2, kind: output, shape index: {}]  }
   0x1   :  { %99 = vmatprep.subr.bf16.mxu0 %v111_v0  ;;  %v109_v1 = vld [vmem:[%s143_s1] sm:$0xff]   ;;  %103 = vmatprep.mubr.msk.bf16.mxu0 %vm112_vm1, %v111_v0  ;;  %17 = vst.msk [vmem:[#allocation2] sm:$0xff] %vm16_vm0, %v111_v0  ;;  %v110_v2 = vld [vmem:[%s143_s1 + $0x8] sm:$0xff]  }
   0x2   :  { %100 = vmatpush3.bf16.msra.mxu0 %v109_v1  ;;  %v19_v3 = vld [vmem:[%s144_s0] sm:$0xf] }
   0x3   :  { %101 = vmatprep.subr.bf16.mxu0 %v111_v0 }
   0x6   :  { %102 = vmatpush3.bf16.msra.mxu0 %v110_v2 }
   0x8   :  { %v18_v4 = vld [vmem:[#allocation2] sm:$0xff] }
   0x9   :  { %104 = vmatmul.mubr.msk.bf16.vlgmr.msra.gmra.mrb[0].mxu0 %vm16_vm0, %v19_v3 }
  0xdc   :  { %v74_v5 = vpop.f32.mrb[0].mxu0 }
  0xdd   :  { %v80_v6 = vadd.f32 %v74_v5, %v18_v4  ;;  %v105_v7 = vpop.f32.mrb[1].mxu0 }
  0xde   :  { %v77_v8 = vpop.f32.mrb[2].mxu0 }
  0xdf   :  { %81 = vst.msk [vmem:[#allocation2] sm:$0xff] %vm16_vm0, %v80_v6  ;;  %v106_v9 = vpop.f32.mrb[3].mxu0 }
  0xe6   :  { %v85_v10 = vld [vmem:[#allocation2] sm:$0xff] }
  0xe7   :  { %v86_v11 = vpack.c.bf16 %v85_v10, %v85_v10 }
  0xe9   :  { %88 = vst.msk [vmem:[%s145_s2] sm:$0xf] %vm87_vm2, %v86_v11 }

// kernel: body.358
= control target key start
LH: loop header
LB: loop body
LE: loop exit
PB: predicated region body
PF: predicated region fallthrough
CT: control target
= control target key end

     0   :  { %vm16_vm0 = vcmask 261120   ;;  %v138_v0 = vmov 0.0   ;;  %vm139_vm1 = vmmov 0   ;;  %vm52_vm2 = vcmask 523264   ;;  %s175_s1 = inlined_call_operand.vmem [shape: bf16[64,32], index: 1, kind: input, shape index: {}]   ;;  %s176_s0 = inlined_call_operand.vmem [shape: bf16[8,64], index: 0, kind: input, shape index: {}]   ;;  %s177_s2 = inlined_call_operand.vmem [shape: bf16[8,32], index: 2, kind: output, shape index: {}]  }
   0x1   :  { %120 = vmatprep.subr.bf16.mxu0 %v138_v0  ;;  %v134_v1 = vld [vmem:[%s175_s1] sm:$0xff]   ;;  %128 = vmatprep.mubr.msk.bf16.mxu0 %vm139_vm1, %v138_v0  ;;  %17 = vst.msk [vmem:[#allocation2] sm:$0xff] %vm16_vm0, %v138_v0  ;;  %v135_v2 = vld [vmem:[%s175_s1 + $0x8] sm:$0xff]   ;;  %v136_v3 = vld [vmem:[%s175_s1 + $0x10] sm:$0xff]   ;;  %vm104_vm3 = vcmask 257024  }
   0x2   :  { %121 = vmatpush3.bf16.msra.mxu0 %v134_v1  ;;  %v137_v4 = vld [vmem:[%s175_s1 + $0x18] sm:$0xff]   ;;  %v19_v5 = vld [vmem:[%s176_s0] sm:$0xf] }
   0x3   :  { %122 = vmatprep.subr.bf16.mxu0 %v138_v0 }
   0x6   :  { %123 = vmatpush3.bf16.msra.mxu0 %v135_v2 }
   0x7   :  { %124 = vmatprep.subr.bf16.mxu0 %v138_v0 }
   0x8   :  { %v18_v6 = vld [vmem:[#allocation2] sm:$0xff] }
   0xa   :  { %125 = vmatpush3.bf16.msra.mxu0 %v136_v3 }
   0xb   :  { %126 = vmatprep.subr.bf16.mxu0 %v138_v0 }
   0xe   :  { %127 = vmatpush3.bf16.msra.mxu0 %v137_v4 }
  0x11   :  { %129 = vmatmul.mubr.msk.bf16.vlgmr.msra.gmra.mrb[0].mxu0 %vm52_vm2, %v19_v5 }
  0xe4   :  { %v90_v7 = vpop.f32.mrb[0].mxu0 }
  0xe5   :  { %v96_v8 = vadd.f32 %v90_v7, %v18_v6  ;;  %v130_v9 = vpop.f32.mrb[1].mxu0 }
  0xe6   :  { %v93_v10 = vpop.f32.mrb[2].mxu0 }
  0xe7   :  { %98 = vst.msk [vmem:[#allocation2] sm:$0xff] %vm16_vm0, %v96_v8  ;;  %v131_v11 = vpop.f32.mrb[3].mxu0 }
  0xee   :  { %v102_v12 = vld [vmem:[#allocation2] sm:$0xff] }
  0xef   :  { %v103_v13 = vpack.c.bf16 %v102_v12, %v102_v12 }
  0xf1   :  { %105 = vst.msk [vmem:[%s177_s2] sm:$0xf] %vm104_vm3, %v103_v13 }

// kernel: body.357
= control target key start
LH: loop header
LB: loop body
LE: loop exit
PB: predicated region body
PF: predicated region fallthrough
CT: control target
= control target key end

     0   :  { %vm19_vm0 = vcmask 523264   ;;  %v204_v0 = vmov 0.0   ;;  %vm205_vm1 = vmmov 0   ;;  %vm40_vm2 = vcmask 261120   ;;  %s248_s1 = inlined_call_operand.vmem [shape: bf16[32,64], index: 1, kind: input, shape index: {}]   ;;  %s249_s2 = inlined_call_operand.vmem [shape: bf16[32,64], index: 2, kind: input, shape index: {}]   ;;  %s250_s0 = inlined_call_operand.vmem [shape: bf16[8,32], index: 0, kind: input, shape index: {}]   ;;  %s251_s3 = inlined_call_operand.vmem [shape: bf16[8,64], index: 3, kind: output, shape index: {}]  }
   0x1   :  { %178 = vmatprep.subr.bf16.mxu0 %v204_v0  ;;  %v196_v1 = vld [vmem:[%s248_s1] sm:$0xff]   ;;  %182 = vmatprep.mubr.msk.bf16.mxu0 %vm205_vm1, %v204_v0  ;;  %20 = vst.msk [vmem:[#allocation2] sm:$0xff] %vm19_vm0, %v204_v0  ;;  %21 = vst.msk [vmem:[#allocation3] sm:$0xff] %vm19_vm0, %v204_v0  ;;  %v197_v2 = vld [vmem:[%s248_s1 + $0x8] sm:$0xff]   ;;  %vm160_vm3 = vcmask 519168  }
   0x2   :  { %186 = vmatprep.subr.bf16.mxu1 %v204_v0  ;;  %190 = vmatprep.mubr.msk.bf16.mxu1 %vm205_vm1, %v204_v0  ;;  %v198_v3 = vld [vmem:[%s249_s2] sm:$0xff]   ;;  %v199_v4 = vld [vmem:[%s249_s2 + $0x8] sm:$0xff]  }
   0x3   :  { %179 = vmatpush3.bf16.msra.mxu0 %v196_v1  ;;  %187 = vmatpush3.bf16.msra.mxu1 %v198_v3  ;;  %v22_v5 = vld [vmem:[%s250_s0] sm:$0xf] }
   0x4   :  { %180 = vmatprep.subr.bf16.mxu0 %v204_v0  ;;  %188 = vmatprep.subr.bf16.mxu1 %v204_v0 }
   0x7   :  { %181 = vmatpush3.bf16.msra.mxu0 %v197_v2  ;;  %189 = vmatpush3.bf16.msra.mxu1 %v199_v4 }
   0x8   :  { %v23_v6 = vld [vmem:[#allocation2] sm:$0xff]  ;;  %v87_v10 = vld [vmem:[#allocation3] sm:$0xff] }
   0xa   :  { %183 = vmatmul.mubr.msk.bf16.vlgmr.msra.gmra.mrb[0].mxu0 %vm40_vm2, %v22_v5  ;;  %191 = vmatmul.mubr.msk.bf16.vlgmr.msra.gmra.mrb[0].mxu1 %vm40_vm2, %v22_v5 }
  0xdd   :  { %v78_v7 = vpop.f32.mrb[0].mxu0  ;;  %v138_v13 = vpop.f32.mrb[0].mxu1 }
  0xde   :  { %v84_v8 = vadd.f32 %v78_v7, %v23_v6  ;;  %v184_v9 = vpop.f32.mrb[1].mxu0  ;;  %v144_v14 = vadd.f32 %v138_v13, %v87_v10  ;;  %v192_v15 = vpop.f32.mrb[1].mxu1 }
  0xdf   :  { %v81_v11 = vpop.f32.mrb[2].mxu0  ;;  %v141_v16 = vpop.f32.mrb[2].mxu1 }
  0xe0   :  { %86 = vst.msk [vmem:[#allocation2] sm:$0xff] %vm19_vm0, %v84_v8  ;;  %v185_v12 = vpop.f32.mrb[3].mxu0  ;;  %145 = vst.msk [vmem:[#allocation3] sm:$0xff] %vm19_vm0, %v144_v14  ;;  %v193_v17 = vpop.f32.mrb[3].mxu1 }
  0xe7   :  { %v149_v18 = vld [vmem:[#allocation2] sm:$0xff]  ;;  %v157_v24 = vld [vmem:[#allocation3] sm:$0xff] }
  0xe8   :  { %v150_v19 = vsub.f32 0.0, %v149_v18 }
  0xea   :  { %v151_v20 = vmul.f32 1.442695, %v150_v19 }
  0xec   :  { %200 = vpow2.f32 %v151_v20 }
  0xf6   :  { %v201_v21 = vpop.eup %200 }
  0xf7   :  { %v153_v22 = vadd.f32 1.0, %v201_v21 }
  0xf9   :  { %202 = vrcp.f32 %v153_v22 }
 0x103   :  { %v203_v23 = vpop.eup %202 }
 0x104   :  { %v156_v25 = vmul.f32 %v203_v23, %v149_v18 }
 0x106   :  { %v158_v26 = vmul.f32 %v157_v24, %v156_v25 }
 0x108   :  { %v159_v27 = vpack.c.bf16 %v158_v26, %v158_v26 }
 0x10a   :  { %161 = vst.msk [vmem:[%s251_s3] sm:$0xf] %vm160_vm3, %v159_v27 }

// kernel: body.354
= control target key start
LH: loop header
LB: loop body
LE: loop exit
PB: predicated region body
PF: predicated region fallthrough
CT: control target
= control target key end

     0   :  { %s1921_s27 = smov 0   ;;  %s1923_s28 = smov 0   ;;  %s2260_s0 = inlined_call_operand.vmem [shape: s32[2,1,4], index: 0, kind: input, shape index: {}]   ;;  %s2261_s1 = inlined_call_operand.vmem [shape: f32[4,16], index: 1, kind: input, shape index: {}]   ;;  %s2262_s2 = inlined_call_operand.vmem [shape: f32[4,16], index: 2, kind: input, shape index: {}]   ;;  %s2263_s3 = inlined_call_operand.vmem [shape: f32[4,16], index: 3, kind: input, shape index: {}]   ;;  %s2264_s4 = inlined_call_operand.vmem [shape: f32[4,16], index: 4, kind: input, shape index: {}]   ;;  %s2265_s5 = inlined_call_operand.vmem [shape: bf16[3,2,4,32], index: 5, kind: input, shape index: {}, may-alias: {5,6,7}]   ;;  %s2266_s6 = inlined_call_operand.vmem [shape: bf16[3,2,4,32], index: 6, kind: input, shape index: {}, may-alias: {5,6,7}]   ;;  %s2267_s7 = inlined_call_operand.vmem [shape: bf16[3,2,4,32], index: 7, kind: input, shape index: {}, may-alias: {5,6,7}]   ;;  %s2268_s8 = inlined_call_operand.vmem [shape: bf16[2,4,32], index: 8, kind: output, shape index: {}]  }
   0x1   :  { %s1925_s29 = smov 0  }
   0x2 LB: > { %s37_s30 = sadd.s32 1, %s1850_s28  ;;  %p1633_p0 = scmp.ge.s32.totalorder %s1854_s29, 1  ;;  %s1854_s29 = sphi %s1925_s29, %s18_s29   ;;  %s1850_s28 = sphi %s1923_s28, %s2270_s28   ;;  %s1846_s27 = sphi %s1921_s27, %s2269_s27  }
   0x3   : > { %p39_p1 = scmp.ge.s32.totalorder %s37_s30, 2  ;;  %p366_p2 = scmp.lt.s32.totalorder %s1854_s29, 3 }
   0x5   : > { %s2272_s30 = smov (%p39_p1, %s37_s30), 0  ;;  %p367_p3 = pnand %p1633_p0, %p366_p2 }
   0x6   : > { %v1942_v0 = vld [vmem:[%s2263_s3] sm:$0xf] (!%p367_p3)  ;;  %p442_p4 = scmp.lt.s32.totalorder (!%p367_p3), %s1846_s27, 1  ;;  %s1856_s13 = smov (!%p367_p3), 4   ;;  %v1857_v10 = vmov (!%p367_p3), 0.0   ;;  %vm1858_vm0 = vmmov (!%p367_p3), 0   ;;  %v662_v45 = vlaneseq (!%p367_p3) }
   0x7   : > { %370 = sbr.rel (%p367_p3) target bundleno = 2253 (0x8cd), region = 52  ;;  %v1947_v1 = vld [vmem:[%s2261_s1] sm:$0xf] (!%p367_p3)  ;;  %551 = vrot.lane.b32.xlu0 (!%p367_p3), %v1942_v0, %s1856_s13  ;;  %1678 = vmatprep.subr.bf16.mxu0 (!%p367_p3), %v1857_v10  ;;  %s1859_s25 = smov (!%p367_p3), 124   ;;  %vm568_vm1 = vcmask (!%p367_p3), 31744   ;;  %v1862_v43 = vmov (!%p367_p3), 0  }
   0x8   : > { %527 = vrot.lane.b32.xlu1 (!%p367_p3), %v1947_v1, %s1856_s13  ;;  %v1965_v2 = vld [vmem:[%s2264_s4] sm:$0xf] (!%p367_p3)  ;;  %1690 = vmatprep.subr.bf16.mxu1 (!%p367_p3), %v1857_v10  ;;  %s1860_s26 = smov (!%p367_p3), 8   ;;  %s1861_s9 = smov (!%p367_p3), 12   ;;  %vm499_vm2 = vcmask (!%p367_p3), 257024   ;;  %v1863_v44 = vmov (!%p367_p3), -inf  }
   0x9   : > { %v1974_v5 = vld [vmem:[%s2262_s2] sm:$0xf] (!%p367_p3)  ;;  %1680 = vmatprep.mubr.msk.bf16.mxu0 (!%p367_p3), %vm1858_vm0, %v1857_v10  ;;  %1692 = vmatprep.mubr.msk.bf16.mxu1 (!%p367_p3), %vm1858_vm0, %v1857_v10  ;;  %500 = vst.msk [vmem:[#allocation2] sm:$0xf] (!%p367_p3), %vm499_vm2, %v1863_v44  ;;  %501 = vst.msk [vmem:[#allocation3] sm:$0xf] (!%p367_p3), %vm499_vm2, %v1857_v10 }
   0xa   : > { %1810 = vset.pattern.permute.xlu1 (!%p367_p3), %v1862_v43  ;;  %502 = vst.msk [vmem:[#allocation4] sm:$0xf] (!%p367_p3), %vm499_vm2, %v1857_v10  ;;  %v2058_v47 = vshrl.u32 (!%p367_p3), %v662_v45, 7  ;;  %vm669_vm5 = vcmask (!%p367_p3), 27648   ;;  %s1865_s15 = smov (!%p367_p3), 120   ;;  %s1866_s16 = smov (!%p367_p3), 108  }
   0xb   : > { %vm691_vm6 = vcmask (!%p367_p3), 60416   ;;  %vm699_vm7 = vcmask (!%p367_p3), 1041408   ;;  %s1868_s21 = smov (!%p367_p3), 16   ;;  %vm911_vm8 = vcmask (!%p367_p3), 126016   ;;  %vm1144_vm9 = vcmask (!%p367_p3), 191616   ;;  %s1875_s23 = smov (!%p367_p3), 24  }
   0xc   : > { %v664_v48 = vsub.s32 (!%p367_p3), 0, %v2058_v47  ;;  %vm1369_vm10 = vcmask (!%p367_p3), 257216   ;;  %vm1437_vm11 = vcmask (!%p367_p3), 254976  }
   0xe   : > { %s2274_s27 = smov (!%p442_p4, %s1846_s27), 1 }
   0xf   : > { %s1956_s14 = sshll.u32 %s2274_s27, 1  ;;  %s447_s12 = scalar_lea.vmem %s2260_s0, %s2274_s27 }
  0x10   : > { %s1524_s17 = scalar_lea.vmem %s2266_s6, %s1956_s14  ;;  %s470_s22 = scalar_lea.vmem %s2265_s5, %s1956_s14  ;;  %v512_v46 = vld [vmem:[%s447_s12] sm:$0x1] }
  0x11   : > { %v1638_v3 = vld [vmem:[%s1524_s17 + $0x4] sm:$0x3]  ;;  %v503_v4 = vld [vmem:[%s470_s22] sm:$0x3]  ;;  %vm513_vm3 = vcmp.gt.s32.totalorder %v512_v46, 0  ;;  %s1864_s27 = smov 116   ;;  %s1528_s20 = scalar_lea.vmem %s2267_s7, %s1956_s14 }
  0x12   : > { %v1976_v6 = vunpack.c.l.bf16 %v1638_v3  ;;  %v1978_v7 = vunpack.c.l.bf16 %v503_v4  ;;  %v661_v49 = vsel %vm513_vm3, 1, %v1862_v43  ;;  %s1867_s17 = smov 112   ;;  %s1873_s22 = smov 104  }
  0x13   : > { %v2061_v50 = vrot.slane %v661_v49, %v664_v48 }
  0x14   : > { %v555_v8 = vmul.f32 %v1965_v2, %v1976_v6  ;;  %v531_v9 = vmul.f32 %v1974_v5, %v1978_v7  ;;  %v538_v25 = vmul.f32 %v1942_v0, %v1976_v6  ;;  %v514_v34 = vmul.f32 %v1947_v1, %v1978_v7 }
  0x15   : > { %vm666_vm4 = vcmp.eq.s32.totalorder %v2061_v50, 1 }
  0x16   : > { %557 = vrot.lane.b32.xlu0 %v555_v8, %s1856_s13  ;;  %533 = vrot.lane.b32.xlu1 %v531_v9, %s1856_s13 }
  0x1a   : > { %540 = vrot.lane.b32.xlu0 %v1965_v2, %s1856_s13  ;;  %516 = vrot.lane.b32.xlu1 %v1974_v5, %s1856_s13 }
  0x79   : > { %v552_v11 = vpop.permute.xlu0 %551 }
  0x7a   : > { %v528_v12 = vpop.permute.xlu1 %527  ;;  %v1996_v14 = vmul.f32 %v552_v11, %v1976_v6 }
  0x7b   : > { %v1993_v13 = vmul.f32 %v528_v12, %v1978_v7 }
  0x88   : > { %v558_v15 = vpop.permute.xlu0 %557  ;;  %v534_v16 = vpop.permute.xlu1 %533 }
  0x89   : > { %v560_v17 = vadd.f32 %v558_v15, %v1996_v14  ;;  %v536_v18 = vadd.f32 %v534_v16, %v1993_v13 }
  0x8b   : > { %v561_v19 = vpack.c.bf16 %v560_v17, %v560_v17  ;;  %v537_v23 = vpack.c.bf16 %v536_v18, %v536_v18 }
  0x8c   : > { %v541_v20 = vpop.permute.xlu0 %540  ;;  %v517_v21 = vpop.permute.xlu1 %516 }
  0x8d   : > { %v543_v22 = vmul.f32 %v541_v20, %v1976_v6  ;;  %566 = vrot.lane.b32.xlu0 %v561_v19, %s1859_s25  ;;  %v519_v24 = vmul.f32 %v517_v21, %v1978_v7 }
  0x8f   : > { %545 = vrot.lane.b32.xlu1 %v543_v22, %s1859_s25 }
  0x91   : > { %563 = vrot.lane.b32.xlu0 %v537_v23, %s1859_s25 }
  0x93   : > { %521 = vrot.lane.b32.xlu1 %v519_v24, %s1859_s25 }
  0x95   : > { %765 = vrot.lane.b32.xlu0 %v1965_v2, %s1860_s26 }
  0x97   : > { %746 = vrot.lane.b32.xlu1 %v1974_v5, %s1860_s26 }
  0x9b   : > { %998 = vrot.lane.b32.xlu1 %v1965_v2, %s1861_s9 }
  0x9f   : > { %979 = vrot.lane.b32.xlu1 %v1974_v5, %s1861_s9 }
  0xa3   : > { %775 = vrot.lane.b32.xlu1 %v1942_v0, %s1860_s26 }
  0xa7   : > { %779 = vrot.lane.b32.xlu1 %v543_v22, %s1856_s13  ;;  %v2081_v22 = vld [vmem:[#allocation2] sm:$0xf] }
  0xab   : > { %756 = vrot.lane.b32.xlu1 %v1947_v1, %s1860_s26 }
  0xaf   : > { %760 = vrot.lane.b32.xlu1 %v519_v24, %s1856_s13 }
  0xff   : > { %v567_v26 = vpop.permute.xlu0 %566 }
 0x100   : > { %v573_v27 = vsel %vm568_vm1, %v567_v26, 0 }
 0x101   : > { %1679 = vmatpush3.bf16.xpose.msra.mxu0 %v573_v27  ;;  %v546_v28 = vpop.permute.xlu1 %545 }
 0x102   : > { %v548_v29 = vsub.f32 %v538_v25, %v546_v28  ;;  %1684 = vmatprep.subr.bf16.mxu0 %v1857_v10 }
 0x103   : > { %v564_v30 = vpop.permute.xlu0 %563 }
 0x104   : > { %v549_v31 = vpack.c.bf16 %v548_v29, %v548_v29 }
 0x105   : > { %v522_v36 = vpop.permute.xlu1 %521 }
 0x106   : > { %v619_v32 = vsel %vm568_vm1, %v549_v31, 0  ;;  %v524_v37 = vsub.f32 %v514_v34, %v522_v36 }
 0x107   : > { %v766_v33 = vpop.permute.xlu0 %765 }
 0x108   : > { %v768_v35 = vmul.f32 %v766_v33, %v1976_v6  ;;  %1681 = vmatmul.mubr.msk.bf16.vlgmr.msra.gmra.mrb[0].mxu0 %vm568_vm1, %v564_v30  ;;  %v525_v38 = vpack.c.bf16 %v524_v37, %v524_v37 }
 0x109   : > { %1685 = vmatpush3.bf16.xpose.msra.mxu0 %v619_v32  ;;  %1686 = vmatprep.mubr.msk.bf16.mxu0 %vm1858_vm0, %v1857_v10  ;;  %v747_v39 = vpop.permute.xlu1 %746  ;;  %v2103_v32 = vld [vmem:[%s1528_s20 + $0x8] sm:$0x3] }
 0x10a   : > { %770 = vrot.lane.b32.xlu1 %v768_v35, %s1859_s25  ;;  %1708 = vmatprep.subr.bf16.mxu0 %v1857_v10  ;;  %v749_v40 = vmul.f32 %v747_v39, %v1978_v7  ;;  %v701_v33 = vsel %vm699_vm7, %v2103_v32, 0 }
 0x10b   : > { %1691 = vmatpush3.bf16.msra.mxu1 %v701_v33 }
 0x10c   : > { %1696 = vmatprep.subr.bf16.mxu1 %v1857_v10 }
 0x10d   : > { %v999_v41 = vpop.permute.xlu1 %998 }
 0x10e   : > { %1008 = vrot.lane.b32.xlu1 %v1942_v0, %s1861_s9  ;;  %v2047_v42 = vmul.f32 %v999_v41, %v1976_v6 }
 0x111   : > { %v980_v51 = vpop.permute.xlu1 %979 }
 0x112   : > { %1012 = vrot.lane.b32.xlu1 %v768_v35, %s1856_s13  ;;  %v2088_v26 = vmul.f32 %v980_v51, %v1978_v7 }
 0x114   : > { %1687 = vmatmul.mubr.msk.bf16.vlgmr.msra.gmra.mrb[0].mxu0 %vm568_vm1, %v525_v38 }
 0x115   : > { %1710 = vmatprep.mubr.msk.bf16.mxu0 %vm1858_vm0, %v1857_v10  ;;  %v776_v55 = vpop.permute.xlu1 %775 }
 0x116   : > { %989 = vrot.lane.b32.xlu1 %v1947_v1, %s1861_s9  ;;  %v778_v61 = vmul.f32 %v776_v55, %v1976_v6 }
 0x119   : > { %v780_v59 = vpop.permute.xlu1 %779 }
 0x11a   : > { %993 = vrot.lane.b32.xlu1 %v749_v40, %s1856_s13  ;;  %v782_v63 = vadd.f32 %v780_v59, %v778_v61 }
 0x11c   : > { %v783_v4 = vpack.c.bf16 %v782_v63, %v782_v63 }
 0x11d   : > { %v757_v60 = vpop.permute.xlu1 %756 }
 0x11e   : > { %1003 = vrot.lane.b32.xlu1 %v2047_v42, %s1859_s25  ;;  %v759_v24 = vmul.f32 %v757_v60, %v1978_v7  ;;  %v693_v60 = vld [vmem:[#allocation4] sm:$0xf] }
 0x121   : > { %v761_v62 = vpop.permute.xlu1 %760 }
 0x122   : > { %v763_v27 = vadd.f32 %v761_v62, %v759_v24 }
 0x124   : > { %v764_v30 = vpack.c.bf16 %v763_v27, %v763_v27 }
 0x17c   : > { %v771_v3 = vpop.permute.xlu1 %770 }
 0x17d   : > { %v773_v8 = vsub.f32 %v1996_v14, %v771_v3 }
 0x17f   : > { %v774_v9 = vpack.c.bf16 %v773_v8, %v773_v8 }
 0x180   : > { %v1009_v11 = vpop.permute.xlu1 %1008 }
 0x181   : > { %v2075_v12 = vmul.f32 %v1009_v11, %v1976_v6 }
 0x184   : > { %v1013_v15 = vpop.permute.xlu1 %1012 }
 0x185   : > { %v1015_v16 = vadd.f32 %v1013_v15, %v2075_v12 }
 0x187   : > { %v1016_v17 = vpack.c.bf16 %v1015_v16, %v1015_v16 }
 0x188   : > { %v990_v18 = vpop.permute.xlu1 %989 }
 0x189   : > { %v2096_v29 = vmul.f32 %v990_v18, %v1978_v7 }
 0x18c   : > { %v994_v14 = vpop.permute.xlu1 %993 }
 0x18d   : > { %v996_v34 = vadd.f32 %v994_v14, %v2096_v29 }
 0x18f   : > { %v997_v36 = vpack.c.bf16 %v996_v34, %v996_v34 }
 0x190   : > { %v1004_v19 = vpop.permute.xlu1 %1003 }
 0x191   : > { %v1006_v20 = vsub.f32 %v778_v61, %v1004_v19  ;;  %v1869_v19 = vmov 8  }
 0x192   : > { %1811 = vset.pattern.permute.xlu0 %v1869_v19 }
 0x193   : > { %v1007_v21 = vpack.c.bf16 %v1006_v20, %v1006_v20 }
 0x1e7   : > { %v655_v52 = vpop.f32.mrb[0].mxu0 }
 0x1e8   : > { %v2066_v53 = vsel %vm666_vm4, %v655_v52, -2.3819763e+38  ;;  %v1688_v54 = vpop.f32.mrb[1].mxu0 }
 0x1e9   : > { %v658_v56 = vpop.f32.mrb[2].mxu0  ;;  %v670_v57 = vsel %vm669_vm5, %v2066_v53, -inf }
 0x1ea   : > { %v1689_v58 = vpop.f32.mrb[3].mxu0  ;;  %671 = vmax.xlane.f32.xlu0 %v670_v57 }
 0x200   : > { %751 = vrot.lane.b32.xlu0 %v749_v40, %s1859_s25 }
 0x204   : > { %788 = vrot.lane.b32.xlu0 %v783_v4, %s1864_s27 }
 0x208   : > { %840 = vrot.lane.b32.xlu0 %v774_v9, %s1865_s15 }
 0x20c   : > { %1021 = vrot.lane.b32.xlu0 %v1016_v17, %s1866_s16 }
 0x210   : > { %1073 = vrot.lane.b32.xlu0 %v1007_v21, %s1867_s17 }
 0x214   : > { %1223 = vrot.lane.b32.xlu0 %v1965_v2, %s1868_s21 }
 0x218   : > { %1204 = vrot.lane.b32.xlu0 %v1974_v5, %s1868_s21 }
 0x277   : > { %v672_v23 = vpop.xlane.xlu0 %671 }
 0x278   : > { %v2085_v25 = vmax.f32 %v2081_v22, %v672_v23 }
 0x27a   : > { %745 = vst.msk [vmem:[#allocation2] sm:$0xf] %vm691_vm6, %v2085_v25  ;;  %679 = vperm.xlu1 %1810, %v2085_v25   ;;  %v674_v57 = vsub.f32 %v2081_v22, %v2085_v25 }
 0x27b   : > { %v752_v28 = vpop.permute.xlu0 %751 }
 0x27c   : > { %v754_v31 = vsub.f32 %v1993_v13, %v752_v28  ;;  %v675_v58 = vmul.f32 1.442695, %v674_v57  ;;  %v1870_v28 = vmov 16  }
 0x27e   : > { %984 = vrot.lane.b32.xlu1 %v2088_v26, %s1859_s25  ;;  %v755_v35 = vpack.c.bf16 %v754_v31, %v754_v31 }
 0x27f   : > { %v789_v44 = vpop.permute.xlu0 %788  ;;  %1812 = vset.pattern.permute.xlu1 %v1870_v28 }
 0x280   : > { %v794_v2 = vsel %vm568_vm1, %v789_v44, 0 }
 0x281   : > { %v2173_v34 = vld [vmem:[#allocation2] sm:$0xf] }
 0x282   : > { %785 = vrot.lane.b32.xlu1 %v764_v30, %s1864_s27 }
 0x283   : > { %v841_v5 = vpop.permute.xlu0 %840 }
 0x284   : > { %v846_v48 = vsel %vm568_vm1, %v841_v5, 0 }
 0x286   : > { %837 = vrot.lane.b32.xlu1 %v755_v35, %s1865_s15 }
 0x287   : > { %v1022_v49 = vpop.permute.xlu0 %1021 }
 0x288   : > { %v1027_v51 = vsel %vm568_vm1, %v1022_v49, 0 }
 0x28a   : > { %1018 = vrot.lane.b32.xlu1 %v997_v36, %s1866_s16 }
 0x2f9   : > { %v680_v13 = vpop.permute.xlu1 %679 }
 0x2fa   : > { %v682_v37 = vsub.f32 %v2066_v53, %v680_v13  ;;  %v1074_v53 = vpop.permute.xlu0 %1073 }
 0x2fb   : > { %v1079_v55 = vsel %vm568_vm1, %v1074_v53, 0 }
 0x2fc   : > { %v683_v38 = vmul.f32 1.442695, %v682_v37 }
 0x2fd   : > { %v985_v39 = vpop.permute.xlu1 %984 }
 0x2fe   : > { %1814 = vpow2.f32 %v683_v38  ;;  %v987_v40 = vsub.f32 %v759_v24, %v985_v39  ;;  %v1224_v14 = vpop.permute.xlu0 %1223 }
 0x2ff   : > { %1816 = vpow2.f32 %v675_v58 }
 0x300   : > { %v988_v41 = vpack.c.bf16 %v987_v40, %v987_v40 }
 0x301   : > { %v786_v46 = vpop.permute.xlu1 %785 }
 0x302   : > { %1070 = vrot.lane.b32.xlu1 %v988_v41, %s1867_s17  ;;  %v1205_v20 = vpop.permute.xlu0 %1204 }
 0x303   : > { %v1207_v21 = vmul.f32 %v1205_v20, %v1978_v7 }
 0x305   : > { %v838_v52 = vpop.permute.xlu1 %837 }
 0x308   : > { %v2118_v43 = vpop.eup %1814 }
 0x309   : > { %v695_v45 = vpack.c.bf16 %v2118_v43, %v2118_v43  ;;  %v1019_v54 = vpop.permute.xlu1 %1018  ;;  %v2147_v59 = vpop.eup %1816 }
 0x30a   : > { %v694_v61 = vmul.f32 %v2147_v59, %v693_v60 }
 0x30b   : > { %1693 = vmatmul.mubr.msk.bf16.vlgmr.msra.gmra.mrb[0].mxu1 %vm568_vm1, %v695_v45 }
 0x30c   : > { %1697 = vmatpush3.bf16.xpose.msra.mxu1 %v794_v2  ;;  %1698 = vmatprep.mubr.msk.bf16.mxu1 %vm1858_vm0, %v1857_v10 }
 0x30d   : > { %1702 = vmatprep.subr.bf16.mxu1 %v1857_v10 }
 0x313   : > { %1699 = vmatmul.mubr.msk.bf16.vlgmr.msra.gmra.mrb[4].mxu1 %vm568_vm1, %v786_v46 }
 0x314   : > { %1703 = vmatpush3.bf16.xpose.msra.mxu1 %v846_v48  ;;  %1704 = vmatprep.mubr.msk.bf16.mxu1 %vm1858_vm0, %v1857_v10 }
 0x315   : > { %1714 = vmatprep.subr.bf16.mxu1 %v1857_v10 }
 0x31f   : > { %1705 = vmatmul.mubr.msk.bf16.vlgmr.msra.gmra.mrb[4].mxu1 %vm568_vm1, %v838_v52 }
 0x320   : > { %1715 = vmatpush3.bf16.xpose.msra.mxu1 %v1027_v51  ;;  %1716 = vmatprep.mubr.msk.bf16.mxu1 %vm1858_vm0, %v1857_v10 }
 0x321   : > { %1720 = vmatprep.subr.bf16.mxu1 %v1857_v10 }
 0x327   : > { %1717 = vmatmul.mubr.msk.bf16.vlgmr.msra.gmra.mrb[8].mxu1 %vm568_vm1, %v1019_v54 }
 0x328   : > { %1721 = vmatpush3.bf16.xpose.msra.mxu1 %v1079_v55  ;;  %1722 = vmatprep.mubr.msk.bf16.mxu1 %vm1858_vm0, %v1857_v10 }
 0x329   : > { %1744 = vmatprep.subr.bf16.mxu1 %v1857_v10 }
 0x374   : > { %v1071_v56 = vpop.permute.xlu1 %1070 }
 0x375   : > { %1723 = vmatmul.mubr.msk.bf16.vlgmr.msra.gmra.mrb[8].mxu1 %vm568_vm1, %v1071_v56 }
 0x376   : > { %1746 = vmatprep.mubr.msk.bf16.mxu1 %vm1858_vm0, %v1857_v10 }
 0x3de   : > { %v737_v62 = vpop.f32.mrb[0].mxu1 }
 0x3df   : > { %v743_v63 = vadd.f32 %v737_v62, %v694_v61  ;;  %v1694_v3 = vpop.f32.mrb[1].mxu1 }
 0x3e0   : > { %v740_v4 = vpop.f32.mrb[2].mxu1 }
 0x3e1   : > { %744 = vst.msk [vmem:[#allocation4] sm:$0xf] %vm691_vm6, %v743_v63  ;;  %v1695_v8 = vpop.f32.mrb[3].mxu1 }
 0x3f2   : > { %v882_v9 = vpop.f32.mrb[4].mxu1 }
 0x3f3   : > { %v2153_v11 = vsel %vm666_vm4, %v882_v9, -2.3819763e+38  ;;  %v1706_v15 = vpop.f32.mrb[5].mxu1 }
 0x3f4   : > { %v885_v16 = vpop.f32.mrb[6].mxu1  ;;  %v890_v17 = vsel %vm669_vm5, %v2153_v11, -inf }
 0x3f5   : > { %891 = vmax.xlane.f32.xlu1 %v890_v17  ;;  %v1707_v18 = vpop.f32.mrb[7].mxu1 }
 0x406   : > { %1237 = vrot.lane.b32.xlu1 %v2047_v42, %s1856_s13 }
 0x40a   : > { %1214 = vrot.lane.b32.xlu1 %v1947_v1, %s1868_s21  ;;  %v1226_v1 = vmul.f32 %v1224_v14, %v1976_v6 }
 0x40e   : > { %1218 = vrot.lane.b32.xlu1 %v2088_v26, %s1856_s13  ;;  %v1871_v26 = vmov 1983009808   ;;  %s1872_s13 = smov 100  }
 0x40f   : > { %v918_v30 = vunpack.c.l.s4 %v1871_v26 }
 0x411   : > { %v919_v31 = vunpack.c.0.s8 %v918_v30  ;;  %v1874_v30 = vmov 24  }
 0x412   : > { %1209 = vrot.lane.b32.xlu1 %v1207_v21, %s1859_s25 }
 0x413   : > { %v922_v33 = vsub.s32 %v919_v31, %v2058_v47 }
 0x415   : > { %v2179_v13 = vrot.slane %v2103_v32, %v922_v33 }
 0x448   : > { %v1115_v22 = vpop.f32.mrb[8].mxu1 }
 0x449   : > { %v1121_v23 = vsel %vm666_vm4, %v1115_v22, -2.3819763e+38  ;;  %v1724_v24 = vpop.f32.mrb[9].mxu1 }
 0x44a   : > { %v1118_v25 = vpop.f32.mrb[10].mxu1  ;;  %v1123_v27 = vsel %vm669_vm5, %v1121_v23, -inf }
 0x44b   : > { %1124 = vmax.xlane.f32.xlu0 %v1123_v27  ;;  %v1725_v42 = vpop.f32.mrb[11].mxu1 }
 0x461   : > { %1233 = vrot.lane.b32.xlu0 %v1942_v0, %s1868_s21 }
 0x465   : > { %1228 = vrot.lane.b32.xlu0 %v1226_v1, %s1859_s25 }
 0x482   : > { %v892_v35 = vpop.xlane.xlu1 %891 }
 0x483   : > { %v2176_v36 = vmax.f32 %v2173_v34, %v892_v35 }
 0x485   : > { %978 = vst.msk [vmem:[#allocation2] sm:$0xf] %vm911_vm8, %v2176_v36  ;;  %899 = vperm.xlu0 %1811, %v2176_v36   ;;  %v894_v31 = vsub.f32 %v2173_v34, %v2176_v36  ;;  %v687_v34 = vsel %vm669_vm5, %v2118_v43, 0.0  ;;  %v685_v43 = vld [vmem:[#allocation3] sm:$0xf] }
 0x486   : > { %v1238_v0 = vpop.permute.xlu1 %1237 }
 0x487   : > { %v895_v33 = vmul.f32 1.442695, %v894_v31 }
 0x489   : > { %1149 = vrot.lane.b32.xlu0 %v2179_v13, %s1867_s17 }
 0x48a   : > { %v1215_v47 = vpop.permute.xlu1 %1214  ;;  %1813 = vset.pattern.permute.xlu0 %v1874_v30 }
 0x48b   : > { %v1217_v37 = vmul.f32 %v1215_v47, %v1978_v7 }
 0x48c   : > { %v2189_v45 = vld [vmem:[#allocation2] sm:$0xf] }
 0x48e   : > { %v1219_v38 = vpop.permute.xlu1 %1218 }
 0x48f   : > { %v1221_v39 = vadd.f32 %v1219_v38, %v1217_v37 }
 0x491   : > { %v1222_v40 = vpack.c.bf16 %v1221_v39, %v1221_v39  ;;  %v913_v39 = vld [vmem:[#allocation4] sm:$0xf] }
 0x492   : > { %v1210_v41 = vpop.permute.xlu1 %1209 }
 0x493   : > { %v1212_v44 = vsub.f32 %v2096_v29, %v1210_v41  ;;  %1243 = vrot.lane.b32.xlu0 %v1222_v40, %s1872_s13 }
 0x495   : > { %v1213_v32 = vpack.c.bf16 %v1212_v44, %v1212_v44 }
 0x497   : > { %1295 = vrot.lane.b32.xlu0 %v1213_v32, %s1873_s22 }
 0x4d8   : > { %v1125_v2 = vpop.xlane.xlu0 %1124 }
 0x4d9   : > { %v2192_v5 = vmax.f32 %v2189_v45, %v1125_v2 }
 0x4db   : > { %1203 = vst.msk [vmem:[#allocation2] sm:$0xf] %vm1144_vm9, %v2192_v5  ;;  %1132 = vperm.xlu1 %1812, %v2192_v5  }
 0x4dc   : > { %v1234_v7 = vpop.permute.xlu0 %1233 }
 0x4dd   : > { %v1236_v29 = vmul.f32 %v1234_v7, %v1976_v6 }
 0x4df   : > { %v1240_v46 = vadd.f32 %v1238_v0, %v1236_v29  ;;  %924 = vrot.lane.b32.xlu1 %v2179_v13, %s1865_s15 }
 0x4e0   : > { %v1229_v48 = vpop.permute.xlu0 %1228 }
 0x4e1   : > { %v1241_v49 = vpack.c.bf16 %v1240_v46, %v1240_v46  ;;  %v1231_v51 = vsub.f32 %v2075_v12, %v1229_v48 }
 0x4e2   : > { %v1347_v50 = vld [vmem:[#allocation2] sm:$0xf] }
 0x4e3   : > { %1246 = vrot.lane.b32.xlu1 %v1241_v49, %s1872_s13  ;;  %v1232_v52 = vpack.c.bf16 %v1231_v51, %v1231_v51  ;;  %v686_v51 = vmul.f32 %v2147_v59, %v685_v43 }
 0x4e7   : > { %1298 = vrot.lane.b32.xlu1 %v1232_v52, %s1873_s22 }
 0x504   : > { %v900_v53 = vpop.permute.xlu0 %899 }
 0x505   : > { %v902_v54 = vsub.f32 %v2153_v11, %v900_v53 }
 0x507   : > { %v903_v55 = vmul.f32 1.442695, %v902_v54  ;;  %v1127_v54 = vsub.f32 %v2189_v45, %v2192_v5 }
 0x508   : > { %v1150_v62 = vpop.permute.xlu0 %1149 }
 0x509   : > { %1818 = vpow2.f32 %v903_v55  ;;  %v1155_v12 = vsel %vm699_vm7, %v1150_v62, 0  ;;  %v1128_v55 = vmul.f32 1.442695, %v1127_v54 }
 0x50c   : > { %v1244_v15 = vpop.permute.xlu0 %1243 }
 0x510   : > { %v1296_v17 = vpop.permute.xlu0 %1295 }
 0x513   : > { %v1819_v58 = vpop.eup %1818 }
 0x514   : > { %v915_v63 = vpack.c.bf16 %v1819_v58, %v1819_v58  ;;  %v907_v26 = vsel %vm669_vm5, %v1819_v58, 0.0 }
 0x55a   : > { %v1133_v56 = vpop.permute.xlu1 %1132 }
 0x55b   : > { %v1135_v57 = vsub.f32 %v1121_v23, %v1133_v56 }
 0x55d   : > { %v1136_v6 = vmul.f32 1.442695, %v1135_v57 }
 0x55e   : > { %v925_v60 = vpop.permute.xlu1 %924 }
 0x55f   : > { %1820 = vpow2.f32 %v1136_v6  ;;  %v930_v61 = vsel %vm699_vm7, %v925_v60, 0 }
 0x560   : > { %1709 = vmatpush3.bf16.msra.mxu0 %v930_v61  ;;  %1822 = vpow2.f32 %v895_v33 }
 0x561   : > { %1726 = vmatprep.subr.bf16.mxu0 %v1857_v10 }
 0x562   : > { %v1247_v4 = vpop.permute.xlu1 %1246 }
 0x563   : > { %1711 = vmatmul.mubr.msk.bf16.vlgmr.msra.gmra.mrb[4].mxu0 %vm568_vm1, %v915_v63  ;;  %v1252_v9 = vsel %vm568_vm1, %v1247_v4, 0 }
 0x564   : > { %1727 = vmatpush3.bf16.msra.mxu0 %v1155_v12  ;;  %1728 = vmatprep.mubr.msk.bf16.mxu0 %vm1858_vm0, %v1857_v10 }
 0x565   : > { %1732 = vmatprep.subr.bf16.mxu0 %v1857_v10 }
 0x566   : > { %v1299_v11 = vpop.permute.xlu1 %1298 }
 0x567   : > { %v1304_v16 = vsel %vm568_vm1, %v1299_v11, 0 }
 0x569   : > { %v1821_v3 = vpop.eup %1820 }
 0x56a   : > { %v1148_v8 = vpack.c.bf16 %v1821_v3, %v1821_v3  ;;  %v1823_v37 = vpop.eup %1822  ;;  %v1140_v36 = vsel %vm669_vm5, %v1821_v3, 0.0 }
 0x56b   : > { %v914_v40 = vmul.f32 %v1823_v37, %v913_v39 }
 0x56c   : > { %1729 = vmatmul.mubr.msk.bf16.vlgmr.msra.gmra.mrb[8].mxu0 %vm568_vm1, %v1148_v8 }
 0x56d   : > { %1733 = vmatpush3.bf16.xpose.msra.mxu0 %v1252_v9  ;;  %1734 = vmatprep.mubr.msk.bf16.mxu0 %vm1858_vm0, %v1857_v10 }
 0x56e   : > { %1738 = vmatprep.subr.bf16.mxu0 %v1857_v10 }
 0x574   : > { %1735 = vmatmul.mubr.msk.bf16.vlgmr.msra.gmra.mrb[12].mxu0 %vm568_vm1, %v1244_v15 }
 0x575   : > { %1739 = vmatpush3.bf16.xpose.msra.mxu0 %v1304_v16  ;;  %1740 = vmatprep.mubr.msk.bf16.mxu0 %vm1858_vm0, %v1857_v10 }
 0x580   : > { %1741 = vmatmul.mubr.msk.bf16.vlgmr.msra.gmra.mrb[12].mxu0 %vm568_vm1, %v1296_v17 }
 0x636   : > { %v966_v18 = vpop.f32.mrb[4].mxu0 }
 0x637   : > { %v1712_v14 = vpop.f32.mrb[5].mxu0 }
 0x638   : > { %v969_v19 = vpop.f32.mrb[6].mxu0 }
 0x639   : > { %v1713_v20 = vpop.f32.mrb[7].mxu0 }
 0x63f   : > { %v1191_v21 = vpop.f32.mrb[8].mxu0 }
 0x640   : > { %v1730_v22 = vpop.f32.mrb[9].mxu0 }
 0x641   : > { %v1194_v23 = vpop.f32.mrb[10].mxu0 }
 0x642   : > { %v1731_v24 = vpop.f32.mrb[11].mxu0 }
 0x653   : > { %v1340_v25 = vpop.f32.mrb[12].mxu0 }
 0x654   : > { %v1346_v27 = vsel %vm666_vm4, %v1340_v25, -2.3819763e+38  ;;  %v1742_v42 = vpop.f32.mrb[13].mxu0 }
 0x655   : > { %v1343_v28 = vpop.f32.mrb[14].mxu0  ;;  %v1348_v1 = vsel %vm669_vm5, %v1346_v27, -inf }
 0x656   : > { %1349 = vmax.xlane.f32.xlu1 %v1348_v1  ;;  %v1743_v10 = vpop.f32.mrb[15].mxu0 }
 0x65a   : > { %908 = vadd.xlane.f32.xlu1 %v907_v26 }
 0x66b   : > { %973 = vrot.lane.b32.xlu1 %v966_v18, %s1860_s26  ;;  %s493_s26 = scalar_lea.vmem %s2268_s8, %s1956_s14 }
 0x6e3   : > { %v1350_v35 = vpop.xlane.xlu1 %1349 }
 0x6e4   : > { %v1351_v0 = vmax.f32 %v1347_v50, %v1350_v35 }
 0x6e6   : > { %v1352_v47 = vsub.f32 %v1347_v50, %v1351_v0  ;;  %1428 = vst.msk [vmem:[#allocation2] sm:$0xf] %vm1369_vm10, %v1351_v0  ;;  %1357 = vperm.xlu0 %1813, %v1351_v0  }
 0x6e7   : > { %v909_v38 = vpop.xlane.xlu1 %908 }
 0x6e8   : > { %v1353_v59 = vmul.f32 1.442695, %v1352_v47 }
 0x6ea   : > { %1374 = vrot.lane.b32.xlu0 %v2179_v13, %s1873_s22 }
 0x6eb   : > { %v974_v41 = vpop.permute.xlu1 %973 }
 0x6ec   : > { %v976_v44 = vadd.f32 %v974_v41, %v914_v40 }
 0x6ee   : > { %977 = vst.msk [vmem:[#allocation4] sm:$0xf] %vm911_vm8, %v976_v44 }
 0x6f5   : > { %v1146_v5 = vld [vmem:[#allocation4] sm:$0xf] }
 0x709   : > { %688 = vadd.xlane.f32.xlu0 %v687_v34 }
 0x70d   : > { %1141 = vadd.xlane.f32.xlu0 %v1140_v36 }
 0x765   : > { %v1358_v32 = vpop.permute.xlu0 %1357 }
 0x766   : > { %v1360_v2 = vsub.f32 %v1346_v27, %v1358_v32 }
 0x768   : > { %v1361_v7 = vmul.f32 1.442695, %v1360_v2 }
 0x769   : > { %v1375_v29 = vpop.permute.xlu0 %1374 }
 0x76a   : > { %1824 = vpow2.f32 %v1361_v7  ;;  %v1380_v46 = vsel %vm699_vm7, %v1375_v29, 0 }
 0x76b   : > { %1745 = vmatpush3.bf16.msra.mxu1 %v1380_v46  ;;  %1826 = vpow2.f32 %v1128_v55 }
 0x76c   : > { %1828 = vpow2.f32 %v1353_v59 }
 0x774   : > { %v1825_v13 = vpop.eup %1824 }
 0x775   : > { %v1365_v48 = vsel %vm669_vm5, %v1825_v13, 0.0  ;;  %v1373_v49 = vpack.c.bf16 %v1825_v13, %v1825_v13  ;;  %v1827_v58 = vpop.eup %1826 }
 0x776   : > { %1366 = vadd.xlane.f32.xlu0 %v1365_v48  ;;  %v1829_v3 = vpop.eup %1828  ;;  %v1147_v9 = vmul.f32 %v1827_v58, %v1146_v5 }
 0x777   : > { %1747 = vmatmul.mubr.msk.bf16.vlgmr.msra.gmra.mrb[12].mxu1 %vm568_vm1, %v1373_v49 }
 0x78c   : > { %1198 = vrot.lane.b32.xlu0 %v1191_v21, %s1868_s21 }
 0x796   : > { %v689_v52 = vpop.xlane.xlu0 %688 }
 0x797   : > { %v690_v53 = vadd.f32 %v689_v52, %v686_v51 }
 0x799   : > { %692 = vst.msk [vmem:[#allocation3] sm:$0xf] %vm691_vm6, %v690_v53 }
 0x79a   : > { %v1142_v62 = vpop.xlane.xlu0 %1141 }
 0x7a0   : > { %v905_v56 = vld [vmem:[#allocation3] sm:$0xf] }
 0x7a1   : > { %v906_v57 = vmul.f32 %v1823_v37, %v905_v56 }
 0x7a3   : > { %v910_v6 = vadd.f32 %v909_v38, %v906_v57 }
 0x7a5   : > { %912 = vst.msk [vmem:[#allocation3] sm:$0xf] %vm911_vm8, %v910_v6 }
 0x7ac   : > { %v1138_v60 = vld [vmem:[#allocation3] sm:$0xf] }
 0x7ad   : > { %v1139_v61 = vmul.f32 %v1827_v58, %v1138_v60 }
 0x7af   : > { %v1143_v12 = vadd.f32 %v1142_v62, %v1139_v61 }
 0x7b1   : > { %1145 = vst.msk [vmem:[#allocation3] sm:$0xf] %vm1144_vm9, %v1143_v12 }
 0x7b8   : > { %v1363_v63 = vld [vmem:[#allocation3] sm:$0xf] }
 0x7b9   : > { %v1364_v4 = vmul.f32 %v1829_v3, %v1363_v63 }
 0x803   : > { %v1367_v45 = vpop.xlane.xlu0 %1366 }
 0x804   : > { %v1368_v8 = vadd.f32 %v1367_v45, %v1364_v4 }
 0x806   : > { %1370 = vst.msk [vmem:[#allocation3] sm:$0xf] %vm1369_vm10, %v1368_v8 }
 0x807   : > { %v1199_v11 = vpop.permute.xlu0 %1198 }
 0x808   : > { %v1201_v15 = vadd.f32 %v1199_v11, %v1147_v9 }
 0x80a   : > { %1202 = vst.msk [vmem:[#allocation4] sm:$0xf] %vm1144_vm9, %v1201_v15 }
 0x80d   : > { %v1433_v20 = vld [vmem:[#allocation3] sm:$0xf] }
 0x80e   : > { %1830 = vrcp.f32 %v1433_v20 }
 0x811   : > { %v1371_v19 = vld [vmem:[#allocation4] sm:$0xf] }
 0x812   : > { %v1372_v21 = vmul.f32 %v1829_v3, %v1371_v19 }
 0x818   : > { %v1831_v24 = vpop.eup %1830 }
 0x84a   : > { %v1416_v16 = vpop.f32.mrb[12].mxu1 }
 0x84b   : > { %1423 = vrot.lane.b32.xlu1 %v1416_v16, %s1875_s23  ;;  %v1748_v17 = vpop.f32.mrb[13].mxu1 }
 0x84c   : > { %v1419_v18 = vpop.f32.mrb[14].mxu1 }
 0x84d   : > { %v1749_v14 = vpop.f32.mrb[15].mxu1 }
 0x8bd   : > { %v1424_v22 = vpop.permute.xlu1 %1423 }
 0x8be   : > { %v1426_v23 = vadd.f32 %v1424_v22, %v1372_v21 }
 0x8c0   : > { %1427 = vst.msk [vmem:[#allocation4] sm:$0xf] %vm1369_vm10, %v1426_v23 }
 0x8c7   : > { %v1432_v25 = vld [vmem:[#allocation4] sm:$0xf] }
 0x8c8   : > { %v1435_v27 = vmul.f32 %v1831_v24, %v1432_v25 }
 0x8ca   : > { %v1436_v42 = vpack.c.bf16 %v1435_v27, %v1435_v27 }
 0x8cc   : > { %1438 = vst.msk [vmem:[%s493_s26] sm:$0x3] %vm1437_vm11, %v1436_v42 }
 0x8cd PF: > { %s18_s29 = sadd.s32 1, %s1854_s29   ;;  %s2269_s27 = smov %s1850_s28 }
 0x8ce   : > { %p15_p5 = scmp.ge.s32.totalorder %s18_s29, 4   ;;  %s2270_s28 = smov %s2272_s30 }
 0x8d0   :  { %17 = sbr.rel (!%p15_p5) target bundleno = 2 (0x2), region = 111 }

// kernel: body.359
= control target key start
LH: loop header
LB: loop body
LE: loop exit
PB: predicated region body
PF: predicated region fallthrough
CT: control target
= control target key end

     0   :  { %s111_s0 = inlined_call_operand.vmem [shape: bf16[8,32], index: 0, kind: input, shape index: {}]   ;;  %s112_s1 = inlined_call_operand.vmem [shape: f32[1,32], index: 1, kind: input, shape index: {}]   ;;  %s113_s2 = inlined_call_operand.hbm [shape: bf16[8,32], index: 2, kind: output, shape index: {}]  }
   0x1   :  { %v12_v0 = vld [vmem:[%s111_s0] sm:$0xf] }
   0x2   :  { %7 = vsyncpa [#allocation3], 0  ;;  %v13_v1 = vunpack.c.l.bf16 %v12_v0  ;;  %vm15_vm0 = vcmask 261120   ;;  %v49_v8 = vld [vmem:[%s112_s1] ss:$0 sm:$0xff]  ;;  %s77_s13 = smov [#allocation2]  }
   0x3   :  { %s41_s14 = sshll.u32 %s77_s13, 4  ;;  %vm33_vm1 = vcmask 257024   ;;  %s42_s14 = int_to_ptr.vmem [resolvable:$true] %s41_s14 }
   0x4   :  { %v14_v2 = vmul.f32 %v13_v1, %v13_v1  ;;  %s53_s0 = scalar_lea.vmem %s42_s14, 64  ;;  %p58_p1 = scmp.lt.s32.totalorder %s42_s14, %s42_s14 }
   0x5   :  { %p54_p0 = scmp.ne.s32.totalorder %s42_s14, %s53_s0  ;;  %p59_p2 = scmp.lt.s32.totalorder %s53_s0, %s53_s0 }
   0x6   :  { %v16_v3 = vsel %vm15_vm0, %v14_v2, 0.0 }
   0x7   :  { %17 = vadd.xlane.f32.xlu0 %v16_v3  ;;  %p60_p3 = por %p59_p2, %p58_p1 }
   0x9   :  { %p61_p4 = pnand %p60_p3, %p54_p0 }
  0x94   :  { %v18_v4 = vpop.xlane.xlu0 %17 }
  0x95   :  { %v20_v5 = vmul.f32 0.03125, %v18_v4 }
  0x97   :  { %v21_v6 = vadd.f32 1e-06, %v20_v5 }
  0x99   :  { %51 = vrsqrt.f32 %v21_v6 }
  0xa3   :  { %v52_v7 = vpop.eup %51 }
  0xa4   :  { %v23_v9 = vmul.f32 %v52_v7, %v13_v1 }
  0xa6   :  { %v31_v10 = vmul.f32 %v49_v8, %v23_v9 }
  0xa8   :  { %v32_v11 = vpack.c.bf16 %v31_v10, %v31_v10 }
  0xaa   :  { %34 = vst.msk [vmem:[#allocation2] sm:$0xf] %vm33_vm1, %v32_v11 }
  0xab   :  { %64 = shalt.err (!%p61_p4)
}
  0xac   :  { %s65_s17 = scalar_lea.hbm %s113_s2, 64 }
  0xad   :  { %p66_p5 = scmp.ne.s32.totalorder %s113_s2, %s65_s17  ;;  %p69_p6 = scmp.lt.u32.totalorder %s65_s17, %s113_s2 }
  0xaf   :  { %p71_p7 = pnand %p69_p6, %p66_p5 }
  0xb1   :  { %74 = shalt.err (!%p71_p7)
}
  0xb2   :  { %44 = dma.vmem_to_hbm [thread:$0]  %s42_s14, 64, %s113_s2, [#allocation3]  }
  0xb3   :  { %75 = dma.done.wait [#allocation3], 64  }
  0xb4   :  { %76 = vsyncadd [#allocation3], 4294967232 }
  0xb5   :  { %48 = vsyncpa [#allocation3], 1 }

</bundles_post_ra>
